<compile_context>
chip_gen: v6e
topology: v6e:2x2x1
jax: 0.10.0
libtpu: 0.0.40
codegen_flags: <defaults>
</compile_context>

<pallas_src>
import functools
import math

import jax
import jax.numpy as jnp
from jax.experimental import pallas as pl
from jax.experimental.pallas import tpu as pltpu


# ---------------------------------------------------------------------------
# Kernel
# ---------------------------------------------------------------------------
def _stage_block_kernel(eps,
                        cls_ref, xm_ref, lng_ref, lnb_ref,
                        wred_ref, wcls_ref, bcls_ref, o_ref):
    """Fused PatchMerging (LayerNorm + Linear) + cls-token Linear.

    cls_ref : (tb, C)             cls tokens for this block's images
    xm_ref  : (tb * M', 4C)       2x2-merged spatial tokens (row-major per image)
    o_ref   : (tb, 1 + M', out_dim)
    """
    tb = cls_ref.shape[0]
    n_merged = o_ref.shape[1] - 1
    out_dim = o_ref.shape[2]

    # ---- merged spatial tokens: LayerNorm(4C) -> Linear(4C -> out, no bias) ----
    xm = xm_ref[...].astype(jnp.float32)
    mean = jnp.mean(xm, axis=-1, keepdims=True)
    var = jnp.mean(jnp.square(xm - mean), axis=-1, keepdims=True)
    y = (xm - mean) * jax.lax.rsqrt(var + eps)
    y = y * lng_ref[...].astype(jnp.float32) + lnb_ref[...].astype(jnp.float32)
    red = jnp.dot(y.astype(wred_ref.dtype), wred_ref[...],
                  preferred_element_type=jnp.float32)            # (tb*M', out_dim)

    # ---- cls tokens: plain Linear(C -> out, bias=True) ----
    cls = cls_ref[...].astype(wcls_ref.dtype)
    cls_out = jnp.dot(cls, wcls_ref[...], preferred_element_type=jnp.float32)
    cls_out = cls_out + bcls_ref[...].astype(jnp.float32)        # (tb, out_dim)

    # ---- stitch [cls ; merged] per image and write ONE full-block store ----
    out_full = jnp.concatenate(
        [cls_out.reshape(tb, 1, out_dim),
         red.reshape(tb, n_merged, out_dim)], axis=1)            # (tb, 1+M', out)
    o_ref[...] = out_full.astype(o_ref.dtype)


# ---------------------------------------------------------------------------
# Wrapper
# ---------------------------------------------------------------------------
def stage_block_forward(x, params, *, block_images=None, max_block_rows=512):
    """StageBlock (downsample=True path): (B, 1+H*W, C) -> (B, 1+(H/2)*(W/2), out_dim)."""
    B, N, C = x.shape
    H = W = int(math.sqrt(N - 1))
    assert H * W == N - 1 and H % 2 == 0 and W % 2 == 0, (H, W, N)
    H2, W2 = H // 2, W // 2
    n_merged = H2 * W2
    C4 = 4 * C
    out_dim = params["w_red"].shape[1]
    eps = 1e-5

    # 2x2 neighborhood gather, matching torch:
    #   reshape(B,H//2,2,W//2,2,C).permute(0,1,3,4,2,5).flatten(3)
    # Single fused XLA copy taken straight from the (B, N, C) token tensor.
    x_m = (x[:, 1:, :]
           .reshape(B, H2, 2, W2, 2, C)
           .transpose(0, 1, 3, 4, 2, 5)
           .reshape(B * n_merged, C4))
    x_cls = x[:, 0, :]                                            # (B, C), tiny

    # Images per grid step: divide B, keep <= max_block_rows merged rows per step,
    # and keep second-minor block dims TPU-friendly (multiple of 8 or full dim).
    if block_images is None:
        block_images = B
        for tb_c in range(B, 0, -1):
            if B % tb_c == 0 and tb_c * n_merged <= max_block_rows and (
                    tb_c == B or tb_c % 8 == 0):
                block_images = tb_c
                break
    tb = block_images
    assert B % tb == 0, (B, tb)
    assert tb == B or (tb % 8 == 0 and (tb * n_merged) % 8 == 0), (tb, n_merged)
    grid = (B // tb,)
    rows = tb * n_merged

    flops = 2 * B * n_merged * C4 * out_dim + 2 * B * C * out_dim
    transcendentals = B * n_merged                                # rsqrt per row
    bytes_accessed = 4 * (x_m.size + x_cls.size + B * (1 + n_merged) * out_dim
                          + params["w_red"].size + params["w_cls"].size
                          + 2 * C4 + out_dim)

    kernel = functools.partial(_stage_block_kernel, eps)

    out = pl.pallas_call(
        kernel,
        out_shape=jax.ShapeDtypeStruct((B, 1 + n_merged, out_dim), x.dtype),
        grid=grid,
        in_specs=[
            pl.BlockSpec((tb, C), lambda i: (i, 0)),              # cls tokens
            pl.BlockSpec((rows, C4), lambda i: (i, 0)),           # merged patches
            pl.BlockSpec((1, C4), lambda i: (0, 0)),              # LN gamma
            pl.BlockSpec((1, C4), lambda i: (0, 0)),              # LN beta
            pl.BlockSpec((C4, out_dim), lambda i: (0, 0)),        # reduction weight
            pl.BlockSpec((C, out_dim), lambda i: (0, 0)),         # cls proj weight
            pl.BlockSpec((1, out_dim), lambda i: (0, 0)),         # cls proj bias
        ],
        out_specs=pl.BlockSpec((tb, 1 + n_merged, out_dim), lambda i: (i, 0, 0)),
        compiler_params=pltpu.CompilerParams(dimension_semantics=("parallel",)),
        cost_estimate=pl.CostEstimate(flops=int(flops),
                                      transcendentals=int(transcendentals),
                                      bytes_accessed=int(bytes_accessed)),
    )(x_cls, x_m,
      params["ln_g"].reshape(1, C4), params["ln_b"].reshape(1, C4),
      params["w_red"], params["w_cls"], params["b_cls"].reshape(1, out_dim))

    # TODO(synk): self.blocks (CAEBlock / Linear_Mlp) not defined in the reference
    # source; applied as identity.
    return out


# ---------------------------------------------------------------------------
# Pure-JAX reference (for correctness check)
# ---------------------------------------------------------------------------
def reference_forward(x, params):
    B, N, C = x.shape
    H = W = int(math.sqrt(N - 1))
    cls = x[:, 0:1, :]
    s = x[:, 1:, :].reshape(B, H // 2, 2, W // 2, 2, C).transpose(0, 1, 3, 4, 2, 5)
    s = s.reshape(B, (H // 2) * (W // 2), 4 * C)
    mean = s.mean(-1, keepdims=True)
    var = ((s - mean) ** 2).mean(-1, keepdims=True)
    s = (s - mean) * jax.lax.rsqrt(var + 1e-5) * params["ln_g"] + params["ln_b"]
    s = s @ params["w_red"]
    c = cls @ params["w_cls"] + params["b_cls"]
    return jnp.concatenate((c, s), axis=1)


# ---------------------------------------------------------------------------
# Main
# ---------------------------------------------------------------------------
if __name__ == "__main__":
    jax.config.update("jax_default_matmul_precision", "highest")

    dim, out_dim = 64, 128    # out_dim multiple of 128 -> lane-dense output stores
    B, H, W = 16, 8, 8
    N = 1 + H * W

    key = jax.random.PRNGKey(0)
    ks = jax.random.split(key, 6)

    params = {
        "ln_g": 1.0 + 0.02 * jax.random.normal(ks[0], (4 * dim,), jnp.float32),
        "ln_b": 0.02 * jax.random.normal(ks[1], (4 * dim,), jnp.float32),
        "w_red": jax.random.normal(ks[2], (4 * dim, out_dim), jnp.float32)
        / math.sqrt(4 * dim),
        "w_cls": jax.random.normal(ks[3], (dim, out_dim), jnp.float32)
        / math.sqrt(dim),
        "b_cls": 0.02 * jax.random.normal(ks[4], (out_dim,), jnp.float32),
    }

    x = jax.random.normal(ks[5], (B, N, dim), jnp.float32)

    # Default tiling (whole batch per grid step) and a forced multi-step grid.
    out_a = jax.block_until_ready(stage_block_forward(x, params))
    out_b = jax.block_until_ready(stage_block_forward(x, params, block_images=8))

    ref = reference_forward(x, params)
    expected_shape = (B, 1 + (H // 2) * (W // 2), out_dim)
    for out in (out_a, out_b):
        assert out.shape == expected_shape, out.shape
        assert jnp.allclose(out, ref, atol=1e-4, rtol=1e-4), float(
            jnp.max(jnp.abs(out - ref)))

    print("KERNEL_OK")
</pallas_src>

<mosaic_0001>
module attributes {stable_mosaic.version = 11 : i64} {
  func.func @_stage_block_kernel(%arg0: i32, %arg1: memref<16x64xf32, #tpu.memory_space<vmem>>, %arg2: memref<256x256xf32, #tpu.memory_space<vmem>>, %arg3: memref<1x256xf32, #tpu.memory_space<vmem>>, %arg4: memref<1x256xf32, #tpu.memory_space<vmem>>, %arg5: memref<256x128xf32, #tpu.memory_space<vmem>>, %arg6: memref<64x128xf32, #tpu.memory_space<vmem>>, %arg7: memref<1x128xf32, #tpu.memory_space<vmem>>, %arg8: memref<16x17x128xf32, #tpu.memory_space<vmem>>) attributes {dimension_semantics = [#tpu.dimension_semantics<parallel>], iteration_bounds = array<i64: 1>, scalar_prefetch = 0 : i64, scratch_operands = 0 : i64, tpu.core_type = #tpu.core_type<tc>, window_params = [{transform_indices = @transform_0, window_bounds = array<i64: 16, 64>}, {transform_indices = @transform_1, window_bounds = array<i64: 256, 256>}, {pipeline_mode = #tpu.pipeline_mode<synchronous>, transform_indices = @transform_2, window_bounds = array<i64: 1, 256>}, {pipeline_mode = #tpu.pipeline_mode<synchronous>, transform_indices = @transform_3, window_bounds = array<i64: 1, 256>}, {pipeline_mode = #tpu.pipeline_mode<synchronous>, transform_indices = @transform_4, window_bounds = array<i64: 256, 128>}, {pipeline_mode = #tpu.pipeline_mode<synchronous>, transform_indices = @transform_5, window_bounds = array<i64: 64, 128>}, {pipeline_mode = #tpu.pipeline_mode<synchronous>, transform_indices = @transform_6, window_bounds = array<i64: 1, 128>}, {transform_indices = @transform_7, window_bounds = array<i64: 16, 17, 128>}]} {
    %c0 = arith.constant 0 : index
    %c0_0 = arith.constant 0 : index
    %0 = vector.load %arg2[%c0, %c0_0] : memref<256x256xf32, #tpu.memory_space<vmem>>, vector<256x256xf32>
    %cst = arith.constant dense<0.000000e+00> : vector<256xf32>
    %1 = vector.multi_reduction <add>, %0, %cst [1] : vector<256x256xf32> to vector<256xf32>
    %2 = vector.shape_cast %1 : vector<256xf32> to vector<256x1xf32>
    %cst_1 = arith.constant 2.560000e+02 : f32
    %3 = vector.broadcast %cst_1 : f32 to vector<256x1xf32>
    %4 = arith.divf %2, %3 : vector<256x1xf32>
    %5 = vector.broadcast %4 : vector<256x1xf32> to vector<256x256xf32>
    %6 = arith.subf %0, %5 : vector<256x256xf32>
    %7 = arith.mulf %6, %6 : vector<256x256xf32>
    %cst_2 = arith.constant dense<0.000000e+00> : vector<256xf32>
    %8 = vector.multi_reduction <add>, %7, %cst_2 [1] : vector<256x256xf32> to vector<256xf32>
    %9 = vector.shape_cast %8 : vector<256xf32> to vector<256x1xf32>
    %cst_3 = arith.constant 2.560000e+02 : f32
    %10 = vector.broadcast %cst_3 : f32 to vector<256x1xf32>
    %11 = arith.divf %9, %10 : vector<256x1xf32>
    %12 = vector.broadcast %4 : vector<256x1xf32> to vector<256x256xf32>
    %13 = arith.subf %0, %12 : vector<256x256xf32>
    %cst_4 = arith.constant 9.99999974E-6 : f32
    %14 = vector.broadcast %cst_4 : f32 to vector<256x1xf32>
    %15 = arith.addf %11, %14 : vector<256x1xf32>
    %16 = math.rsqrt %15 : vector<256x1xf32>
    %17 = vector.broadcast %16 : vector<256x1xf32> to vector<256x256xf32>
    %18 = arith.mulf %13, %17 : vector<256x256xf32>
    %c0_5 = arith.constant 0 : index
    %c0_6 = arith.constant 0 : index
    %19 = vector.load %arg3[%c0_5, %c0_6] : memref<1x256xf32, #tpu.memory_space<vmem>>, vector<1x256xf32>
    %20 = vector.broadcast %19 : vector<1x256xf32> to vector<256x256xf32>
    %21 = arith.mulf %18, %20 : vector<256x256xf32>
    %c0_7 = arith.constant 0 : index
    %c0_8 = arith.constant 0 : index
    %22 = vector.load %arg4[%c0_7, %c0_8] : memref<1x256xf32, #tpu.memory_space<vmem>>, vector<1x256xf32>
    %23 = vector.broadcast %22 : vector<1x256xf32> to vector<256x256xf32>
    %24 = arith.addf %21, %23 : vector<256x256xf32>
    %c0_9 = arith.constant 0 : index
    %c0_10 = arith.constant 0 : index
    %25 = vector.load %arg5[%c0_9, %c0_10] : memref<256x128xf32, #tpu.memory_space<vmem>>, vector<256x128xf32>
    %cst_11 = arith.constant dense<0.000000e+00> : vector<256x128xf32>
    %26 = tpu.matmul %24, %25, %cst_11 {dimension_numbers = #tpu.dot_dimension_numbers<[1], [0], [0], [1], [0, 0, 1, 1], [], []>, precision = #tpu.contract_precision<fp32>} : vector<256x256xf32>, vector<256x128xf32>, vector<256x128xf32> -> vector<256x128xf32>
    %c0_12 = arith.constant 0 : index
    %c0_13 = arith.constant 0 : index
    %27 = vector.load %arg1[%c0_12, %c0_13] : memref<16x64xf32, #tpu.memory_space<vmem>>, vector<16x64xf32>
    %c0_14 = arith.constant 0 : index
    %c0_15 = arith.constant 0 : index
    %28 = vector.load %arg6[%c0_14, %c0_15] : memref<64x128xf32, #tpu.memory_space<vmem>>, vector<64x128xf32>
    %cst_16 = arith.constant dense<0.000000e+00> : vector<16x128xf32>
    %29 = tpu.matmul %27, %28, %cst_16 {dimension_numbers = #tpu.dot_dimension_numbers<[1], [0], [0], [1], [0, 0, 1, 1], [], []>, precision = #tpu.contract_precision<fp32>} : vector<16x64xf32>, vector<64x128xf32>, vector<16x128xf32> -> vector<16x128xf32>
    %c0_17 = arith.constant 0 : index
    %c0_18 = arith.constant 0 : index
    %30 = vector.load %arg7[%c0_17, %c0_18] : memref<1x128xf32, #tpu.memory_space<vmem>>, vector<1x128xf32>
    %31 = vector.broadcast %30 : vector<1x128xf32> to vector<16x128xf32>
    %32 = arith.addf %29, %31 : vector<16x128xf32>
    %33 = vector.shape_cast %32 : vector<16x128xf32> to vector<16x1x128xf32>
    %34 = vector.shape_cast %26 : vector<256x128xf32> to vector<16x16x128xf32>
    %35 = tpu.concatenate %33, %34 in 1 : vector<16x1x128xf32>, vector<16x16x128xf32> -> vector<16x17x128xf32>
    %c0_19 = arith.constant 0 : index
    %c0_20 = arith.constant 0 : index
    %c0_21 = arith.constant 0 : index
    %36 = vector.load %arg8[%c0_19, %c0_20, %c0_21] : memref<16x17x128xf32, #tpu.memory_space<vmem>>, vector<16x17x128xf32>
    tpu.vector_store %arg8[%c0_19, %c0_20, %c0_21], %35 {strides = array<i32>} : memref<16x17x128xf32, #tpu.memory_space<vmem>>, vector<16x17x128xf32>,
    return
  }
  func.func @transform_0(%arg0: i32) -> (i32, i32) {
    %c0_i32 = arith.constant 0 : i32
    %c0_i32_0 = arith.constant 0 : i32
    return %arg0, %c0_i32 : i32, i32
  }
  func.func @transform_1(%arg0: i32) -> (i32, i32) {
    %c0_i32 = arith.constant 0 : i32
    %c0_i32_0 = arith.constant 0 : i32
    return %arg0, %c0_i32 : i32, i32
  }
  func.func @transform_2(%arg0: i32) -> (i32, i32) {
    %c0_i32 = arith.constant 0 : i32
    %c0_i32_0 = arith.constant 0 : i32
    %c0_i32_1 = arith.constant 0 : i32
    return %c0_i32, %c0_i32_0 : i32, i32
  }
  func.func @transform_3(%arg0: i32) -> (i32, i32) {
    %c0_i32 = arith.constant 0 : i32
    %c0_i32_0 = arith.constant 0 : i32
    %c0_i32_1 = arith.constant 0 : i32
    return %c0_i32, %c0_i32_0 : i32, i32
  }
  func.func @transform_4(%arg0: i32) -> (i32, i32) {
    %c0_i32 = arith.constant 0 : i32
    %c0_i32_0 = arith.constant 0 : i32
    %c0_i32_1 = arith.constant 0 : i32
    return %c0_i32, %c0_i32_0 : i32, i32
  }
  func.func @transform_5(%arg0: i32) -> (i32, i32) {
    %c0_i32 = arith.constant 0 : i32
    %c0_i32_0 = arith.constant 0 : i32
    %c0_i32_1 = arith.constant 0 : i32
    return %c0_i32, %c0_i32_0 : i32, i32
  }
  func.func @transform_6(%arg0: i32) -> (i32, i32) {
    %c0_i32 = arith.constant 0 : i32
    %c0_i32_0 = arith.constant 0 : i32
    %c0_i32_1 = arith.constant 0 : i32
    return %c0_i32, %c0_i32_0 : i32, i32
  }
  func.func @transform_7(%arg0: i32) -> (i32, i32, i32) {
    %c0_i32 = arith.constant 0 : i32
    %c0_i32_0 = arith.constant 0 : i32
    %c0_i32_1 = arith.constant 0 : i32
    return %arg0, %c0_i32, %c0_i32_0 : i32, i32, i32
  }
}

</mosaic_0001>

<bundles_post_ra>
// kernel: tpu_custom_call.1
= control target key start
LH: loop header
LB: loop body
LE: loop exit
PB: predicated region body
PF: predicated region fallthrough
CT: control target
= control target key end

     0   :  { %12 = vsyncpa [#allocation3], 0  ;;  %s7843_s0 = inlined_call_operand.hbm [shape: f32[16,64], index: 0, kind: input, shape index: {}]   ;;  %s7844_s1 = inlined_call_operand.hbm [shape: f32[256,256], index: 1, kind: input, shape index: {}]   ;;  %s7845_s2 = inlined_call_operand.vmem [shape: f32[1,256], index: 2, kind: input, shape index: {}]   ;;  %s7846_s3 = inlined_call_operand.vmem [shape: f32[1,256], index: 3, kind: input, shape index: {}]   ;;  %s7847_s4 = inlined_call_operand.hbm [shape: f32[256,128], index: 4, kind: input, shape index: {}]   ;;  %s7848_s5 = inlined_call_operand.hbm [shape: f32[64,128], index: 5, kind: input, shape index: {}]   ;;  %s7849_s6 = inlined_call_operand.vmem [shape: f32[1,128], index: 6, kind: input, shape index: {}]   ;;  %s7850_s7 = inlined_call_operand.vmem [shape: f32[16,17,128], index: 7, kind: output, shape index: {}]  }
   0x1   :  { %13 = vsyncpa [#allocation5], 0 }
   0x2   :  { %14 = vsyncpa [#allocation8], 0  ;;  %s4718_s24 = smov [#allocation4]  }
   0x3   :  { %s32_s25 = sshll.u32 %s4718_s24, 4  ;;  %s33_s25 = int_to_ptr.vmem [resolvable:$true] %s32_s25 }
   0x4   :  { %s4640_s26 = scalar_lea.vmem %s33_s25, 8192  ;;  %p4645_p1 = scmp.lt.s32.totalorder %s33_s25, %s33_s25 }
   0x5   :  { %p4641_p0 = scmp.ne.s32.totalorder %s33_s25, %s4640_s26  ;;  %p4646_p2 = scmp.lt.s32.totalorder %s4640_s26, %s4640_s26 }
   0x7   :  { %p4647_p3 = por %p4646_p2, %p4645_p1 }
   0x9   :  { %p4648_p4 = pnand %p4647_p3, %p4641_p0 }
   0xb   :  { %4651 = shalt.err (!%p4648_p4)
}
   0xc   :  { %s4719_s27 = smov 256   ;;  %s4720_s28 = smov 16  }
   0xd   :  { %38 = dma.hbm_to_vmem [thread:$0]  %s7844_s1, 8192, %s33_s25, [#allocation5], %s4719_s27, %s4719_s27, %s4720_s28  }
   0xe   :  { %s4721_s8 = smov [#allocation2]  }
   0xf   :  { %s20_s9 = sshll.u32 %s4721_s8, 4  ;;  %s21_s9 = int_to_ptr.vmem [resolvable:$true] %s20_s9 }
  0x10   :  { %s4660_s10 = scalar_lea.vmem %s21_s9, 256  ;;  %p4665_p6 = scmp.lt.s32.totalorder %s21_s9, %s21_s9 }
  0x11   :  { %p4661_p5 = scmp.ne.s32.totalorder %s21_s9, %s4660_s10  ;;  %p4666_p7 = scmp.lt.s32.totalorder %s4660_s10, %s4660_s10 }
  0x13   :  { %p4667_p8 = por %p4666_p7, %p4665_p6 }
  0x15   :  { %p4668_p9 = pnand %p4667_p8, %p4661_p5 }
  0x17   :  { %4671 = shalt.err (!%p4668_p9)
}
  0x18   :  { %s4722_s11 = smov 128   ;;  %s4723_s12 = smov 8  }
  0x19   :  { %26 = dma.hbm_to_vmem [thread:$0]  %s7843_s0, 256, %s21_s9, [#allocation3], %s4722_s11, %s4722_s11, %s4723_s12  }
  0x1a   :  { %s4724_s15 = smov [#allocation6]   ;;  %s4725_s17 = smov [#allocation7]  }
  0x1b   :  { %s48_s16 = sshll.u32 %s4724_s15, 4  ;;  %s60_s1 = sshll.u32 %s4725_s17, 4  ;;  %s49_s16 = int_to_ptr.vmem [resolvable:$true] %s48_s16  ;;  %s61_s1 = int_to_ptr.vmem [resolvable:$true] %s60_s1 }
  0x1c   :  { %s4680_s18 = scalar_lea.vmem %s49_s16, 4096  ;;  %p4685_p11 = scmp.lt.s32.totalorder %s49_s16, %s49_s16 }
  0x1d   :  { %p4681_p10 = scmp.ne.s32.totalorder %s49_s16, %s4680_s18  ;;  %p4686_p12 = scmp.lt.s32.totalorder %s4680_s18, %s4680_s18 }
  0x1f   :  { %p4687_p13 = por %p4686_p12, %p4685_p11 }
  0x21   :  { %p4688_p0 = pnand %p4687_p13, %p4681_p10 }
  0x23   :  { %4691 = shalt.err (!%p4688_p0)
}
  0x24   :  { %54 = dma.hbm_to_vmem [thread:$0]  %s7847_s4, 4096, %s49_s16, [#allocation5], %s4722_s11, %s4722_s11, %s4723_s12  }
  0x25   :  { %s4700_s21 = scalar_lea.vmem %s61_s1, 1024  ;;  %p4705_p2 = scmp.lt.s32.totalorder %s61_s1, %s61_s1 }
  0x26   :  { %p4701_p1 = scmp.ne.s32.totalorder %s61_s1, %s4700_s21  ;;  %p4706_p3 = scmp.lt.s32.totalorder %s4700_s21, %s4700_s21 }
  0x28   :  { %p4707_p4 = por %p4706_p3, %p4705_p2 }
  0x2a   :  { %p4708_p5 = pnand %p4707_p4, %p4701_p1 }
  0x2c   :  { %4711 = shalt.err (!%p4708_p5)
}
  0x2d   :  { %66 = dma.hbm_to_vmem [thread:$0]  %s7848_s5, 1024, %s61_s1, [#allocation8], %s4722_s11, %s4722_s11, %s4723_s12  }
  0x2e   :  { %4712 = dma.done.wait [#allocation3], 256  }
  0x2f   :  { %4713 = vsyncadd [#allocation3], 4294967040 }
  0x30   :  { %4714 = dma.done.wait [#allocation5], 12288  }
  0x31   :  { %4715 = vsyncadd [#allocation5], 4294955008 }
  0x32   :  { %4716 = dma.done.wait [#allocation8], 1024  }
  0x33   :  { %4717 = vsyncadd [#allocation8], 4294966272  ;;  %v4780_v0 = vld [vmem:[#allocation4 + $0x20] sm:$0xff]  ;;  %v4782_v1 = vld [vmem:[#allocation4 + $0x28] sm:$0xff]  ;;  %vm3457_vm0 = vcmask 523264   ;;  %vm4192_vm1 = vcmask 1040384  }
  0x34   :  { %v4784_v2 = vld [vmem:[#allocation4] sm:$0xff]  ;;  %v151_v3 = vadd.f32 %v4782_v1, %v4780_v0  ;;  %v4788_v4 = vld [vmem:[#allocation4 + $0x8] sm:$0xff]  ;;  %v4790_v5 = vld [vmem:[#allocation4 + $0x30] sm:$0xff] }
  0x35   :  { %v4792_v6 = vld [vmem:[#allocation4 + $0x38] sm:$0xff]  ;;  %v145_v7 = vadd.f32 %v4788_v4, %v4784_v2  ;;  %v4796_v8 = vld [vmem:[#allocation4 + $0x10] sm:$0xff]  ;;  %v4808_v14 = vld [vmem:[#allocation4 + $0x40] sm:$0xff] }
  0x36   :  { %v4798_v9 = vld [vmem:[#allocation4 + $0x18] sm:$0xff]  ;;  %152 = vadd.xlane.f32.xlu1 %v151_v3  ;;  %v154_v10 = vadd.f32 %v4792_v6, %v4790_v5  ;;  %v4804_v12 = vld [vmem:[#allocation4 + $0x50] sm:$0xff]  ;;  %v4810_v15 = vld [vmem:[#allocation4 + $0x48] sm:$0xff] }
  0x37   :  { %146 = vadd.xlane.f32.xlu0 %v145_v7  ;;  %v148_v11 = vadd.f32 %v4798_v9, %v4796_v8  ;;  %v4806_v13 = vld [vmem:[#allocation4 + $0x58] sm:$0xff]  ;;  %v4814_v17 = vld [vmem:[#allocation4 + $0x70] sm:$0xff]  ;;  %v157_v19 = vadd.f32 %v4810_v15, %v4808_v14  ;;  %v4820_v20 = vld [vmem:[#allocation4 + $0x60] sm:$0xff] }
  0x38   :  { %v160_v16 = vadd.f32 %v4806_v13, %v4804_v12  ;;  %v4816_v18 = vld [vmem:[#allocation4 + $0x78] sm:$0xff]  ;;  %v4822_v21 = vld [vmem:[#allocation4 + $0x68] sm:$0xff]  ;;  %v4826_v23 = vld [vmem:[#allocation4 + $0x90] sm:$0xff] }
  0x39   :  { %v166_v22 = vadd.f32 %v4816_v18, %v4814_v17  ;;  %v4828_v24 = vld [vmem:[#allocation4 + $0x98] sm:$0xff]  ;;  %v163_v25 = vadd.f32 %v4822_v21, %v4820_v20  ;;  %v4832_v26 = vld [vmem:[#allocation4 + $0x80] sm:$0xff]  ;;  %v4834_v27 = vld [vmem:[#allocation4 + $0x88] sm:$0xff] }
  0x3a   :  { %155 = vadd.xlane.f32.xlu1 %v154_v10  ;;  %v172_v28 = vadd.f32 %v4828_v24, %v4826_v23  ;;  %v4838_v29 = vld [vmem:[#allocation4 + $0xb0] sm:$0xff]  ;;  %v4840_v30 = vld [vmem:[#allocation4 + $0xb8] sm:$0xff]  ;;  %v169_v31 = vadd.f32 %v4834_v27, %v4832_v26  ;;  %v4844_v32 = vld [vmem:[#allocation4 + $0xa0] sm:$0xff] }
  0x3b   :  { %149 = vadd.xlane.f32.xlu0 %v148_v11  ;;  %v4846_v33 = vld [vmem:[#allocation4 + $0xa8] sm:$0xff]  ;;  %v178_v34 = vadd.f32 %v4840_v30, %v4838_v29  ;;  %v4850_v35 = vld [vmem:[#allocation4 + $0xd0] sm:$0xff]  ;;  %v4852_v36 = vld [vmem:[#allocation4 + $0xd8] sm:$0xff] }
  0x3c   :  { %v175_v37 = vadd.f32 %v4846_v33, %v4844_v32  ;;  %v4856_v38 = vld [vmem:[#allocation4 + $0xc0] sm:$0xff]  ;;  %v4858_v39 = vld [vmem:[#allocation4 + $0xc8] sm:$0xff]  ;;  %v184_v40 = vadd.f32 %v4852_v36, %v4850_v35  ;;  %v4862_v41 = vld [vmem:[#allocation4 + $0xf0] sm:$0xff] }
  0x3d   :  { %v4864_v42 = vld [vmem:[#allocation4 + $0xf8] sm:$0xff]  ;;  %v181_v43 = vadd.f32 %v4858_v39, %v4856_v38  ;;  %v4868_v44 = vld [vmem:[#allocation4 + $0xe0] sm:$0xff]  ;;  %v4870_v45 = vld [vmem:[#allocation4 + $0xe8] sm:$0xff] }
  0x3e   :  { %161 = vadd.xlane.f32.xlu1 %v160_v16  ;;  %v190_v46 = vadd.f32 %v4864_v42, %v4862_v41  ;;  %v4874_v47 = vld [vmem:[#allocation4 + $0x110] sm:$0xff]  ;;  %v4876_v48 = vld [vmem:[#allocation4 + $0x118] sm:$0xff]  ;;  %v187_v49 = vadd.f32 %v4870_v45, %v4868_v44  ;;  %v4880_v50 = vld [vmem:[#allocation4 + $0x100] sm:$0xff] }
  0x3f   :  { %158 = vadd.xlane.f32.xlu0 %v157_v19  ;;  %8237 = vst [vmem:[#allocation12_spill] sm:$0xff] %v4880_v50  ;;  %v114_v51 = vld [vmem:[#allocation4 + $0x108] sm:$0xff]  ;;  %v196_v52 = vadd.f32 %v4876_v48, %v4874_v47  ;;  %v4884_v53 = vld [vmem:[#allocation4 + $0x130] sm:$0xff]  ;;  %v4886_v54 = vld [vmem:[#allocation4 + $0x138] sm:$0xff] }
  0x40   :  { %v193_v55 = vadd.f32 %v114_v51, %v4880_v50  ;;  %v117_v56 = vld [vmem:[#allocation4 + $0x120] sm:$0xff]  ;;  %v118_v57 = vld [vmem:[#allocation4 + $0x128] sm:$0xff]  ;;  %v202_v58 = vadd.f32 %v4886_v54, %v4884_v53  ;;  %v4891_v63 = vld [vmem:[#allocation4 + $0x150] sm:$0xff] }
  0x41   :  { %v121_v59 = vld [vmem:[#allocation4 + $0x140] sm:$0xff]  ;;  %v122_v60 = vld [vmem:[#allocation4 + $0x148] sm:$0xff]  ;;  %v199_v61 = vadd.f32 %v118_v57, %v117_v56  ;;  %v4893_v3 = vld [vmem:[#allocation4 + $0x158] sm:$0xff] }
  0x42   :  { %167 = vadd.xlane.f32.xlu1 %v166_v22  ;;  %v205_v62 = vadd.f32 %v122_v60, %v121_v59  ;;  %8238 = vst [vmem:[#allocation13_spill] sm:$0xff] %v4893_v3  ;;  %v208_v7 = vadd.f32 %v4893_v3, %v4891_v63  ;;  %v125_v10 = vld [vmem:[#allocation4 + $0x160] sm:$0xff]  ;;  %v126_v11 = vld [vmem:[#allocation4 + $0x168] sm:$0xff]  ;;  %v4897_v19 = vld [vmem:[#allocation4 + $0x170] sm:$0xff] }
  0x43   :  { %164 = vadd.xlane.f32.xlu0 %v163_v25  ;;  %v211_v16 = vadd.f32 %v126_v11, %v125_v10  ;;  %8239 = vst [vmem:[#allocation14_spill] sm:$0xff] %v4897_v19  ;;  %v4899_v22 = vld [vmem:[#allocation4 + $0x178] sm:$0xff]  ;;  %v137_v57 = vld [vmem:[#allocation4 + $0x1c0] sm:$0xff]  ;;  %v139_v60 = vld [vmem:[#allocation4 + $0x1d0] sm:$0xff] }
  0x44   :  { %8240 = vst [vmem:[#allocation15_spill] sm:$0xff] %v4899_v22  ;;  %v214_v25 = vadd.f32 %v4899_v22, %v4897_v19  ;;  %v142_v10 = vld [vmem:[#allocation4 + $0x1e8] sm:$0xff]  ;;  %v816_v19 = vld [vmem:[#allocation6 + $0x30] sm:$0xff] }
  0x45   :  { %v812_v3 = vld [vmem:[#allocation6 + $0x10] sm:$0xff] }
  0x46   :  { %173 = vadd.xlane.f32.xlu1 %v172_v28  ;;  %v129_v28 = vld [vmem:[#allocation4 + $0x180] sm:$0xff] }
  0x47   :  { %170 = vadd.xlane.f32.xlu0 %v169_v31  ;;  %v130_v31 = vld [vmem:[#allocation4 + $0x188] sm:$0xff] }
  0x4a   :  { %179 = vadd.xlane.f32.xlu1 %v178_v34  ;;  %v217_v34 = vadd.f32 %v130_v31, %v129_v28  ;;  %v825_v31 = vld [vmem:[#allocation6 + $0x78] sm:$0xff] }
  0x4b   :  { %176 = vadd.xlane.f32.xlu0 %v175_v37  ;;  %v131_v37 = vld [vmem:[#allocation4 + $0x190] sm:$0xff] }
  0x4e   :  { %185 = vadd.xlane.f32.xlu1 %v184_v40  ;;  %v132_v40 = vld [vmem:[#allocation4 + $0x198] sm:$0xff] }
  0x4f   :  { %182 = vadd.xlane.f32.xlu0 %v181_v43  ;;  %v220_v43 = vadd.f32 %v132_v40, %v131_v37  ;;  %v823_v37 = vld [vmem:[#allocation6 + $0x68] sm:$0xff]  ;;  %v7851_v40 = vmov 0.0  }
  0x50   :  { %1419 = vmatprep.subr.mxu1 %v7851_v40  ;;  %842 = vmatprep.subr.mxu0 %v7851_v40 }
  0x52   :  { %191 = vadd.xlane.f32.xlu1 %v190_v46  ;;  %v133_v46 = vld [vmem:[#allocation4 + $0x1a0] sm:$0xff] }
  0x53   :  { %188 = vadd.xlane.f32.xlu0 %v187_v49  ;;  %v134_v49 = vld [vmem:[#allocation4 + $0x1a8] sm:$0xff] }
  0x54   :  { %v223_v51 = vadd.f32 %v134_v49, %v133_v46  ;;  %v4908_v49 = vand.u32 4294901760, %v823_v37 }
  0x56   :  { %197 = vadd.xlane.f32.xlu1 %v196_v52  ;;  %v135_v52 = vld [vmem:[#allocation4 + $0x1b0] sm:$0xff]  ;;  %8243 = vst [vmem:[#allocation18_spill] sm:$0xff] %v4908_v49 }
  0x57   :  { %194 = vadd.xlane.f32.xlu0 %v193_v55  ;;  %v136_v55 = vld [vmem:[#allocation4 + $0x1b8] sm:$0xff] }
  0x58   :  { %v226_v56 = vadd.f32 %v136_v55, %v135_v52  ;;  %v821_v52 = vld [vmem:[#allocation6 + $0x58] sm:$0xff]  ;;  %v820_v55 = vld [vmem:[#allocation6 + $0x50] sm:$0xff] }
  0x5a   :  { %203 = vadd.xlane.f32.xlu1 %v202_v58  ;;  %v138_v58 = vld [vmem:[#allocation4 + $0x1c8] sm:$0xff] }
  0x5b   :  { %200 = vadd.xlane.f32.xlu0 %v199_v61  ;;  %v229_v59 = vadd.f32 %v138_v58, %v137_v57  ;;  %v140_v61 = vld [vmem:[#allocation4 + $0x1d8] sm:$0xff]  ;;  %v4913_v57 = vand.u32 4294901760, %v821_v52  ;;  %v4915_v58 = vand.u32 4294901760, %v820_v55 }
  0x5d   :  { %8245 = vst [vmem:[#allocation20_spill] sm:$0xff] %v4913_v57  ;;  %8246 = vst [vmem:[#allocation21_spill] sm:$0xff] %v4915_v58 }
  0x5e   :  { %206 = vadd.xlane.f32.xlu1 %v205_v62  ;;  %v232_v62 = vadd.f32 %v140_v61, %v139_v60  ;;  %v818_v60 = vld [vmem:[#allocation6 + $0x40] sm:$0xff] }
  0x62   :  { %209 = vadd.xlane.f32.xlu1 %v208_v7  ;;  %v141_v7 = vld [vmem:[#allocation4 + $0x1e0] sm:$0xff] }
  0x63   :  { %v235_v11 = vadd.f32 %v142_v10, %v141_v7  ;;  %v4924_v7 = vsub.f32 %v823_v37, %v4908_v49 }
  0x65   :  { %8249 = vst [vmem:[#allocation24_spill] sm:$0xff] %v4924_v7  ;;  %v7866_v37 = vand.u32 4294901760, %v4924_v7 }
  0x66   :  { %212 = vadd.xlane.f32.xlu1 %v211_v16  ;;  %v143_v16 = vld [vmem:[#allocation4 + $0x1f0] sm:$0xff] }
  0x6a   :  { %215 = vadd.xlane.f32.xlu1 %v214_v25  ;;  %v144_v25 = vld [vmem:[#allocation4 + $0x1f8] sm:$0xff] }
  0x6b   :  { %v238_v28 = vadd.f32 %v144_v25, %v143_v16  ;;  %v4934_v16 = vsub.f32 %v821_v52, %v4913_v57  ;;  %v4937_v25 = vsub.f32 %v820_v55, %v4915_v58 }
  0x6d   :  { %8252 = vst [vmem:[#allocation27_spill] sm:$0xff] %v4934_v16  ;;  %8253 = vst [vmem:[#allocation28_spill] sm:$0xff] %v4937_v25 }
  0x6e   :  { %218 = vadd.xlane.f32.xlu1 %v217_v34  ;;  %v824_v34 = vld [vmem:[#allocation6 + $0x70] sm:$0xff] }
  0x6f   :  { %v4906_v46 = vand.u32 4294901760, %v824_v34 }
  0x71   :  { %8242 = vst [vmem:[#allocation17_spill] sm:$0xff] %v4906_v46 }
  0x72   :  { %221 = vadd.xlane.f32.xlu1 %v220_v43  ;;  %v4904_v43 = vand.u32 4294901760, %v825_v31 }
  0x74   :  { %8241 = vst [vmem:[#allocation16_spill] sm:$0xff] %v4904_v43  ;;  %v4918_v61 = vsub.f32 %v825_v31, %v4904_v43  ;;  %844 = vmatpush1.msra.mxu0 %v4904_v43  ;;  %v8255_v43 = vmov 0.0  }
  0x75   :  { %845 = vmatprep.subr.mxu0 %v7851_v40 }
  0x76   :  { %224 = vadd.xlane.f32.xlu1 %v223_v51  ;;  %v822_v51 = vld [vmem:[#allocation6 + $0x60] sm:$0xff]  ;;  %8247 = vst [vmem:[#allocation22_spill] sm:$0xff] %v4918_v61  ;;  %v7859_v31 = vand.u32 4294901760, %v4918_v61  ;;  %847 = vmatpush1.msra.mxu0 %v4906_v46 }
  0x77   :  { %848 = vmatprep.subr.mxu0 %v8255_v43 }
  0x78   :  { %v1423_v55 = vsub.f32 %v4918_v61, %v7859_v31  ;;  %850 = vmatpush1.msra.mxu0 %v4908_v49  ;;  %v815_v31 = vld [vmem:[#allocation6 + $0x28] sm:$0xff] }
  0x79   :  { %851 = vmatprep.subr.mxu0 %v8255_v43 }
  0x7a   :  { %227 = vadd.xlane.f32.xlu1 %v226_v56  ;;  %v4911_v56 = vand.u32 4294901760, %v822_v51  ;;  %v1424_v61 = vand.u32 4294901760, %v1423_v55  ;;  %v4978_v55 = vand.u32 4294901760, %v816_v19 }
  0x7c   :  { %8244 = vst [vmem:[#allocation19_spill] sm:$0xff] %v4911_v56  ;;  %853 = vmatpush1.msra.mxu0 %v4911_v56  ;;  %1425 = vmatpush1.msra.mxu1 %v1424_v61  ;;  %8261 = vst [vmem:[#allocation33_spill] sm:$0xff] %v4978_v55  ;;  %v813_v61 = vld [vmem:[#allocation6 + $0x18] sm:$0xff] }
  0x7d   :  { %854 = vmatprep.subr.mxu0 %v8255_v43  ;;  %1426 = vmatprep.subr.mxu1 %v8255_v43 }
  0x7e   :  { %230 = vadd.xlane.f32.xlu1 %v229_v59  ;;  %v819_v59 = vld [vmem:[#allocation6 + $0x48] sm:$0xff]  ;;  %856 = vmatpush1.msra.mxu0 %v4913_v57  ;;  %v4993_v57 = vsub.f32 %v816_v19, %v4978_v55 }
  0x7f   :  { %v4927_v10 = vand.u32 4294901760, %v819_v59  ;;  %857 = vmatprep.subr.mxu0 %v8255_v43 }
  0x80   :  { %859 = vmatpush1.msra.mxu0 %v4915_v58  ;;  %8265 = vst [vmem:[#allocation36_spill] sm:$0xff] %v4993_v57  ;;  %v5011_v58 = vand.u32 4294901760, %v812_v3 }
  0x81   :  { %8250 = vst [vmem:[#allocation25_spill] sm:$0xff] %v4927_v10  ;;  %v4949_v52 = vsub.f32 %v819_v59, %v4927_v10  ;;  %860 = vmatprep.subr.mxu0 %v8255_v43 }
  0x82   :  { %233 = vadd.xlane.f32.xlu1 %v232_v62  ;;  %v4921_v62 = vsub.f32 %v824_v34, %v4906_v46  ;;  %v1437_v46 = vsub.f32 %v4924_v7, %v7866_v37  ;;  %v8259_v37 = vand.u32 4294901760, %v4934_v16  ;;  %862 = vmatpush1.msra.mxu0 %v4927_v10  ;;  %8270 = vst [vmem:[#allocation40_spill] sm:$0xff] %v5011_v58  ;;  %v810_v10 = vld [vmem:[#allocation6] sm:$0xff] }
  0x83   :  { %8256 = vst [vmem:[#allocation30_spill] sm:$0xff] %v4949_v52  ;;  %863 = vmatprep.subr.mxu0 %v8255_v43 }
  0x84   :  { %8248 = vst [vmem:[#allocation23_spill] sm:$0xff] %v4921_v62  ;;  %v7863_v34 = vand.u32 4294901760, %v4921_v62  ;;  %v1451_v40 = vsub.f32 %v4934_v16, %v8259_v37  ;;  %v1438_v49 = vand.u32 4294901760, %v1437_v46 }
  0x86   :  { %236 = vadd.xlane.f32.xlu1 %v235_v11  ;;  %v4930_v11 = vsub.f32 %v822_v51, %v4911_v56  ;;  %v1430_v22 = vsub.f32 %v4921_v62, %v7863_v34  ;;  %v817_v51 = vld [vmem:[#allocation6 + $0x38] sm:$0xff] }
  0x88   :  { %8251 = vst [vmem:[#allocation26_spill] sm:$0xff] %v4930_v11  ;;  %v1431_v50 = vand.u32 4294901760, %v1430_v22  ;;  %v8258_v34 = vand.u32 4294901760, %v4930_v11  ;;  %v4976_v22 = vand.u32 4294901760, %v817_v51 }
  0x8a   :  { %239 = vadd.xlane.f32.xlu1 %v238_v28  ;;  %v4939_v28 = vand.u32 4294901760, %v818_v60  ;;  %v1444_v62 = vsub.f32 %v4930_v11, %v8258_v34  ;;  %8260 = vst [vmem:[#allocation32_spill] sm:$0xff] %v4976_v22  ;;  %v4980_v34 = vand.u32 4294901760, %v815_v31  ;;  %v8263_v11 = vand.u32 4294901760, %v4937_v25  ;;  %1432 = vmatpush1.msra.mxu1 %v1431_v50 }
  0x8b   :  { %v4989_v16 = vsub.f32 %v817_v51, %v4976_v22  ;;  %1433 = vmatprep.subr.mxu1 %v8255_v43  ;;  %v1452_v50 = vand.u32 4294901760, %v1451_v40  ;;  %v5007_v51 = vand.u32 4294901760, %v813_v61 }
  0x8c   :  { %8254 = vst [vmem:[#allocation29_spill] sm:$0xff] %v4939_v28  ;;  %v4964_v59 = vsub.f32 %v818_v60, %v4939_v28  ;;  %v814_v60 = vld [vmem:[#allocation6 + $0x20] sm:$0xff]  ;;  %8262 = vst [vmem:[#allocation34_spill] sm:$0xff] %v4980_v34  ;;  %v1458_v37 = vsub.f32 %v4937_v25, %v8263_v11  ;;  %v1445_v46 = vand.u32 4294901760, %v1444_v62  ;;  %v8267_v11 = vand.u32 4294901760, %v4949_v52  ;;  %1439 = vmatpush1.msra.mxu1 %v1438_v49  ;;  %v811_v25 = vld [vmem:[#allocation6 + $0x8] sm:$0xff] }
  0x8d   :  { %8264 = vst [vmem:[#allocation35_spill] sm:$0xff] %v4989_v16  ;;  %v4995_v56 = vand.u32 4294901760, %v814_v60  ;;  %v5005_v19 = vsub.f32 %v815_v31, %v4980_v34  ;;  %8269 = vst [vmem:[#allocation39_spill] sm:$0xff] %v5007_v51  ;;  %1440 = vmatprep.subr.mxu1 %v8255_v43  ;;  %865 = vmatpush1.msra.mxu0 %v4939_v28  ;;  %v8277_v28 = vand.u32 4294901760, %v4993_v57 }
  0x8e   :  { %8257 = vst [vmem:[#allocation31_spill] sm:$0xff] %v4964_v59  ;;  %v1465_v7 = vsub.f32 %v4949_v52, %v8267_v11  ;;  %1446 = vmatpush1.msra.mxu1 %v1445_v46  ;;  %v1459_v11 = vand.u32 4294901760, %v1458_v37  ;;  %v8271_v40 = vand.u32 4294901760, %v4964_v59  ;;  %866 = vmatprep.subr.mxu0 %v8255_v43  ;;  %v5023_v52 = vand.u32 4294901760, %v811_v25 }
  0x8f   :  { %8266 = vst [vmem:[#allocation37_spill] sm:$0xff] %v4995_v56  ;;  %8268 = vst [vmem:[#allocation38_spill] sm:$0xff] %v5005_v19  ;;  %v5019_v31 = vsub.f32 %v814_v60, %v4995_v56  ;;  %1447 = vmatprep.subr.mxu1 %v8255_v43  ;;  %v8274_v46 = vand.u32 4294901760, %v4989_v16  ;;  %868 = vmatpush1.msra.mxu0 %v4976_v22  ;;  %v5031_v60 = vsub.f32 %v813_v61, %v5007_v51 }
  0x90   :  { %v1472_v49 = vsub.f32 %v4964_v59, %v8271_v40  ;;  %8273 = vst [vmem:[#allocation42_spill] sm:$0xff] %v5023_v52  ;;  %1453 = vmatpush1.msra.mxu1 %v1452_v50  ;;  %v1466_v37 = vand.u32 4294901760, %v1465_v7  ;;  %869 = vmatprep.subr.mxu0 %v8255_v43  ;;  %v5036_v59 = vsub.f32 %v812_v3, %v5011_v58  ;;  %v841_v50 = vld [vmem:[#allocation6 + $0xf8] sm:$0xff]  ;;  %v5043_v61 = vand.u32 4294901760, %v810_v10 }
  0x91   :  { %8272 = vst [vmem:[#allocation41_spill] sm:$0xff] %v5019_v31  ;;  %v1479_v40 = vsub.f32 %v4989_v16, %v8274_v46  ;;  %8275 = vst [vmem:[#allocation43_spill] sm:$0xff] %v5031_v60  ;;  %1454 = vmatprep.subr.mxu1 %v8255_v43  ;;  %v1486_v46 = vsub.f32 %v4993_v57, %v8277_v28  ;;  %871 = vmatpush1.msra.mxu0 %v4978_v55  ;;  %v840_v16 = vld [vmem:[#allocation6 + $0xf0] sm:$0xff]  ;;  %v5055_v57 = vand.u32 4294901760, %v841_v50 }
  0x92   :  { %8276 = vst [vmem:[#allocation44_spill] sm:$0xff] %v5036_v59  ;;  %1460 = vmatpush1.msra.mxu1 %v1459_v11  ;;  %v1473_v7 = vand.u32 4294901760, %v1472_v49  ;;  %8278 = vst [vmem:[#allocation45_spill] sm:$0xff] %v5043_v61  ;;  %872 = vmatprep.subr.mxu0 %v8255_v43  ;;  %v5048_v3 = vsub.f32 %v811_v25, %v5023_v52  ;;  %v8280_v49 = vand.u32 4294901760, %v5005_v19  ;;  %v5067_v62 = vand.u32 4294901760, %v840_v16 }
  0x93   :  { %1461 = vmatprep.subr.mxu1 %v8255_v43  ;;  %v1480_v11 = vand.u32 4294901760, %v1479_v40  ;;  %874 = vmatpush1.msra.mxu0 %v4980_v34  ;;  %8281 = vst [vmem:[#allocation47_spill] sm:$0xff] %v5055_v57  ;;  %v1487_v25 = vand.u32 4294901760, %v1486_v46 }
  0x94   :  { %8279 = vst [vmem:[#allocation46_spill] sm:$0xff] %v5048_v3  ;;  %1467 = vmatpush1.msra.mxu1 %v1466_v37  ;;  %v1493_v28 = vsub.f32 %v5005_v19, %v8280_v49  ;;  %875 = vmatprep.subr.mxu0 %v8255_v43  ;;  %v8282_v37 = vand.u32 4294901760, %v5019_v31  ;;  %v5065_v49 = vsub.f32 %v810_v10, %v5043_v61  ;;  %8284 = vst [vmem:[#allocation49_spill] sm:$0xff] %v5067_v62 }
  0x95   :  { %1468 = vmatprep.subr.mxu1 %v8255_v43  ;;  %877 = vmatpush1.msra.mxu0 %v4995_v56  ;;  %v7902_v19 = vand.u32 4294901760, %v5048_v3 }
  0x96   :  { %1474 = vmatpush1.msra.mxu1 %v1473_v7  ;;  %v1500_v40 = vsub.f32 %v5019_v31, %v8282_v37  ;;  %8283 = vst [vmem:[#allocation48_spill] sm:$0xff] %v5065_v49  ;;  %878 = vmatprep.subr.mxu0 %v8255_v43  ;;  %v1494_v55 = vand.u32 4294901760, %v1493_v28  ;;  %v8285_v7 = vand.u32 4294901760, %v5031_v60  ;;  %v5077_v37 = vsub.f32 %v841_v50, %v5055_v57 }
  0x97   :  { %1475 = vmatprep.subr.mxu1 %v8255_v43  ;;  %880 = vmatpush1.msra.mxu0 %v5007_v51  ;;  %v7905_v56 = vand.u32 4294901760, %v5065_v49 }
  0x98   :  { %1481 = vmatpush1.msra.mxu1 %v1480_v11  ;;  %v1507_v46 = vsub.f32 %v5031_v60, %v8285_v7  ;;  %8286 = vst [vmem:[#allocation50_spill] sm:$0xff] %v5077_v37  ;;  %881 = vmatprep.subr.mxu0 %v8255_v43  ;;  %v1501_v10 = vand.u32 4294901760, %v1500_v40  ;;  %v8287_v11 = vand.u32 4294901760, %v5036_v59  ;;  %v5087_v7 = vsub.f32 %v840_v16, %v5067_v62 }
  0x99   :  { %1482 = vmatprep.subr.mxu1 %v8255_v43  ;;  %883 = vmatpush1.msra.mxu0 %v5011_v58 }
  0x9a   :  { %1488 = vmatpush1.msra.mxu1 %v1487_v25  ;;  %v1514_v28 = vsub.f32 %v5036_v59, %v8287_v11  ;;  %8288 = vst [vmem:[#allocation51_spill] sm:$0xff] %v5087_v7  ;;  %884 = vmatprep.subr.mxu0 %v8255_v43  ;;  %v1508_v50 = vand.u32 4294901760, %v1507_v46  ;;  %v1521_v25 = vsub.f32 %v5048_v3, %v7902_v19 }
  0x9b   :  { %1489 = vmatprep.subr.mxu1 %v8255_v43  ;;  %886 = vmatpush1.msra.mxu0 %v5023_v52  ;;  %v1528_v11 = vsub.f32 %v5065_v49, %v7905_v56 }
  0x9c   :  { %1495 = vmatpush1.msra.mxu1 %v1494_v55  ;;  %887 = vmatprep.subr.mxu0 %v8255_v43  ;;  %v1515_v16 = vand.u32 4294901760, %v1514_v28  ;;  %v1522_v52 = vand.u32 4294901760, %v1521_v25 }
  0x9d   :  { %1496 = vmatprep.subr.mxu1 %v8255_v43  ;;  %889 = vmatpush1.msra.mxu0 %v5043_v61  ;;  %v1529_v55 = vand.u32 4294901760, %v1528_v11  ;;  %v8290_v61 = vand.u32 4294901760, %v5087_v7 }
  0x9e   :  { %1502 = vmatpush1.msra.mxu1 %v1501_v10  ;;  %890 = vmatprep.subr.mxu0 %v8255_v43  ;;  %v8289_v10 = vand.u32 4294901760, %v5077_v37 }
  0x9f   :  { %1503 = vmatprep.subr.mxu1 %v8255_v43  ;;  %892 = vmatpush2.msra.mxu0 %v5055_v57 }
  0xa0   :  { %1509 = vmatpush1.msra.mxu1 %v1508_v50  ;;  %v1535_v28 = vsub.f32 %v5077_v37, %v8289_v10  ;;  %893 = vmatprep.subr.mxu0 %v8255_v43 }
  0xa1   :  { %1510 = vmatprep.subr.mxu1 %v8255_v43  ;;  %895 = vmatpush2.msra.mxu0 %v5067_v62 }
  0xa2   :  { %1516 = vmatpush1.msra.mxu1 %v1515_v16  ;;  %896 = vmatprep.subr.mxu0 %v8255_v43  ;;  %v1536_v62 = vand.u32 4294901760, %v1535_v28 }
  0xa3   :  { %1517 = vmatprep.subr.mxu1 %v8255_v43 }
  0xa4   :  { %1523 = vmatpush1.msra.mxu1 %v1522_v52 }
  0xa5   :  { %1524 = vmatprep.subr.mxu1 %v8255_v43 }
  0xa6   :  { %1530 = vmatpush1.msra.mxu1 %v1529_v55 }
  0xa7   :  { %1531 = vmatprep.subr.mxu1 %v8255_v43 }
  0xa8   :  { %1537 = vmatpush2.msra.mxu1 %v1536_v62 }
  0xa9   :  { %1538 = vmatprep.subr.mxu1 %v8255_v43 }
  0xbf   :  { %v153_v46 = vpop.xlane.xlu1 %152 }
  0xc0   :  { %v244_v19 = vmul.f32 0.00390625, %v153_v46  ;;  %v147_v40 = vpop.xlane.xlu0 %146  ;;  %v1542_v46 = vsub.f32 %v5087_v7, %v8290_v61 }
  0xc1   :  { %v242_v56 = vmul.f32 0.00390625, %v147_v40 }
  0xc2   :  { %v5124_v40 = vsub.f32 %v4780_v0, %v244_v19  ;;  %v5127_v16 = vsub.f32 %v4782_v1, %v244_v19  ;;  %v1543_v7 = vand.u32 4294901760, %v1542_v46 }
  0xc3   :  { %v5116_v50 = vsub.f32 %v4784_v2, %v242_v56  ;;  %v5119_v25 = vsub.f32 %v4788_v4, %v242_v56  ;;  %v156_v10 = vpop.xlane.xlu1 %155 }
  0xc4   :  { %v245_v61 = vmul.f32 0.00390625, %v156_v10  ;;  %v150_v11 = vpop.xlane.xlu0 %149  ;;  %v342_v55 = vmul.f32 %v5124_v40, %v5124_v40  ;;  %1544 = vmatpush2.msra.mxu1 %v1543_v7 }
  0xc5   :  { %v243_v2 = vmul.f32 0.00390625, %v150_v11  ;;  %v338_v4 = vmul.f32 %v5116_v50, %v5116_v50  ;;  %v339_v56 = vmul.f32 %v5119_v25, %v5119_v25  ;;  %1545 = vmatprep.subr.mxu1 %v8255_v43 }
  0xc6   :  { %v5142_v28 = vsub.f32 %v4790_v5, %v245_v61  ;;  %v5145_v10 = vsub.f32 %v4792_v6, %v245_v61  ;;  %v838_v61 = vld [vmem:[#allocation6 + $0xe0] sm:$0xff] }
  0xc7   :  { %v5135_v0 = vsub.f32 %v4796_v8, %v243_v2  ;;  %v5138_v1 = vsub.f32 %v4798_v9, %v243_v2  ;;  %v162_v19 = vpop.xlane.xlu1 %161  ;;  %v402_v52 = vadd.f32 %v339_v56, %v338_v4  ;;  %v343_v8 = vmul.f32 %v5127_v16, %v5127_v16  ;;  %v839_v9 = vld [vmem:[#allocation6 + $0xe8] sm:$0xff] }
  0xc8   :  { %v159_v11 = vpop.xlane.xlu0 %158  ;;  %v5156_v6 = vand.u32 4294901760, %v839_v9  ;;  %v247_v4 = vmul.f32 0.00390625, %v162_v19  ;;  %v344_v49 = vmul.f32 %v5142_v28, %v5142_v28  ;;  %v5164_v3 = vand.u32 4294901760, %v838_v61 }
  0xc9   :  { %403 = vadd.xlane.f32.xlu0 %v402_v52  ;;  %v340_v46 = vmul.f32 %v5135_v0, %v5135_v0  ;;  %v341_v5 = vmul.f32 %v5138_v1, %v5138_v1  ;;  %v246_v2 = vmul.f32 0.00390625, %v159_v11  ;;  %v408_v37 = vadd.f32 %v343_v8, %v342_v55 }
  0xca   :  { %8291 = vst [vmem:[#allocation52_spill] sm:$0xff] %v5156_v6  ;;  %v5160_v62 = vsub.f32 %v839_v9, %v5156_v6  ;;  %8293 = vst [vmem:[#allocation54_spill] sm:$0xff] %v5164_v3  ;;  %898 = vmatpush2.msra.mxu0 %v5156_v6  ;;  %v345_v9 = vmul.f32 %v5145_v10, %v5145_v10 }
  0xcb   :  { %v168_v56 = vpop.xlane.xlu1 %167  ;;  %v405_v57 = vadd.f32 %v341_v5, %v340_v46  ;;  %v5168_v7 = vsub.f32 %v4808_v14, %v246_v2  ;;  %v5171_v19 = vsub.f32 %v4810_v15, %v246_v2  ;;  %899 = vmatprep.subr.mxu0 %v8255_v43  ;;  %v5178_v46 = vsub.f32 %v838_v61, %v5164_v3 }
  0xcc   :  { %8292 = vst [vmem:[#allocation53_spill] sm:$0xff] %v5160_v62  ;;  %v249_v52 = vmul.f32 0.00390625, %v168_v56  ;;  %v165_v11 = vpop.xlane.xlu0 %164  ;;  %v7920_v55 = vand.u32 4294901760, %v5160_v62  ;;  %901 = vmatpush2.msra.mxu0 %v5164_v3  ;;  %v5185_v14 = vsub.f32 %v4806_v13, %v247_v4 }
  0xcd   :  { %406 = vadd.xlane.f32.xlu0 %v405_v57  ;;  %v248_v8 = vmul.f32 0.00390625, %v165_v11  ;;  %8294 = vst [vmem:[#allocation55_spill] sm:$0xff] %v5178_v46  ;;  %v5182_v57 = vsub.f32 %v4804_v12, %v247_v4  ;;  %902 = vmatprep.subr.mxu0 %v8255_v43  ;;  %v7925_v56 = vand.u32 4294901760, %v5178_v46  ;;  %v837_v12 = vld [vmem:[#allocation6 + $0xd8] sm:$0xff]  ;;  %v411_v11 = vadd.f32 %v345_v9, %v344_v49 }
  0xce   :  { %v1549_v5 = vsub.f32 %v5160_v62, %v7920_v55  ;;  %v5192_v2 = vsub.f32 %v4814_v17, %v249_v52  ;;  %v5195_v61 = vsub.f32 %v4816_v18, %v249_v52  ;;  %v346_v13 = vmul.f32 %v5168_v7, %v5168_v7 }
  0xcf   :  { %v174_v15 = vpop.xlane.xlu1 %173  ;;  %v347_v4 = vmul.f32 %v5171_v19, %v5171_v19  ;;  %v5203_v3 = vsub.f32 %v4820_v20, %v248_v8  ;;  %v5206_v17 = vsub.f32 %v4822_v21, %v248_v8  ;;  %v1556_v52 = vsub.f32 %v5178_v46, %v7925_v56  ;;  %v836_v20 = vld [vmem:[#allocation6 + $0xd0] sm:$0xff] }
  0xd0   :  { %v1550_v55 = vand.u32 4294901760, %v1549_v5  ;;  %v171_v18 = vpop.xlane.xlu0 %170  ;;  %v348_v9 = vmul.f32 %v5182_v57, %v5182_v57  ;;  %v349_v6 = vmul.f32 %v5185_v14, %v5185_v14  ;;  %v5215_v5 = vand.u32 4294901760, %v837_v12 }
  0xd1   :  { %409 = vadd.xlane.f32.xlu0 %v408_v37  ;;  %v251_v37 = vmul.f32 0.00390625, %v174_v15  ;;  %v352_v21 = vmul.f32 %v5192_v2, %v5192_v2  ;;  %v353_v8 = vmul.f32 %v5195_v61, %v5195_v61  ;;  %v1557_v15 = vand.u32 4294901760, %v1556_v52 }
  0xd2   :  { %1551 = vmatpush2.msra.mxu1 %v1550_v55  ;;  %8295 = vst [vmem:[#allocation56_spill] sm:$0xff] %v5215_v5  ;;  %v414_v56 = vadd.f32 %v347_v4, %v346_v13  ;;  %v250_v46 = vmul.f32 0.00390625, %v171_v18  ;;  %v5223_v62 = vsub.f32 %v837_v12, %v5215_v5  ;;  %904 = vmatpush2.msra.mxu0 %v5215_v5  ;;  %v5230_v59 = vand.u32 4294901760, %v836_v20 }
  0xd3   :  { %v180_v49 = vpop.xlane.xlu1 %179  ;;  %1552 = vmatprep.subr.mxu1 %v8255_v43  ;;  %v350_v55 = vmul.f32 %v5203_v3, %v5203_v3  ;;  %v351_v58 = vmul.f32 %v5206_v17, %v5206_v17  ;;  %905 = vmatprep.subr.mxu0 %v8255_v43  ;;  %v417_v4 = vadd.f32 %v349_v6, %v348_v9 }
  0xd4   :  { %8296 = vst [vmem:[#allocation57_spill] sm:$0xff] %v5223_v62  ;;  %1558 = vmatpush2.msra.mxu1 %v1557_v15  ;;  %8297 = vst [vmem:[#allocation58_spill] sm:$0xff] %v5230_v59  ;;  %v7938_v12 = vand.u32 4294901760, %v5223_v62  ;;  %v5239_v18 = vsub.f32 %v4828_v24, %v251_v37  ;;  %v5241_v5 = vadd.f32 %v353_v8, %v352_v21  ;;  %v177_v15 = vpop.xlane.xlu0 %176  ;;  %907 = vmatpush2.msra.mxu0 %v5230_v59 }
  0xd5   :  { %412 = vadd.xlane.f32.xlu0 %v411_v11  ;;  %v5234_v11 = vsub.f32 %v4826_v23, %v251_v37  ;;  %1559 = vmatprep.subr.mxu1 %v8255_v43  ;;  %v5244_v51 = vsub.f32 %v836_v20, %v5230_v59  ;;  %v5248_v23 = vsub.f32 %v4832_v26, %v250_v46  ;;  %v835_v26 = vld [vmem:[#allocation6 + $0xc8] sm:$0xff]  ;;  %v253_v21 = vmul.f32 0.00390625, %v180_v49 }
  0xd6   :  { %v5251_v6 = vsub.f32 %v4834_v27, %v250_v46  ;;  %v1563_v24 = vsub.f32 %v5223_v62, %v7938_v12  ;;  %908 = vmatprep.subr.mxu0 %v8255_v43  ;;  %v420_v20 = vadd.f32 %v351_v58, %v350_v55  ;;  %v252_v27 = vmul.f32 0.00390625, %v177_v15 }
  0xd7   :  { %v186_v13 = vpop.xlane.xlu1 %185  ;;  %8298 = vst [vmem:[#allocation59_spill] sm:$0xff] %v5244_v51  ;;  %v5266_v46 = vmul.f32 %v5234_v11, %v5234_v11  ;;  %v354_v49 = vmul.f32 %v5248_v23, %v5248_v23  ;;  %v5281_v15 = vmul.f32 %v5239_v18, %v5239_v18  ;;  %v5293_v62 = vsub.f32 %v4838_v29, %v253_v21 }
  0xd8   :  { %v255_v52 = vmul.f32 0.00390625, %v186_v13  ;;  %v1564_v13 = vand.u32 4294901760, %v1563_v24  ;;  %v355_v55 = vmul.f32 %v5251_v6, %v5251_v6  ;;  %v5283_v24 = vand.u32 4294901760, %v835_v26 }
  0xd9   :  { %415 = vadd.xlane.f32.xlu0 %v414_v56  ;;  %v7941_v56 = vand.u32 4294901760, %v5244_v51 }
  0xda   :  { %v5258_v37 = vsub.f32 %v4850_v35, %v255_v52  ;;  %v5261_v9 = vsub.f32 %v4852_v36, %v255_v52  ;;  %v183_v52 = vpop.xlane.xlu0 %182  ;;  %1565 = vmatpush2.msra.mxu1 %v1564_v13  ;;  %8301 = vst [vmem:[#allocation62_spill] sm:$0xff] %v5283_v24  ;;  %910 = vmatpush2.msra.mxu0 %v5283_v24 }
  0xdb   :  { %v192_v8 = vpop.xlane.xlu1 %191  ;;  %v1570_v58 = vsub.f32 %v5244_v51, %v7941_v56  ;;  %1566 = vmatprep.subr.mxu1 %v8255_v43  ;;  %911 = vmatprep.subr.mxu0 %v8255_v43 }
  0xdc   :  { %8299 = vst [vmem:[#allocation60_spill] sm:$0xff] %v5258_v37  ;;  %8300 = vst [vmem:[#allocation61_spill] sm:$0xff] %v5261_v9  ;;  %v257_v12 = vmul.f32 0.00390625, %v192_v8  ;;  %v364_v35 = vmul.f32 %v5258_v37, %v5258_v37  ;;  %v365_v36 = vmul.f32 %v5261_v9, %v5261_v9  ;;  %v834_v8 = vld [vmem:[#allocation6 + $0xc0] sm:$0xff]  ;;  %v5296_v37 = vsub.f32 %v4840_v30, %v253_v21 }
  0xdd   :  { %418 = vadd.xlane.f32.xlu0 %v417_v4  ;;  %v1571_v51 = vand.u32 4294901760, %v1570_v58  ;;  %v5299_v9 = vsub.f32 %v4844_v32, %v252_v27  ;;  %v5309_v30 = vand.u32 4294901760, %v834_v8  ;;  %v5312_v32 = vsub.f32 %v4846_v33, %v252_v27 }
  0xde   :  { %v5286_v59 = vsub.f32 %v4862_v41, %v257_v12  ;;  %v5289_v56 = vsub.f32 %v4864_v42, %v257_v12  ;;  %v441_v4 = vadd.f32 %v365_v36, %v364_v35  ;;  %v5302_v41 = vsub.f32 %v835_v26, %v5283_v24 }
  0xdf   :  { %v198_v13 = vpop.xlane.xlu1 %197  ;;  %1572 = vmatpush2.msra.mxu1 %v1571_v51  ;;  %8305 = vst [vmem:[#allocation66_spill] sm:$0xff] %v5309_v30  ;;  %v426_v21 = vadd.f32 %v355_v55, %v354_v49  ;;  %v254_v26 = vmul.f32 0.00390625, %v183_v52  ;;  %v189_v51 = vpop.xlane.xlu0 %188  ;;  %v360_v27 = vmul.f32 %v5293_v62, %v5293_v62  ;;  %913 = vmatpush2.msra.mxu0 %v5309_v30 }
  0xe0   :  { %8302 = vst [vmem:[#allocation63_spill] sm:$0xff] %v5286_v59  ;;  %8303 = vst [vmem:[#allocation64_spill] sm:$0xff] %v5289_v56  ;;  %v259_v42 = vmul.f32 0.00390625, %v198_v13  ;;  %442 = vadd.xlane.f32.xlu1 %v441_v4  ;;  %v368_v12 = vmul.f32 %v5286_v59, %v5286_v59  ;;  %v369_v29 = vmul.f32 %v5289_v56, %v5289_v56  ;;  %1573 = vmatprep.subr.mxu1 %v8255_v43  ;;  %v8328_v59 = vld [vmem:[#allocation12_spill] sm:$0xff] }
  0xe1   :  { %8304 = vst [vmem:[#allocation65_spill] sm:$0xff] %v5302_v41  ;;  %421 = vadd.xlane.f32.xlu0 %v420_v20  ;;  %v7948_v35 = vand.u32 4294901760, %v5302_v41  ;;  %v5323_v13 = vsub.f32 %v834_v8, %v5309_v30  ;;  %v358_v20 = vmul.f32 %v5299_v9, %v5299_v9  ;;  %914 = vmatprep.subr.mxu0 %v8255_v43 }
  0xe2   :  { %v5317_v36 = vsub.f32 %v4874_v47, %v259_v42  ;;  %v5320_v58 = vsub.f32 %v4876_v48, %v259_v42  ;;  %v447_v4 = vadd.f32 %v369_v29, %v368_v12  ;;  %v361_v47 = vmul.f32 %v5296_v37, %v5296_v37  ;;  %v833_v42 = vld [vmem:[#allocation6 + $0xb8] sm:$0xff] }
  0xe3   :  { %8308 = vst [vmem:[#allocation69_spill] sm:$0xff] %v5323_v13  ;;  %v204_v33 = vpop.xlane.xlu1 %203  ;;  %v1577_v48 = vsub.f32 %v5302_v41, %v7948_v35  ;;  %v5344_v12 = vsub.f32 %v4856_v38, %v254_v26  ;;  %v359_v29 = vmul.f32 %v5312_v32, %v5312_v32  ;;  %v5360_v38 = vsub.f32 %v4858_v39, %v254_v26 }
  0xe4   :  { %8306 = vst [vmem:[#allocation67_spill] sm:$0xff] %v5317_v36  ;;  %8307 = vst [vmem:[#allocation68_spill] sm:$0xff] %v5320_v58  ;;  %v261_v52 = vmul.f32 0.00390625, %v204_v33  ;;  %448 = vadd.xlane.f32.xlu1 %v447_v4  ;;  %v372_v49 = vmul.f32 %v5317_v36, %v5317_v36  ;;  %v373_v55 = vmul.f32 %v5320_v58, %v5320_v58  ;;  %v256_v4 = vmul.f32 0.00390625, %v189_v51 }
  0xe5   :  { %424 = vadd.xlane.f32.xlu0 %v5241_v5  ;;  %v1578_v33 = vand.u32 4294901760, %v1577_v48  ;;  %v8311_v36 = vand.u32 4294901760, %v5323_v13  ;;  %v832_v5 = vld [vmem:[#allocation6 + $0xb0] sm:$0xff]  ;;  %v5362_v51 = vand.u32 4294901760, %v833_v42  ;;  %v831_v48 = vld [vmem:[#allocation6 + $0xa8] sm:$0xff]  ;;  %v432_v39 = vadd.f32 %v359_v29, %v358_v20 }
  0xe6   :  { %v5349_v35 = vsub.f32 %v4884_v53, %v261_v52  ;;  %v5352_v30 = vsub.f32 %v4886_v54, %v261_v52  ;;  %v453_v8 = vadd.f32 %v373_v55, %v372_v49  ;;  %v830_v49 = vld [vmem:[#allocation6 + $0xa0] sm:$0xff]  ;;  %v5371_v26 = vadd.f32 %v361_v47, %v360_v27  ;;  %v195_v55 = vpop.xlane.xlu0 %194 }
  0xe7   :  { %v1584_v58 = vsub.f32 %v5323_v13, %v8311_v36  ;;  %v5357_v24 = vpop.xlane.xlu1 %206  ;;  %1579 = vmatpush2.msra.mxu1 %v1578_v33  ;;  %8312 = vst [vmem:[#allocation72_spill] sm:$0xff] %v5362_v51  ;;  %v429_v36 = vadd.f32 %v5281_v15, %v5266_v46  ;;  %v5376_v33 = vand.u32 4294901760, %v832_v5  ;;  %916 = vmatpush2.msra.mxu0 %v5362_v51  ;;  %v5386_v15 = vand.u32 4294901760, %v831_v48  ;;  %v826_v13 = vld [vmem:[#allocation6 + $0x80] sm:$0xff] }
  0xe8   :  { %8309 = vst [vmem:[#allocation70_spill] sm:$0xff] %v5349_v35  ;;  %8310 = vst [vmem:[#allocation71_spill] sm:$0xff] %v5352_v30  ;;  %454 = vadd.xlane.f32.xlu1 %v453_v8  ;;  %v376_v53 = vmul.f32 %v5349_v35, %v5349_v35  ;;  %v377_v54 = vmul.f32 %v5352_v30, %v5352_v30  ;;  %1580 = vmatprep.subr.mxu1 %v8255_v43  ;;  %v5396_v47 = vand.u32 4294901760, %v830_v49 }
  0xe9   :  { %v1585_v52 = vand.u32 4294901760, %v1584_v58  ;;  %427 = vadd.xlane.f32.xlu0 %v426_v21  ;;  %v5374_v8 = vsub.f32 %v833_v42, %v5362_v51  ;;  %8314 = vst [vmem:[#allocation74_spill] sm:$0xff] %v5376_v33  ;;  %v5380_v30 = vsub.f32 %v4868_v44, %v256_v4  ;;  %v5384_v46 = vmul.f32 %v5344_v12, %v5344_v12  ;;  %v829_v21 = vld [vmem:[#allocation6 + $0x98] sm:$0xff] }
  0xea   :  { %v459_v35 = vadd.f32 %v377_v54, %v376_v53  ;;  %8315 = vst [vmem:[#allocation75_spill] sm:$0xff] %v5386_v15  ;;  %917 = vmatprep.subr.mxu0 %v8255_v43  ;;  %v363_v20 = vmul.f32 %v5360_v38, %v5360_v38  ;;  %v5394_v44 = vsub.f32 %v832_v5, %v5376_v33  ;;  %8317 = vst [vmem:[#allocation77_spill] sm:$0xff] %v5396_v47 }
  0xeb   :  { %8313 = vst [vmem:[#allocation73_spill] sm:$0xff] %v5374_v8  ;;  %1586 = vmatpush2.msra.mxu1 %v1585_v52  ;;  %v210_v58 = vpop.xlane.xlu1 %209  ;;  %v7959_v27 = vand.u32 4294901760, %v5374_v8  ;;  %919 = vmatpush2.msra.mxu0 %v5376_v33  ;;  %v5400_v29 = vsub.f32 %v4870_v45, %v256_v4  ;;  %v258_v53 = vmul.f32 0.00390625, %v195_v55  ;;  %v5403_v54 = vsub.f32 %v831_v48, %v5386_v15  ;;  %v8322_v4 = vld [vmem:[#allocation13_spill] sm:$0xff] }
  0xec   :  { %1587 = vmatprep.subr.mxu1 %v8255_v43  ;;  %8316 = vst [vmem:[#allocation76_spill] sm:$0xff] %v5394_v44  ;;  %v263_v42 = vmul.f32 0.00390625, %v210_v58  ;;  %460 = vadd.xlane.f32.xlu1 %v459_v35  ;;  %v5411_v33 = vsub.f32 %v830_v49, %v5396_v47  ;;  %v5413_v35 = vand.u32 4294901760, %v829_v21  ;;  %v828_v58 = vld [vmem:[#allocation6 + $0x90] sm:$0xff] }
  0xed   :  { %8318 = vst [vmem:[#allocation78_spill] sm:$0xff] %v5403_v54  ;;  %920 = vmatprep.subr.mxu0 %v8255_v43  ;;  %430 = vadd.xlane.f32.xlu0 %v429_v36  ;;  %v1591_v5 = vsub.f32 %v5374_v8, %v7959_v27  ;;  %v366_v36 = vmul.f32 %v5380_v30, %v5380_v30  ;;  %v201_v27 = vpop.xlane.xlu0 %200  ;;  %v8326_v8 = vand.u32 4294901760, %v5403_v54 }
  0xee   :  { %8319 = vst [vmem:[#allocation79_spill] sm:$0xff] %v5411_v33  ;;  %8320 = vst [vmem:[#allocation80_spill] sm:$0xff] %v5413_v35  ;;  %922 = vmatpush2.msra.mxu0 %v5386_v15  ;;  %v5417_v45 = vsub.f32 %v4891_v63, %v263_v42  ;;  %v5420_v48 = vsub.f32 %v8322_v4, %v263_v42  ;;  %v8324_v15 = vand.u32 4294901760, %v5394_v44  ;;  %v7980_v51 = vand.u32 4294901760, %v5411_v33 }
  0xef   :  { %923 = vmatprep.subr.mxu0 %v8255_v43  ;;  %v5426_v49 = vpop.xlane.xlu1 %212  ;;  %v1592_v52 = vand.u32 4294901760, %v1591_v5  ;;  %v5433_v42 = vsub.f32 %v829_v21, %v5413_v35  ;;  %v367_v5 = vmul.f32 %v5400_v29, %v5400_v29  ;;  %v5453_v56 = vsub.f32 %v8328_v59, %v258_v53 }
  0xf0   :  { %8321 = vst [vmem:[#allocation81_spill] sm:$0xff] %v5417_v45  ;;  %8323 = vst [vmem:[#allocation13_spill] sm:$0xff] %v5420_v48  ;;  %v1598_v63 = vsub.f32 %v5394_v44, %v8324_v15  ;;  %925 = vmatpush2.msra.mxu0 %v5396_v47  ;;  %v380_v4 = vmul.f32 %v5417_v45, %v5417_v45  ;;  %v381_v55 = vmul.f32 %v5420_v48, %v5420_v48  ;;  %v827_v44 = vld [vmem:[#allocation6 + $0x88] sm:$0xff] }
  0xf1   :  { %8325 = vst [vmem:[#allocation82_spill] sm:$0xff] %v5433_v42  ;;  %v1605_v15 = vsub.f32 %v5403_v54, %v8326_v8  ;;  %926 = vmatprep.subr.mxu0 %v8255_v43  ;;  %433 = vadd.xlane.f32.xlu0 %v432_v39  ;;  %v1612_v47 = vsub.f32 %v5411_v33, %v7980_v51  ;;  %v7981_v45 = vand.u32 4294901760, %v5433_v42  ;;  %v5450_v48 = vand.u32 4294901760, %v828_v58 }
  0xf2   :  { %1593 = vmatpush2.msra.mxu1 %v1592_v52  ;;  %v1599_v21 = vand.u32 4294901760, %v1598_v63  ;;  %v465_v41 = vadd.f32 %v381_v55, %v380_v4  ;;  %v260_v8 = vmul.f32 0.00390625, %v201_v27  ;;  %928 = vmatpush2.msra.mxu0 %v5413_v35  ;;  %v5463_v55 = vand.u32 4294901760, %v827_v44 }
  0xf3   :  { %8327 = vst [vmem:[#allocation83_spill] sm:$0xff] %v5450_v48  ;;  %1594 = vmatprep.subr.mxu1 %v8255_v43  ;;  %v1606_v54 = vand.u32 4294901760, %v1605_v15  ;;  %v216_v39 = vpop.xlane.xlu1 %215  ;;  %v1613_v52 = vand.u32 4294901760, %v1612_v47  ;;  %v1619_v63 = vsub.f32 %v5433_v42, %v7981_v45  ;;  %v5461_v51 = vsub.f32 %v828_v58, %v5450_v48  ;;  %929 = vmatprep.subr.mxu0 %v8255_v43  ;;  %v4609_v47 = vld [vmem:[#allocation4 + $0x108] sm:$0xff]  ;;  %v4624_v42 = vld [vmem:[#allocation4 + $0x1c0] sm:$0xff] }
  0xf4   :  { %1600 = vmatpush2.msra.mxu1 %v1599_v21  ;;  %8330 = vst [vmem:[#allocation84_spill] sm:$0xff] %v5463_v55  ;;  %v265_v59 = vmul.f32 0.00390625, %v216_v39  ;;  %466 = vadd.xlane.f32.xlu1 %v465_v41  ;;  %v438_v27 = vadd.f32 %v363_v20, %v5384_v46  ;;  %v5468_v4 = vand.u32 4294901760, %v826_v13  ;;  %v5471_v15 = vsub.f32 %v4609_v47, %v258_v53  ;;  %v8333_v39 = vld [vmem:[#allocation14_spill] sm:$0xff]  ;;  %v8335_v46 = vld [vmem:[#allocation15_spill] sm:$0xff] }
  0xf5   :  { %8329 = vst [vmem:[#allocation12_spill] sm:$0xff] %v5461_v51  ;;  %1601 = vmatprep.subr.mxu1 %v8255_v43  ;;  %436 = vadd.xlane.f32.xlu0 %v5371_v26  ;;  %v1620_v58 = vand.u32 4294901760, %v1619_v63  ;;  %v7984_v21 = vand.u32 4294901760, %v5461_v51  ;;  %v5475_v45 = vsub.f32 %v827_v44, %v5463_v55  ;;  %v444_v35 = vadd.f32 %v367_v5, %v366_v36  ;;  %v4611_v36 = vld [vmem:[#allocation4 + $0x128] sm:$0xff] }
  0xf6   :  { %8331 = vst [vmem:[#allocation85_spill] sm:$0xff] %v5468_v4  ;;  %1607 = vmatpush2.msra.mxu1 %v1606_v54  ;;  %v5478_v41 = vsub.f32 %v8333_v39, %v265_v59  ;;  %v5481_v20 = vsub.f32 %v8335_v46, %v265_v59  ;;  %v5485_v26 = vsub.f32 %v826_v13, %v5468_v4  ;;  %v4610_v54 = vld [vmem:[#allocation4 + $0x120] sm:$0xff]  ;;  %v262_v46 = vmul.f32 0.00390625, %v5357_v24 }
  0xf7   :  { %8332 = vst [vmem:[#allocation86_spill] sm:$0xff] %v5475_v45  ;;  %1608 = vmatprep.subr.mxu1 %v8255_v43  ;;  %v219_v53 = vpop.xlane.xlu1 %218  ;;  %v5487_v63 = vsub.f32 %v4610_v54, %v260_v8  ;;  %v370_v44 = vmul.f32 %v5453_v56, %v5453_v56  ;;  %v1626_v47 = vsub.f32 %v5461_v51, %v7984_v21  ;;  %v7988_v59 = vand.u32 4294901760, %v5475_v45 }
  0xf8   :  { %8334 = vst [vmem:[#allocation14_spill] sm:$0xff] %v5478_v41  ;;  %8336 = vst [vmem:[#allocation15_spill] sm:$0xff] %v5481_v20  ;;  %1614 = vmatpush2.msra.mxu1 %v1613_v52  ;;  %931 = vmatpush2.msra.mxu0 %v5450_v48  ;;  %v5496_v5 = vsub.f32 %v4611_v36, %v260_v8  ;;  %v384_v13 = vmul.f32 %v5478_v41, %v5478_v41  ;;  %v7989_v52 = vand.u32 4294901760, %v5485_v26 }
  0xf9   :  { %8337 = vst [vmem:[#allocation87_spill] sm:$0xff] %v5485_v26  ;;  %v385_v39 = vmul.f32 %v5481_v20, %v5481_v20  ;;  %1615 = vmatprep.subr.mxu1 %v8255_v43  ;;  %932 = vmatprep.subr.mxu0 %v8255_v43  ;;  %v371_v54 = vmul.f32 %v5471_v15, %v5471_v15  ;;  %v1627_v8 = vand.u32 4294901760, %v1626_v47 }
  0xfa   :  { %439 = vadd.xlane.f32.xlu0 %v438_v27  ;;  %1621 = vmatpush2.msra.mxu1 %v1620_v58  ;;  %v1633_v36 = vsub.f32 %v5475_v45, %v7988_v59  ;;  %v1640_v51 = vsub.f32 %v5485_v26, %v7989_v52  ;;  %v374_v58 = vmul.f32 %v5487_v63, %v5487_v63  ;;  %v4613_v52 = vld [vmem:[#allocation4 + $0x148] sm:$0xff]  ;;  %v4615_v45 = vld [vmem:[#allocation4 + $0x198] sm:$0xff] }
  0xfb   :  { %v471_v21 = vadd.f32 %v385_v39, %v384_v13  ;;  %1622 = vmatprep.subr.mxu1 %v8255_v43  ;;  %v222_v41 = vpop.xlane.xlu1 %221  ;;  %934 = vmatpush2.msra.mxu0 %v5463_v55  ;;  %v375_v47 = vmul.f32 %v5496_v5, %v5496_v5  ;;  %v4612_v39 = vld [vmem:[#allocation4 + $0x140] sm:$0xff]  ;;  %v5523_v26 = vsub.f32 %v4613_v52, %v262_v46  ;;  %v266_v52 = vmul.f32 0.00390625, %v219_v53 }
  0xfc   :  { %1628 = vmatpush2.msra.mxu1 %v1627_v8  ;;  %v1634_v24 = vand.u32 4294901760, %v1633_v36  ;;  %v267_v27 = vmul.f32 0.00390625, %v222_v41  ;;  %v1641_v13 = vand.u32 4294901760, %v1640_v51  ;;  %v5521_v59 = vsub.f32 %v4612_v39, %v262_v46  ;;  %935 = vmatprep.subr.mxu0 %v8255_v43 }
  0xfd   :  { %472 = vadd.xlane.f32.xlu1 %v471_v21  ;;  %1629 = vmatprep.subr.mxu1 %v8255_v43  ;;  %v264_v8 = vmul.f32 0.00390625, %v5426_v49  ;;  %v450_v41 = vadd.f32 %v371_v54, %v370_v44  ;;  %v4614_v21 = vld [vmem:[#allocation4 + $0x190] sm:$0xff]  ;;  %v456_v44 = vadd.f32 %v375_v47, %v374_v58  ;;  %v4617_v54 = vld [vmem:[#allocation4 + $0x168] sm:$0xff]  ;;  %v4618_v58 = vld [vmem:[#allocation4 + $0x180] sm:$0xff] }
  0xfe   :  { %445 = vadd.xlane.f32.xlu0 %v444_v35  ;;  %1635 = vmatpush2.msra.mxu1 %v1634_v24  ;;  %v5526_v36 = vsub.f32 %v4614_v21, %v267_v27  ;;  %v5528_v55 = vsub.f32 %v4615_v45, %v267_v27  ;;  %v4616_v45 = vld [vmem:[#allocation4 + $0x160] sm:$0xff]  ;;  %v378_v53 = vmul.f32 %v5521_v59, %v5521_v59  ;;  %v4619_v21 = vld [vmem:[#allocation4 + $0x188] sm:$0xff] }
  0xff   :  { %1636 = vmatprep.subr.mxu1 %v8255_v43  ;;  %v225_v51 = vpop.xlane.xlu1 %224  ;;  %937 = vmatpush2.msra.mxu0 %v5468_v4  ;;  %v5539_v46 = vsub.f32 %v4616_v45, %v264_v8  ;;  %v5541_v24 = vsub.f32 %v4617_v54, %v264_v8  ;;  %v379_v27 = vmul.f32 %v5523_v26, %v5523_v26 }
 0x100   :  { %8338 = vst [vmem:[#allocation88_spill] sm:$0xff] %v5526_v36  ;;  %8339 = vst [vmem:[#allocation89_spill] sm:$0xff] %v5528_v55  ;;  %1642 = vmatpush2.msra.mxu1 %v1641_v13  ;;  %v388_v35 = vmul.f32 %v5526_v36, %v5526_v36  ;;  %v389_v49 = vmul.f32 %v5528_v55, %v5528_v55  ;;  %1868 = vmatprep.subr.mxu0 %v8255_v43  ;;  %v268_v4 = vmul.f32 0.00390625, %v225_v51  ;;  %v4620_v55 = vld [vmem:[#allocation4 + $0x1b0] sm:$0xff] }
 0x101   :  { %2285 = vmatprep.subr.mxu1 %v8255_v43  ;;  %8340 = vst [vmem:[#allocation90_spill] sm:$0xff] %v5539_v46  ;;  %8341 = vst [vmem:[#allocation91_spill] sm:$0xff] %v5541_v24  ;;  %v5547_v47 = vsub.f32 %v4618_v58, %v266_v52  ;;  %v5549_v36 = vsub.f32 %v4619_v21, %v266_v52  ;;  %v462_v8 = vadd.f32 %v379_v27, %v378_v53  ;;  %v4622_v27 = vld [vmem:[#allocation4 + $0x1a0] sm:$0xff] }
 0x102   :  { %451 = vadd.xlane.f32.xlu0 %v450_v41  ;;  %v477_v13 = vadd.f32 %v389_v49, %v388_v35  ;;  %v382_v41 = vmul.f32 %v5539_v46, %v5539_v46  ;;  %v383_v54 = vmul.f32 %v5541_v24, %v5541_v24  ;;  %v4621_v49 = vld [vmem:[#allocation4 + $0x1b8] sm:$0xff] }
 0x103   :  { %v228_v39 = vpop.xlane.xlu1 %227  ;;  %8342 = vst [vmem:[#allocation92_spill] sm:$0xff] %v5547_v47  ;;  %v387_v53 = vmul.f32 %v5549_v36, %v5549_v36 }
 0x104   :  { %v269_v45 = vmul.f32 0.00390625, %v228_v39  ;;  %478 = vadd.xlane.f32.xlu1 %v477_v13  ;;  %v5567_v13 = vsub.f32 %v4622_v27, %v268_v4 }
 0x106   :  { %457 = vadd.xlane.f32.xlu0 %v456_v44  ;;  %v5555_v35 = vsub.f32 %v4620_v55, %v269_v45  ;;  %v5557_v58 = vsub.f32 %v4621_v49, %v269_v45  ;;  %v386_v44 = vmul.f32 %v5547_v47, %v5547_v47  ;;  %v4623_v55 = vld [vmem:[#allocation4 + $0x1a8] sm:$0xff]  ;;  %v468_v45 = vadd.f32 %v383_v54, %v382_v41  ;;  %v4627_v41 = vld [vmem:[#allocation4 + $0x1d8] sm:$0xff] }
 0x107   :  { %v231_v48 = vpop.xlane.xlu1 %230  ;;  %v5569_v39 = vsub.f32 %v4623_v55, %v268_v4  ;;  %v4625_v47 = vld [vmem:[#allocation4 + $0x1c8] sm:$0xff]  ;;  %v390_v27 = vmul.f32 %v5567_v13, %v5567_v13  ;;  %v4626_v4 = vld [vmem:[#allocation4 + $0x1d0] sm:$0xff]  ;;  %v4628_v55 = vld [vmem:[#allocation4 + $0x1e0] sm:$0xff] }
 0x108   :  { %8343 = vst [vmem:[#allocation93_spill] sm:$0xff] %v5555_v35  ;;  %8344 = vst [vmem:[#allocation94_spill] sm:$0xff] %v5557_v58  ;;  %v392_v52 = vmul.f32 %v5555_v35, %v5555_v35  ;;  %v393_v51 = vmul.f32 %v5557_v58, %v5557_v58  ;;  %v270_v21 = vmul.f32 0.00390625, %v231_v48  ;;  %v474_v58 = vadd.f32 %v387_v53, %v386_v44 }
 0x109   :  { %v391_v48 = vmul.f32 %v5569_v39, %v5569_v39 }
 0x10a   :  { %463 = vadd.xlane.f32.xlu0 %v462_v8  ;;  %v483_v49 = vadd.f32 %v393_v51, %v392_v52  ;;  %v5571_v46 = vsub.f32 %v4624_v42, %v270_v21  ;;  %v5573_v24 = vsub.f32 %v4625_v47, %v270_v21 }
 0x10b   :  { %v234_v35 = vpop.xlane.xlu1 %233  ;;  %v480_v51 = vadd.f32 %v391_v48, %v390_v27  ;;  %v4630_v48 = vld [vmem:[#allocation4 + $0x1f0] sm:$0xff] }
 0x10c   :  { %v271_v20 = vmul.f32 0.00390625, %v234_v35  ;;  %484 = vadd.xlane.f32.xlu1 %v483_v49  ;;  %8345 = vst [vmem:[#allocation95_spill] sm:$0xff] %v5571_v46  ;;  %8346 = vst [vmem:[#allocation96_spill] sm:$0xff] %v5573_v24  ;;  %v394_v44 = vmul.f32 %v5571_v46, %v5571_v46  ;;  %v395_v53 = vmul.f32 %v5573_v24, %v5573_v24 }
 0x10e   :  { %469 = vadd.xlane.f32.xlu0 %v468_v45  ;;  %v5579_v8 = vsub.f32 %v4626_v4, %v271_v20  ;;  %v5581_v54 = vsub.f32 %v4627_v41, %v271_v20  ;;  %v4629_v20 = vld [vmem:[#allocation4 + $0x1e8] sm:$0xff] }
 0x10f   :  { %v237_v35 = vpop.xlane.xlu1 %236 }
 0x110   :  { %8347 = vst [vmem:[#allocation97_spill] sm:$0xff] %v5579_v8  ;;  %8348 = vst [vmem:[#allocation98_spill] sm:$0xff] %v5581_v54  ;;  %v272_v52 = vmul.f32 0.00390625, %v237_v35  ;;  %v396_v42 = vmul.f32 %v5579_v8, %v5579_v8  ;;  %v397_v47 = vmul.f32 %v5581_v54, %v5581_v54  ;;  %v486_v35 = vadd.f32 %v395_v53, %v394_v44 }
 0x112   :  { %475 = vadd.xlane.f32.xlu0 %v474_v58  ;;  %v5591_v21 = vsub.f32 %v4628_v55, %v272_v52  ;;  %v5593_v45 = vsub.f32 %v4629_v20, %v272_v52  ;;  %v489_v49 = vadd.f32 %v397_v47, %v396_v42  ;;  %v4631_v55 = vld [vmem:[#allocation4 + $0x1f8] sm:$0xff] }
 0x113   :  { %v240_v4 = vpop.xlane.xlu1 %239 }
 0x114   :  { %8349 = vst [vmem:[#allocation99_spill] sm:$0xff] %v5591_v21  ;;  %8350 = vst [vmem:[#allocation100_spill] sm:$0xff] %v5593_v45  ;;  %v273_v41 = vmul.f32 0.00390625, %v240_v4  ;;  %490 = vadd.xlane.f32.xlu1 %v489_v49  ;;  %v398_v58 = vmul.f32 %v5591_v21, %v5591_v21  ;;  %v399_v27 = vmul.f32 %v5593_v45, %v5593_v45 }
 0x116   :  { %481 = vadd.xlane.f32.xlu0 %v480_v51  ;;  %v5599_v8 = vsub.f32 %v4630_v48, %v273_v41  ;;  %v5601_v54 = vsub.f32 %v4631_v55, %v273_v41  ;;  %v492_v47 = vadd.f32 %v399_v27, %v398_v58  ;;  %v660_v48 = vlaneseq }
 0x118   :  { %8351 = vst [vmem:[#allocation101_spill] sm:$0xff] %v5599_v8  ;;  %8352 = vst [vmem:[#allocation102_spill] sm:$0xff] %v5601_v54  ;;  %v400_v52 = vmul.f32 %v5599_v8, %v5599_v8  ;;  %v401_v42 = vmul.f32 %v5601_v54, %v5601_v54  ;;  %v5607_v8 = vshrl.u32 %v660_v48, 7 }
 0x11a   :  { %487 = vadd.xlane.f32.xlu0 %v486_v35  ;;  %v495_v51 = vadd.f32 %v401_v42, %v400_v52  ;;  %8353 = vst [vmem:[#allocation103_spill] sm:$0xff] %v5607_v8  ;;  %v666_v58 = vsub.s32 1, %v5607_v8  ;;  %v662_v27 = vsub.s32 0, %v5607_v8  ;;  %v658_v52 = vld [vmem:[%s7845_s2] sm:$0x3] }
 0x11c   :  { %496 = vadd.xlane.f32.xlu1 %v495_v51 }
 0x11e   :  { %493 = vadd.xlane.f32.xlu0 %v492_v47  ;;  %v734_v47 = vld [vmem:[%s7846_s3] sm:$0x3] }
 0x152   :  { %v404_v44 = vpop.xlane.xlu0 %403 }
 0x153   :  { %v498_v53 = vmul.f32 0.00390625, %v404_v44 }
 0x155   :  { %v530_v20 = vadd.f32 1e-05, %v498_v53  ;;  %v5617_v53 = vrot.slane %v658_v52, %v666_v58 }
 0x156   :  { %v407_v49 = vpop.xlane.xlu0 %406 }
 0x157   :  { %4545 = vrsqrt.f32 %v530_v20  ;;  %v499_v4 = vmul.f32 0.00390625, %v407_v49 }
 0x159   :  { %v531_v41 = vadd.f32 1e-05, %v499_v4  ;;  %v5625_v4 = vrot.slane %v734_v47, %v662_v27 }
 0x15a   :  { %v410_v55 = vpop.xlane.xlu0 %409 }
 0x15b   :  { %4547 = vrsqrt.f32 %v531_v41  ;;  %v500_v21 = vmul.f32 0.00390625, %v410_v55 }
 0x15d   :  { %v532_v45 = vadd.f32 1e-05, %v500_v21  ;;  %v5619_v21 = vrot.slane %v658_v52, %v662_v27 }
 0x15e   :  { %v413_v54 = vpop.xlane.xlu0 %412 }
 0x15f   :  { %4549 = vrsqrt.f32 %v532_v45  ;;  %v501_v35 = vmul.f32 0.00390625, %v413_v54  ;;  %v5621_v45 = vrot.slane %v734_v47, %v666_v58 }
 0x161   :  { %v533_v42 = vadd.f32 1e-05, %v501_v35 }
 0x162   :  { %v416_v51 = vpop.xlane.xlu0 %415 }
 0x163   :  { %v502_v44 = vmul.f32 0.00390625, %v416_v51  ;;  %4551 = vrsqrt.f32 %v533_v42 }
 0x164   :  { %v4546_v54 = vpop.eup %4545 }
 0x165   :  { %v595_v20 = vmul.f32 %v4546_v54, %v5119_v25  ;;  %v594_v49 = vmul.f32 %v4546_v54, %v5116_v50  ;;  %v534_v48 = vadd.f32 1e-05, %v502_v44 }
 0x166   :  { %v419_v41 = vpop.xlane.xlu0 %418 }
 0x167   :  { %v503_v55 = vmul.f32 0.00390625, %v419_v41  ;;  %v671_v35 = vmul.f32 %v5617_v53, %v595_v20  ;;  %v670_v51 = vmul.f32 %v5619_v21, %v594_v49  ;;  %4553 = vrsqrt.f32 %v534_v48 }
 0x168   :  { %v4548_v8 = vpop.eup %4547 }
 0x169   :  { %v535_v52 = vadd.f32 1e-05, %v503_v55  ;;  %v443_v46 = vpop.xlane.xlu1 %442  ;;  %v747_v58 = vadd.f32 %v5621_v45, %v671_v35  ;;  %v746_v42 = vadd.f32 %v5625_v4, %v670_v51  ;;  %v597_v25 = vmul.f32 %v4548_v8, %v5138_v1 }
 0x16a   :  { %v511_v50 = vmul.f32 0.00390625, %v443_v46  ;;  %v422_v27 = vpop.xlane.xlu0 %421  ;;  %v596_v47 = vmul.f32 %v4548_v8, %v5135_v0 }
 0x16b   :  { %v504_v44 = vmul.f32 0.00390625, %v422_v27  ;;  %v5633_v54 = vand.u32 4294901760, %v747_v58  ;;  %v5635_v20 = vand.u32 4294901760, %v746_v42  ;;  %4555 = vrsqrt.f32 %v535_v52 }
 0x16c   :  { %v4550_v49 = vpop.eup %4549  ;;  %v543_v41 = vadd.f32 1e-05, %v511_v50  ;;  %v673_v55 = vmul.f32 %v5617_v53, %v597_v25  ;;  %v672_v35 = vmul.f32 %v5619_v21, %v596_v47 }
 0x16d   :  { %8354 = vst [vmem:[#allocation104_spill] sm:$0xff] %v5633_v54  ;;  %8355 = vst [vmem:[#allocation105_spill] sm:$0xff] %v5635_v20  ;;  %v536_v51 = vadd.f32 1e-05, %v504_v44  ;;  %1644 = vmatprep.mubr.f32.mxu1 %v5633_v54  ;;  %v449_v1 = vpop.xlane.xlu1 %448  ;;  %v5641_v46 = vsub.f32 %v747_v58, %v5633_v54  ;;  %v599_v0 = vmul.f32 %v4550_v49, %v5127_v16  ;;  %v8357_v44 = vld [vmem:[#allocation16_spill] sm:$0xff] }
 0x16e   :  { %v5645_v8 = vsub.f32 %v746_v42, %v5635_v20  ;;  %4557 = vrsqrt.f32 %v543_v41  ;;  %v513_v48 = vmul.f32 0.00390625, %v449_v1  ;;  %1646 = vmatmul.mubr.f32.vlgmr.msra.gmra.mxu1 %v5635_v20  ;;  %v425_v52 = vpop.xlane.xlu0 %424  ;;  %v749_v25 = vadd.f32 %v5621_v45, %v673_v55 }
 0x16f   :  { %8356 = vst [vmem:[#allocation106_spill] sm:$0xff] %v5641_v46  ;;  %v748_v50 = vadd.f32 %v5625_v4, %v672_v35  ;;  %4559 = vrsqrt.f32 %v536_v51  ;;  %v505_v27 = vmul.f32 0.00390625, %v425_v52  ;;  %v8023_v47 = vand.u32 4294901760, %v5641_v46  ;;  %2287 = vmatpush1.msra.mxu1 %v8357_v44  ;;  %v8360_v52 = vld [vmem:[#allocation17_spill] sm:$0xff] }
 0x170   :  { %v675_v58 = vmul.f32 %v5617_v53, %v599_v0  ;;  %v545_v16 = vadd.f32 1e-05, %v513_v48  ;;  %v5653_v42 = vand.u32 4294901760, %v749_v25  ;;  %2288 = vmatprep.subr.mxu1 %v8255_v43  ;;  %v598_v0 = vmul.f32 %v4550_v49, %v5124_v40  ;;  %v4552_v48 = vpop.eup %4551 }
 0x171   :  { %v5655_v41 = vand.u32 4294901760, %v748_v50  ;;  %v537_v55 = vadd.f32 1e-05, %v505_v27  ;;  %v455_v20 = vpop.xlane.xlu1 %454  ;;  %v941_v35 = vsub.f32 %v5641_v46, %v8023_v47  ;;  %2290 = vmatpush1.msra.mxu1 %v8360_v52  ;;  %v8361_v44 = vand.u32 4294901760, %v5645_v8  ;;  %v8363_v46 = vld [vmem:[#allocation18_spill] sm:$0xff] }
 0x172   :  { %8358 = vst [vmem:[#allocation107_spill] sm:$0xff] %v5653_v42  ;;  %v751_v51 = vadd.f32 %v5621_v45, %v675_v58  ;;  %4561 = vrsqrt.f32 %v545_v16  ;;  %1651 = vmatprep.mubr.f32.mxu1 %v5653_v42  ;;  %v515_v54 = vmul.f32 0.00390625, %v455_v20  ;;  %v428_v1 = vpop.xlane.xlu0 %427  ;;  %v5670_v24 = vsub.f32 %v749_v25, %v5653_v42  ;;  %2291 = vmatprep.subr.mxu1 %v8255_v43  ;;  %v8368_v42 = vld [vmem:[#allocation23_spill] sm:$0xff] }
 0x173   :  { %8359 = vst [vmem:[#allocation108_spill] sm:$0xff] %v5655_v41  ;;  %v947_v27 = vsub.f32 %v5645_v8, %v8361_v44  ;;  %4563 = vrsqrt.f32 %v537_v55  ;;  %1653 = vmatmul.mubr.f32.gmra.mxu1 %v5655_v41  ;;  %v506_v40 = vmul.f32 0.00390625, %v428_v1  ;;  %v942_v49 = vand.u32 4294901760, %v941_v35 }
 0x174   :  { %v5674_v58 = vand.u32 4294901760, %v751_v51  ;;  %v547_v16 = vadd.f32 1e-05, %v515_v54  ;;  %v674_v20 = vmul.f32 %v5619_v21, %v598_v0  ;;  %v8028_v52 = vand.u32 4294901760, %v5670_v24  ;;  %2293 = vmatpush1.msra.mxu1 %v8363_v46  ;;  %v8378_v46 = vld [vmem:[#allocation26_spill] sm:$0xff] }
 0x175   :  { %v948_v47 = vand.u32 4294901760, %v947_v27  ;;  %v538_v44 = vadd.f32 1e-05, %v506_v40  ;;  %943 = vmatprep.mubr.f32.mxu0 %v942_v49  ;;  %v461_v25 = vpop.xlane.xlu1 %460  ;;  %v601_v55 = vmul.f32 %v4552_v48, %v5145_v10  ;;  %v5682_v1 = vsub.f32 %v748_v50, %v5655_v41  ;;  %2294 = vmatprep.subr.mxu1 %v8255_v43  ;;  %v4554_v49 = vpop.eup %4553  ;;  %v8365_v10 = vld [vmem:[#allocation22_spill] sm:$0xff] }
 0x176   :  { %8362 = vst [vmem:[#allocation109_spill] sm:$0xff] %v5674_v58  ;;  %1658 = vmatprep.mubr.f32.mxu1 %v5674_v58  ;;  %v600_v35 = vmul.f32 %v4552_v48, %v5142_v28  ;;  %4565 = vrsqrt.f32 %v547_v16  ;;  %v517_v54 = vmul.f32 0.00390625, %v461_v25  ;;  %v750_v0 = vadd.f32 %v5625_v4, %v674_v20  ;;  %v431_v27 = vpop.xlane.xlu0 %430  ;;  %v8366_v48 = vld [vmem:[#allocation19_spill] sm:$0xff] }
 0x177   :  { %8364 = vst [vmem:[#allocation110_spill] sm:$0xff] %v5682_v1  ;;  %949 = vmatmul.mubr.f32.vlgmr.msra.gmra.mxu0 %v948_v47  ;;  %v956_v40 = vsub.f32 %v5670_v24, %v8028_v52  ;;  %4567 = vrsqrt.f32 %v538_v44  ;;  %v507_v50 = vmul.f32 0.00390625, %v431_v27  ;;  %v677_v41 = vmul.f32 %v5617_v53, %v601_v55  ;;  %2296 = vmatpush1.msra.mxu1 %v8366_v48 }
 0x178   :  { %1871 = vmatpush1.msra.mxu0 %v8365_v10  ;;  %v8031_v28 = vand.u32 4294901760, %v5682_v1  ;;  %v549_v47 = vadd.f32 1e-05, %v517_v54  ;;  %v5694_v16 = vand.u32 4294901760, %v750_v0  ;;  %v676_v25 = vmul.f32 %v5619_v21, %v600_v35  ;;  %2297 = vmatprep.subr.mxu1 %v8255_v43  ;;  %v5699_v44 = vpop.eup %4555 }
 0x179   :  { %v957_v20 = vand.u32 4294901760, %v956_v40  ;;  %1872 = vmatprep.subr.mxu0 %v8255_v43  ;;  %v539_v52 = vadd.f32 1e-05, %v507_v50  ;;  %v753_v27 = vadd.f32 %v5621_v45, %v677_v41  ;;  %v5707_v54 = vsub.f32 %v751_v51, %v5674_v58  ;;  %v8370_v40 = vld [vmem:[#allocation20_spill] sm:$0xff] }
 0x17a   :  { %8367 = vst [vmem:[#allocation111_spill] sm:$0xff] %v5694_v16  ;;  %v962_v55 = vsub.f32 %v5682_v1, %v8031_v28  ;;  %1875 = vmatpush1.msra.mxu0 %v8368_v42  ;;  %2299 = vmatpush1.msra.mxu1 %v8370_v40  ;;  %4569 = vrsqrt.f32 %v549_v47  ;;  %v752_v35 = vadd.f32 %v5625_v4, %v676_v25  ;;  %v434_v50 = vpop.xlane.xlu0 %433  ;;  %v8381_v1 = vld [vmem:[#allocation27_spill] sm:$0xff] }
 0x17b   :  { %8369 = vst [vmem:[#allocation112_spill] sm:$0xff] %v5707_v54  ;;  %1660 = vmatmul.mubr.f32.gmra.mxu1 %v5694_v16  ;;  %958 = vmatprep.mubr.f32.mxu0 %v957_v20  ;;  %v603_v41 = vmul.f32 %v4554_v49, %v5171_v19  ;;  %v5714_v48 = vsub.f32 %v750_v0, %v5694_v16  ;;  %v5716_v28 = vpop.eup %4557  ;;  %4571 = vrsqrt.f32 %v539_v52  ;;  %v5718_v42 = vand.u32 4294901760, %v753_v27  ;;  %v8374_v16 = vld [vmem:[#allocation24_spill] sm:$0xff]  ;;  %v8375_v52 = vld [vmem:[#allocation21_spill] sm:$0xff] }
 0x17c   :  { %v963_v51 = vand.u32 4294901760, %v962_v55  ;;  %v508_v58 = vmul.f32 0.00390625, %v434_v50  ;;  %1876 = vmatprep.subr.mxu0 %v8255_v43  ;;  %2300 = vmatprep.subr.mxu1 %v8255_v43  ;;  %v5722_v47 = vpop.eup %4559  ;;  %v5724_v20 = vand.u32 4294901760, %v752_v35  ;;  %v602_v40 = vmul.f32 %v4554_v49, %v5168_v7 }
 0x17d   :  { %8371 = vst [vmem:[#allocation113_spill] sm:$0xff] %v5714_v48  ;;  %8372 = vst [vmem:[#allocation114_spill] sm:$0xff] %v5718_v42  ;;  %v679_v0 = vmul.f32 %v5617_v53, %v603_v41  ;;  %1879 = vmatpush1.msra.mxu0 %v8374_v16  ;;  %2302 = vmatpush1.msra.mxu1 %v8375_v52  ;;  %v467_v50 = vpop.xlane.xlu1 %466  ;;  %v5734_v10 = vsub.f32 %v753_v27, %v5718_v42  ;;  %v8376_v41 = vand.u32 4294901760, %v5707_v54 }
 0x17e   :  { %8373 = vst [vmem:[#allocation115_spill] sm:$0xff] %v5724_v20  ;;  %1665 = vmatprep.mubr.f32.mxu1 %v5718_v42  ;;  %964 = vmatmul.mubr.f32.gmra.mxu0 %v963_v51  ;;  %v540_v55 = vadd.f32 1e-05, %v508_v58  ;;  %v605_v19 = vmul.f32 %v5699_v44, %v5185_v14  ;;  %v519_v16 = vmul.f32 0.00390625, %v467_v50  ;;  %v8377_v58 = vand.u32 4294901760, %v5714_v48  ;;  %v437_v7 = vpop.xlane.xlu0 %436 }
 0x17f   :  { %1667 = vmatmul.mubr.f32.gmra.mxu1 %v5724_v20  ;;  %v971_v25 = vsub.f32 %v5707_v54, %v8376_v41  ;;  %v755_v52 = vadd.f32 %v5621_v45, %v679_v0  ;;  %1880 = vmatprep.subr.mxu0 %v8255_v43  ;;  %v5747_v49 = vpop.eup %4561  ;;  %v678_v14 = vmul.f32 %v5619_v21, %v602_v40  ;;  %v509_v27 = vmul.f32 0.00390625, %v437_v7  ;;  %v8380_v54 = vld [vmem:[#allocation25_spill] sm:$0xff] }
 0x180   :  { %v977_v51 = vsub.f32 %v5714_v48, %v8377_v58  ;;  %4573 = vrsqrt.f32 %v540_v55  ;;  %v8044_v42 = vand.u32 4294901760, %v5734_v10  ;;  %1883 = vmatpush1.msra.mxu0 %v8378_v46  ;;  %2303 = vmatprep.subr.mxu1 %v8255_v43  ;;  %v5753_v0 = vpop.eup %4563  ;;  %v551_v58 = vadd.f32 1e-05, %v519_v16 }
 0x181   :  { %v972_v50 = vand.u32 4294901760, %v971_v25  ;;  %v5755_v41 = vand.u32 4294901760, %v755_v52  ;;  %1884 = vmatprep.subr.mxu0 %v8255_v43  ;;  %2305 = vmatpush1.msra.mxu1 %v8380_v54  ;;  %v754_v40 = vadd.f32 %v5625_v4, %v678_v14  ;;  %v541_v55 = vadd.f32 1e-05, %v509_v27 }
 0x182   :  { %v978_v48 = vand.u32 4294901760, %v977_v51  ;;  %v986_v7 = vsub.f32 %v5734_v10, %v8044_v42  ;;  %v681_v46 = vmul.f32 %v5617_v53, %v605_v19  ;;  %1887 = vmatpush1.msra.mxu0 %v8381_v1  ;;  %2306 = vmatprep.subr.mxu1 %v8255_v43  ;;  %4575 = vrsqrt.f32 %v551_v58 }
 0x183   :  { %8379 = vst [vmem:[#allocation116_spill] sm:$0xff] %v5755_v41  ;;  %973 = vmatprep.mubr.f32.mxu0 %v972_v50  ;;  %1672 = vmatprep.mubr.f32.mxu1 %v5755_v41  ;;  %v5768_v16 = vsub.f32 %v752_v35, %v5724_v20  ;;  %v604_v25 = vmul.f32 %v5699_v44, %v5182_v57  ;;  %v440_v51 = vpop.xlane.xlu0 %439  ;;  %v5775_v27 = vpop.eup %4565  ;;  %v5777_v19 = vand.u32 4294901760, %v754_v40  ;;  %4577 = vrsqrt.f32 %v541_v55 }
 0x184   :  { %v5773_v14 = vsub.f32 %v755_v52, %v5755_v41  ;;  %979 = vmatmul.mubr.f32.gmra.mxu0 %v978_v48  ;;  %v987_v50 = vand.u32 4294901760, %v986_v7  ;;  %v757_v42 = vadd.f32 %v5621_v45, %v681_v46  ;;  %1888 = vmatprep.subr.mxu0 %v8255_v43  ;;  %v5781_v35 = vpop.eup %4567  ;;  %v510_v44 = vmul.f32 0.00390625, %v440_v51  ;;  %v8384_v41 = vld [vmem:[#allocation28_spill] sm:$0xff]  ;;  %v8385_v48 = vld [vmem:[#allocation29_spill] sm:$0xff] }
 0x185   :  { %8383 = vst [vmem:[#allocation118_spill] sm:$0xff] %v5777_v19  ;;  %v680_v57 = vmul.f32 %v5619_v21, %v604_v25  ;;  %1891 = vmatpush1.msra.mxu0 %v8384_v41  ;;  %2308 = vmatpush1.msra.mxu1 %v8385_v48  ;;  %v607_v46 = vmul.f32 %v5722_v47, %v5206_v17  ;;  %v8387_v51 = vand.u32 4294901760, %v5768_v16 }
 0x186   :  { %8382 = vst [vmem:[#allocation117_spill] sm:$0xff] %v5773_v14  ;;  %1674 = vmatmul.mubr.f32.gmra.mxu1 %v5777_v19  ;;  %988 = vmatprep.mubr.f32.mxu0 %v987_v50  ;;  %v5789_v55 = vand.u32 4294901760, %v757_v42  ;;  %v473_v7 = vpop.xlane.xlu1 %472  ;;  %v5794_v58 = vsub.f32 %v754_v40, %v5777_v19  ;;  %v606_v25 = vmul.f32 %v5722_v47, %v5203_v3  ;;  %v542_v48 = vadd.f32 1e-05, %v510_v44  ;;  %v8389_v44 = vld [vmem:[#allocation30_spill] sm:$0xff] }
 0x187   :  { %v992_v52 = vsub.f32 %v5768_v16, %v8387_v51  ;;  %v756_v20 = vadd.f32 %v5625_v4, %v680_v57  ;;  %v8388_v50 = vand.u32 4294901760, %v5773_v14  ;;  %v446_v54 = vpop.xlane.xlu0 %445  ;;  %1892 = vmatprep.subr.mxu0 %v8255_v43  ;;  %2309 = vmatprep.subr.mxu1 %v8255_v43  ;;  %v5807_v17 = vpop.eup %4569  ;;  %v683_v3 = vmul.f32 %v5617_v53, %v607_v46 }
 0x188   :  { %8386 = vst [vmem:[#allocation119_spill] sm:$0xff] %v5789_v55  ;;  %1679 = vmatprep.mubr.f32.mxu1 %v5789_v55  ;;  %v521_v47 = vmul.f32 0.00390625, %v473_v7  ;;  %v8053_v40 = vand.u32 4294901760, %v5794_v58  ;;  %v682_v57 = vmul.f32 %v5619_v21, %v606_v25  ;;  %1895 = vmatpush1.msra.mxu0 %v8389_v44  ;;  %v5814_v51 = vpop.eup %4571  ;;  %4579 = vrsqrt.f32 %v542_v48 }
 0x189   :  { %v1001_v41 = vsub.f32 %v5773_v14, %v8388_v50  ;;  %v993_v50 = vand.u32 4294901760, %v992_v52  ;;  %v5816_v19 = vand.u32 4294901760, %v756_v20  ;;  %1896 = vmatprep.subr.mxu0 %v8255_v43  ;;  %2311 = vmatpush1.msra.mxu1 %v4976_v22  ;;  %v759_v46 = vadd.f32 %v5621_v45, %v683_v3  ;;  %v8391_v14 = vld [vmem:[#allocation31_spill] sm:$0xff] }
 0x18a   :  { %v553_v7 = vadd.f32 1e-05, %v521_v47  ;;  %v1007_v25 = vsub.f32 %v5794_v58, %v8053_v40  ;;  %v758_v44 = vadd.f32 %v5625_v4, %v682_v57  ;;  %1899 = vmatpush1.msra.mxu0 %v8391_v14  ;;  %2312 = vmatprep.subr.mxu1 %v8255_v43  ;;  %v5829_v52 = vsub.f32 %v757_v42, %v5789_v55 }
 0x18b   :  { %8390 = vst [vmem:[#allocation120_spill] sm:$0xff] %v5816_v19  ;;  %v1002_v1 = vand.u32 4294901760, %v1001_v41  ;;  %994 = vmatmul.mubr.f32.gmra.mxu0 %v993_v50  ;;  %1681 = vmatmul.mubr.f32.gmra.mxu1 %v5816_v19  ;;  %v512_v41 = vmul.f32 0.00390625, %v446_v54  ;;  %v609_v48 = vmul.f32 %v5753_v0, %v5195_v61  ;;  %v5834_v3 = vsub.f32 %v756_v20, %v5816_v19  ;;  %v452_v47 = vpop.xlane.xlu0 %451  ;;  %v8395_v19 = vld [vmem:[#allocation35_spill] sm:$0xff] }
 0x18c   :  { %v5836_v57 = vand.u32 4294901760, %v759_v46  ;;  %4581 = vrsqrt.f32 %v553_v7  ;;  %v1008_v40 = vand.u32 4294901760, %v1007_v25  ;;  %v5838_v14 = vand.u32 4294901760, %v758_v44  ;;  %1900 = vmatprep.subr.mxu0 %v8255_v43 }
 0x18d   :  { %8392 = vst [vmem:[#allocation121_spill] sm:$0xff] %v5834_v3  ;;  %1003 = vmatprep.mubr.f32.mxu0 %v1002_v1  ;;  %v5841_v54 = vpop.eup %4573  ;;  %v544_v42 = vadd.f32 1e-05, %v512_v41  ;;  %v685_v61 = vmul.f32 %v5617_v53, %v609_v48  ;;  %1903 = vmatpush1.msra.mxu0 %v8395_v19  ;;  %v8396_v1 = vld [vmem:[#allocation33_spill] sm:$0xff]  ;;  %v608_v7 = vmul.f32 %v5753_v0, %v5192_v2  ;;  %v514_v25 = vmul.f32 0.00390625, %v452_v47  ;;  %v479_v50 = vpop.xlane.xlu1 %478 }
 0x18e   :  { %8393 = vst [vmem:[#allocation122_spill] sm:$0xff] %v5836_v57  ;;  %8394 = vst [vmem:[#allocation123_spill] sm:$0xff] %v5838_v14  ;;  %2314 = vmatpush1.msra.mxu1 %v8396_v1  ;;  %1686 = vmatprep.mubr.f32.mxu1 %v5836_v57  ;;  %v5852_v55 = vsub.f32 %v759_v46, %v5836_v57  ;;  %v611_v41 = vmul.f32 %v5781_v35, %v5251_v6  ;;  %v8397_v48 = vand.u32 4294901760, %v5829_v52  ;;  %v8399_v1 = vld [vmem:[#allocation36_spill] sm:$0xff] }
 0x18f   :  { %1904 = vmatprep.subr.mxu0 %v8255_v43  ;;  %1009 = vmatmul.mubr.f32.gmra.mxu0 %v1008_v40  ;;  %4583 = vrsqrt.f32 %v544_v42  ;;  %v761_v2 = vadd.f32 %v5621_v45, %v685_v61  ;;  %v8398_v0 = vand.u32 4294901760, %v5834_v3  ;;  %v458_v47 = vpop.xlane.xlu0 %457  ;;  %v5865_v57 = vpop.eup %4575  ;;  %v684_v6 = vmul.f32 %v5619_v21, %v608_v7 }
 0x190   :  { %1688 = vmatmul.mubr.f32.gmra.mxu1 %v5838_v14  ;;  %v1016_v20 = vsub.f32 %v5829_v52, %v8397_v48  ;;  %v546_v19 = vadd.f32 1e-05, %v514_v25  ;;  %v8063_v40 = vand.u32 4294901760, %v5852_v55  ;;  %v687_v42 = vmul.f32 %v5617_v53, %v611_v41  ;;  %1907 = vmatpush1.msra.mxu0 %v8399_v1  ;;  %v5872_v48 = vpop.eup %4577  ;;  %v8401_v1 = vld [vmem:[#allocation38_spill] sm:$0xff] }
 0x191   :  { %v1022_v46 = vsub.f32 %v5834_v3, %v8398_v0  ;;  %2315 = vmatprep.subr.mxu1 %v8255_v43  ;;  %v5874_v22 = vand.u32 4294901760, %v761_v2  ;;  %v523_v3 = vmul.f32 0.00390625, %v479_v50  ;;  %1908 = vmatprep.subr.mxu0 %v8255_v43  ;;  %v760_v7 = vadd.f32 %v5625_v4, %v684_v6 }
 0x192   :  { %v1017_v61 = vand.u32 4294901760, %v1016_v20  ;;  %2317 = vmatpush1.msra.mxu1 %v4980_v34  ;;  %4585 = vrsqrt.f32 %v546_v19  ;;  %v1031_v25 = vsub.f32 %v5852_v55, %v8063_v40  ;;  %v763_v41 = vadd.f32 %v5621_v45, %v687_v42  ;;  %1911 = vmatpush1.msra.mxu0 %v8401_v1 }
 0x193   :  { %8400 = vst [vmem:[#allocation124_spill] sm:$0xff] %v5874_v22  ;;  %v1023_v0 = vand.u32 4294901760, %v1022_v46  ;;  %2318 = vmatprep.subr.mxu1 %v8255_v43  ;;  %1693 = vmatprep.mubr.f32.mxu1 %v5874_v22  ;;  %v555_v50 = vadd.f32 1e-05, %v523_v3  ;;  %v5887_v20 = vsub.f32 %v758_v44, %v5838_v14  ;;  %v610_v19 = vmul.f32 %v5781_v35, %v5248_v23  ;;  %v464_v6 = vpop.xlane.xlu0 %463  ;;  %v8404_v23 = vld [vmem:[#allocation37_spill] sm:$0xff] }
 0x194   :  { %1018 = vmatprep.mubr.f32.mxu0 %v1017_v61  ;;  %v516_v46 = vmul.f32 0.00390625, %v458_v47  ;;  %v5891_v40 = vand.u32 4294901760, %v760_v7  ;;  %v1032_v42 = vand.u32 4294901760, %v1031_v25  ;;  %v5893_v34 = vand.u32 4294901760, %v763_v41  ;;  %1912 = vmatprep.subr.mxu0 %v8255_v43 }
 0x195   :  { %1024 = vmatmul.mubr.f32.gmra.mxu0 %v1023_v0  ;;  %v5896_v1 = vsub.f32 %v761_v2, %v5874_v22  ;;  %4587 = vrsqrt.f32 %v555_v50  ;;  %v8067_v44 = vand.u32 4294901760, %v5887_v20  ;;  %v686_v3 = vmul.f32 %v5619_v21, %v610_v19  ;;  %2320 = vmatpush1.msra.mxu1 %v8404_v23  ;;  %v5903_v35 = vpop.eup %4579 }
 0x196   :  { %8402 = vst [vmem:[#allocation125_spill] sm:$0xff] %v5891_v40  ;;  %8403 = vst [vmem:[#allocation126_spill] sm:$0xff] %v5893_v34  ;;  %v548_v61 = vadd.f32 1e-05, %v516_v46  ;;  %1915 = vmatpush1.msra.mxu0 %v5019_v31  ;;  %1695 = vmatmul.mubr.f32.gmra.mxu1 %v5891_v40  ;;  %v613_v47 = vmul.f32 %v5814_v51, %v5239_v18  ;;  %v5910_v0 = vsub.f32 %v760_v7, %v5891_v40  ;;  %v485_v40 = vpop.xlane.xlu1 %484 }
 0x197   :  { %1033 = vmatprep.mubr.f32.mxu0 %v1032_v42  ;;  %v8070_v2 = vand.u32 4294901760, %v5896_v1  ;;  %v612_v25 = vmul.f32 %v5814_v51, %v5234_v11  ;;  %1700 = vmatprep.mubr.f32.mxu1 %v5893_v34  ;;  %v1037_v50 = vsub.f32 %v5887_v20, %v8067_v44  ;;  %v762_v19 = vadd.f32 %v5625_v4, %v686_v3  ;;  %v470_v42 = vpop.xlane.xlu0 %469 }
 0x198   :  { %4589 = vrsqrt.f32 %v548_v61  ;;  %v518_v46 = vmul.f32 0.00390625, %v464_v6  ;;  %1916 = vmatprep.subr.mxu0 %v8255_v43  ;;  %v689_v7 = vmul.f32 %v5617_v53, %v613_v47  ;;  %v8074_v11 = vand.u32 4294901760, %v5910_v0  ;;  %2321 = vmatprep.subr.mxu1 %v8255_v43 }
 0x199   :  { %v1046_v18 = vsub.f32 %v5896_v1, %v8070_v2  ;;  %v688_v51 = vmul.f32 %v5619_v21, %v612_v25  ;;  %1919 = vmatpush1.msra.mxu0 %v5031_v60  ;;  %v5928_v3 = vpop.eup %4581  ;;  %v1038_v6 = vand.u32 4294901760, %v1037_v50  ;;  %v5930_v61 = vand.u32 4294901760, %v762_v19  ;;  %v8406_v2 = vld [vmem:[#allocation39_spill] sm:$0xff]  ;;  %v8407_v50 = vld [vmem:[#allocation44_spill] sm:$0xff] }
 0x19a   :  { %v550_v44 = vadd.f32 1e-05, %v518_v46  ;;  %v5933_v22 = vsub.f32 %v763_v41, %v5893_v34  ;;  %2323 = vmatpush1.msra.mxu1 %v8406_v2  ;;  %1920 = vmatprep.subr.mxu0 %v8255_v43  ;;  %v765_v25 = vadd.f32 %v5621_v45, %v689_v7  ;;  %v1052_v14 = vsub.f32 %v5910_v0, %v8074_v11 }
 0x19b   :  { %8405 = vst [vmem:[#allocation127_spill] sm:$0xff] %v5930_v61  ;;  %v1047_v47 = vand.u32 4294901760, %v1046_v18  ;;  %v764_v60 = vadd.f32 %v5625_v4, %v688_v51  ;;  %1923 = vmatpush1.msra.mxu0 %v8407_v50  ;;  %2324 = vmatprep.subr.mxu1 %v8255_v43  ;;  %v615_v46 = vmul.f32 %v5841_v54, %v5312_v32  ;;  %v525_v18 = vmul.f32 0.00390625, %v485_v40  ;;  %v476_v31 = vpop.xlane.xlu0 %475 }
 0x19c   :  { %1039 = vmatmul.mubr.f32.gmra.mxu0 %v1038_v6  ;;  %1702 = vmatmul.mubr.f32.gmra.mxu1 %v5930_v61  ;;  %4591 = vrsqrt.f32 %v550_v44  ;;  %v8080_v41 = vand.u32 4294901760, %v5933_v22  ;;  %v5948_v7 = vpop.eup %4583  ;;  %v5950_v11 = vand.u32 4294901760, %v765_v25  ;;  %v1053_v51 = vand.u32 4294901760, %v1052_v14  ;;  %v8410_v6 = vld [vmem:[#allocation40_spill] sm:$0xff] }
 0x19d   :  { %1048 = vmatprep.mubr.f32.mxu0 %v1047_v47  ;;  %v5952_v34 = vand.u32 4294901760, %v764_v60  ;;  %v5955_v50 = vsub.f32 %v762_v19, %v5930_v61  ;;  %2326 = vmatpush1.msra.mxu1 %v8410_v6  ;;  %v691_v32 = vmul.f32 %v5617_v53, %v615_v46  ;;  %v557_v40 = vadd.f32 1e-05, %v525_v18  ;;  %v8411_v18 = vld [vmem:[#allocation46_spill] sm:$0xff] }
 0x19e   :  { %8408 = vst [vmem:[#allocation128_spill] sm:$0xff] %v5950_v11  ;;  %v1061_v44 = vsub.f32 %v5933_v22, %v8080_v41  ;;  %v614_v47 = vmul.f32 %v5841_v54, %v5299_v9  ;;  %1924 = vmatprep.subr.mxu0 %v8255_v43  ;;  %2327 = vmatprep.subr.mxu1 %v8255_v43  ;;  %v520_v19 = vmul.f32 0.00390625, %v470_v42  ;;  %v8413_v6 = vld [vmem:[#allocation42_spill] sm:$0xff] }
 0x19f   :  { %8409 = vst [vmem:[#allocation129_spill] sm:$0xff] %v5952_v34  ;;  %1707 = vmatprep.mubr.f32.mxu1 %v5950_v11  ;;  %v5969_v61 = vsub.f32 %v765_v25, %v5950_v11  ;;  %v617_v46 = vmul.f32 %v5872_v48, %v5296_v37  ;;  %1927 = vmatpush1.msra.mxu0 %v8411_v18  ;;  %v5974_v41 = vpop.eup %4585  ;;  %4593 = vrsqrt.f32 %v557_v40  ;;  %v8412_v42 = vand.u32 4294901760, %v5955_v50 }
 0x1a0   :  { %1054 = vmatmul.mubr.f32.gmra.mxu0 %v1053_v51  ;;  %1709 = vmatmul.mubr.f32.gmra.mxu1 %v5952_v34  ;;  %v1062_v9 = vand.u32 4294901760, %v1061_v44  ;;  %v767_v54 = vadd.f32 %v5621_v45, %v691_v32  ;;  %v690_v14 = vmul.f32 %v5619_v21, %v614_v47  ;;  %v552_v11 = vadd.f32 1e-05, %v520_v19  ;;  %v8416_v47 = vld [vmem:[#allocation48_spill] sm:$0xff] }
 0x1a1   :  { %v1067_v25 = vsub.f32 %v5955_v50, %v8412_v42  ;;  %v8083_v37 = vand.u32 4294901760, %v5969_v61  ;;  %v693_v18 = vmul.f32 %v5617_v53, %v617_v46  ;;  %2329 = vmatpush1.msra.mxu1 %v8413_v6  ;;  %1928 = vmatprep.subr.mxu0 %v8255_v43  ;;  %v5990_v32 = vsub.f32 %v764_v60, %v5952_v34  ;;  %v491_v6 = vpop.xlane.xlu1 %490 }
 0x1a2   :  { %1063 = vmatprep.mubr.f32.mxu0 %v1062_v9  ;;  %v5986_v51 = vand.u32 4294901760, %v767_v54  ;;  %v766_v44 = vadd.f32 %v5625_v4, %v690_v14  ;;  %v616_v40 = vmul.f32 %v5872_v48, %v5293_v62  ;;  %1931 = vmatpush1.msra.mxu0 %v8416_v47  ;;  %v5995_v19 = vpop.eup %4587  ;;  %4595 = vrsqrt.f32 %v552_v11  ;;  %v482_v14 = vpop.xlane.xlu0 %481 }
 0x1a3   :  { %8415 = vst [vmem:[#allocation131_spill] sm:$0xff] %v5990_v32  ;;  %v1068_v46 = vand.u32 4294901760, %v1067_v25  ;;  %v1076_v9 = vsub.f32 %v5969_v61, %v8083_v37  ;;  %v769_v42 = vadd.f32 %v5621_v45, %v693_v18  ;;  %2330 = vmatprep.subr.mxu1 %v8255_v43  ;;  %1932 = vmatprep.subr.mxu0 %v8255_v43  ;;  %v8088_v62 = vand.u32 4294901760, %v5990_v32  ;;  %v8418_v25 = vld [vmem:[#allocation45_spill] sm:$0xff] }
 0x1a4   :  { %8414 = vst [vmem:[#allocation130_spill] sm:$0xff] %v5986_v51  ;;  %1714 = vmatprep.mubr.f32.mxu1 %v5986_v51  ;;  %v6004_v60 = vand.u32 4294901760, %v766_v44  ;;  %v692_v48 = vmul.f32 %v5619_v21, %v616_v40  ;;  %v522_v11 = vmul.f32 0.00390625, %v476_v31  ;;  %2332 = vmatpush1.msra.mxu1 %v8418_v25  ;;  %v6014_v47 = vsub.f32 %v767_v54, %v5986_v51  ;;  %v8420_v25 = vld [vmem:[#allocation50_spill] sm:$0xff] }
 0x1a5   :  { %v6009_v37 = vpop.eup %4589  ;;  %1069 = vmatmul.mubr.f32.gmra.mxu0 %v1068_v46  ;;  %v1077_v18 = vand.u32 4294901760, %v1076_v9  ;;  %v6011_v34 = vand.u32 4294901760, %v769_v42  ;;  %v619_v2 = vmul.f32 %v5903_v35, %v5360_v38  ;;  %2333 = vmatprep.subr.mxu1 %v8255_v43  ;;  %v1082_v31 = vsub.f32 %v5990_v32, %v8088_v62 }
 0x1a6   :  { %8417 = vst [vmem:[#allocation132_spill] sm:$0xff] %v6004_v60  ;;  %1716 = vmatmul.mubr.f32.gmra.mxu1 %v6004_v60  ;;  %v768_v40 = vadd.f32 %v5625_v4, %v692_v48  ;;  %v554_v46 = vadd.f32 1e-05, %v522_v11  ;;  %v527_v9 = vmul.f32 0.00390625, %v491_v6  ;;  %1935 = vmatpush2.msra.mxu0 %v8420_v25  ;;  %v8091_v54 = vand.u32 4294901760, %v6014_v47  ;;  %v8423_v48 = vld [vmem:[#allocation47_spill] sm:$0xff] }
 0x1a7   :  { %8419 = vst [vmem:[#allocation133_spill] sm:$0xff] %v6011_v34  ;;  %1078 = vmatprep.mubr.f32.mxu0 %v1077_v18  ;;  %1721 = vmatprep.mubr.f32.mxu1 %v6011_v34  ;;  %v695_v38 = vmul.f32 %v5617_v53, %v619_v2  ;;  %v6029_v51 = vsub.f32 %v766_v44, %v6004_v60  ;;  %v1083_v62 = vand.u32 4294901760, %v1082_v31  ;;  %v524_v31 = vmul.f32 0.00390625, %v482_v14  ;;  %v8429_v25 = vld [vmem:[#allocation49_spill] sm:$0xff] }
 0x1a8   :  { %v618_v23 = vmul.f32 %v5903_v35, %v5344_v12  ;;  %v6033_v32 = vand.u32 4294901760, %v768_v40  ;;  %4597 = vrsqrt.f32 %v554_v46  ;;  %v559_v6 = vadd.f32 1e-05, %v527_v9  ;;  %2335 = vmatpush2.msra.mxu1 %v8423_v48  ;;  %1936 = vmatprep.subr.mxu0 %v8255_v43  ;;  %v8424_v35 = vld [vmem:[#allocation51_spill] sm:$0xff]  ;;  %v8425_v46 = vld [vmem:[#allocation61_spill] sm:$0xff] }
 0x1a9   :  { %8421 = vst [vmem:[#allocation134_spill] sm:$0xff] %v6029_v51  ;;  %v6037_v11 = vpop.eup %4591  ;;  %v1091_v2 = vsub.f32 %v6014_v47, %v8091_v54  ;;  %v771_v44 = vadd.f32 %v5621_v45, %v695_v38  ;;  %1939 = vmatpush2.msra.mxu0 %v8424_v35  ;;  %2336 = vmatprep.subr.mxu1 %v8255_v43  ;;  %v488_v38 = vpop.xlane.xlu0 %487  ;;  %v556_v14 = vadd.f32 1e-05, %v524_v31  ;;  %v8432_v31 = vld [vmem:[#allocation60_spill] sm:$0xff] }
 0x1aa   :  { %8422 = vst [vmem:[#allocation135_spill] sm:$0xff] %v6033_v32  ;;  %v694_v12 = vmul.f32 %v5619_v21, %v618_v23  ;;  %1084 = vmatmul.mubr.f32.gmra.mxu0 %v1083_v62  ;;  %1723 = vmatmul.mubr.f32.gmra.mxu1 %v6033_v32  ;;  %4599 = vrsqrt.f32 %v559_v6  ;;  %v621_v9 = vmul.f32 %v5716_v28, %v8425_v46  ;;  %v8428_v23 = vand.u32 4294901760, %v6029_v51 }
 0x1ab   :  { %v6051_v54 = vsub.f32 %v769_v42, %v6011_v34  ;;  %v1092_v60 = vand.u32 4294901760, %v1091_v2  ;;  %v6053_v18 = vand.u32 4294901760, %v771_v44  ;;  %2338 = vmatpush2.msra.mxu1 %v8429_v25  ;;  %1940 = vmatprep.subr.mxu0 %v8255_v43  ;;  %v6064_v46 = vsub.f32 %v768_v40, %v6033_v32  ;;  %v8430_v2 = vld [vmem:[#allocation53_spill] sm:$0xff]  ;;  %v497_v42 = vpop.xlane.xlu1 %496 }
 0x1ac   :  { %v1097_v35 = vsub.f32 %v6029_v51, %v8428_v23  ;;  %v770_v62 = vadd.f32 %v5625_v4, %v694_v12  ;;  %v697_v6 = vmul.f32 %v5617_v53, %v621_v9  ;;  %1943 = vmatpush2.msra.mxu0 %v8430_v2  ;;  %2339 = vmatprep.subr.mxu1 %v8255_v43  ;;  %v6068_v34 = vpop.eup %4593  ;;  %v526_v25 = vmul.f32 0.00390625, %v488_v38  ;;  %v8436_v51 = vld [vmem:[#allocation55_spill] sm:$0xff] }
 0x1ad   :  { %8426 = vst [vmem:[#allocation61_spill] sm:$0xff] %v6051_v54  ;;  %8427 = vst [vmem:[#allocation136_spill] sm:$0xff] %v6053_v18  ;;  %1093 = vmatprep.mubr.f32.mxu0 %v1092_v60  ;;  %1728 = vmatprep.mubr.f32.mxu1 %v6053_v18  ;;  %v620_v9 = vmul.f32 %v5716_v28, %v8432_v31  ;;  %4601 = vrsqrt.f32 %v556_v14  ;;  %v8433_v32 = vand.u32 4294901760, %v6051_v54  ;;  %v8102_v48 = vand.u32 4294901760, %v6064_v46  ;;  %v8434_v60 = vld [vmem:[#allocation52_spill] sm:$0xff] }
 0x1ae   :  { %v1098_v12 = vand.u32 4294901760, %v1097_v35  ;;  %v6071_v23 = vand.u32 4294901760, %v770_v62  ;;  %v773_v40 = vadd.f32 %v5621_v45, %v697_v6  ;;  %2341 = vmatpush2.msra.mxu1 %v8434_v60  ;;  %1944 = vmatprep.subr.mxu0 %v8255_v43  ;;  %v558_v35 = vadd.f32 1e-05, %v526_v25 }
 0x1af   :  { %v1106_v2 = vsub.f32 %v6051_v54, %v8433_v32  ;;  %v696_v28 = vmul.f32 %v5619_v21, %v620_v9  ;;  %v623_v38 = vmul.f32 %v5948_v7, %v5400_v29  ;;  %v6087_v14 = vsub.f32 %v771_v44, %v6053_v18  ;;  %v6089_v6 = vpop.eup %4595  ;;  %v494_v54 = vpop.xlane.xlu0 %493  ;;  %1947 = vmatpush2.msra.mxu0 %v8436_v51  ;;  %v8437_v9 = vld [vmem:[#allocation54_spill] sm:$0xff] }
 0x1b0   :  { %8431 = vst [vmem:[#allocation137_spill] sm:$0xff] %v6071_v23  ;;  %1099 = vmatmul.mubr.f32.gmra.mxu0 %v1098_v12  ;;  %1730 = vmatmul.mubr.f32.gmra.mxu1 %v6071_v23  ;;  %v6091_v32 = vand.u32 4294901760, %v773_v40  ;;  %v1112_v12 = vsub.f32 %v6064_v46, %v8102_v48  ;;  %v529_v60 = vmul.f32 0.00390625, %v497_v42  ;;  %4603 = vrsqrt.f32 %v558_v35 }
 0x1b1   :  { %v1107_v31 = vand.u32 4294901760, %v1106_v2  ;;  %2342 = vmatprep.subr.mxu1 %v8255_v43  ;;  %v772_v29 = vadd.f32 %v5625_v4, %v696_v28  ;;  %v699_v25 = vmul.f32 %v5617_v53, %v623_v38  ;;  %v8105_v44 = vand.u32 4294901760, %v6087_v14  ;;  %1948 = vmatprep.subr.mxu0 %v8255_v43 }
 0x1b2   :  { %8435 = vst [vmem:[#allocation60_spill] sm:$0xff] %v6091_v32  ;;  %2344 = vmatpush2.msra.mxu1 %v8437_v9  ;;  %1735 = vmatprep.mubr.f32.mxu1 %v6091_v32  ;;  %v1113_v42 = vand.u32 4294901760, %v1112_v12  ;;  %v561_v2 = vadd.f32 1e-05, %v529_v60  ;;  %v6105_v48 = vsub.f32 %v770_v62, %v6071_v23  ;;  %v622_v28 = vmul.f32 %v5948_v7, %v5380_v30  ;;  %v8439_v9 = vld [vmem:[#allocation57_spill] sm:$0xff]  ;;  %v8440_v7 = vld [vmem:[#allocation56_spill] sm:$0xff] }
 0x1b3   :  { %1108 = vmatprep.mubr.f32.mxu0 %v1107_v31  ;;  %v6109_v35 = vand.u32 4294901760, %v772_v29  ;;  %v775_v38 = vadd.f32 %v5621_v45, %v699_v25  ;;  %v1121_v18 = vsub.f32 %v6087_v14, %v8105_v44  ;;  %v528_v51 = vmul.f32 0.00390625, %v494_v54  ;;  %1951 = vmatpush2.msra.mxu0 %v8439_v9  ;;  %v8442_v44 = vld [vmem:[#allocation64_spill] sm:$0xff]  ;;  %v8443_v23 = vld [vmem:[#allocation59_spill] sm:$0xff] }
 0x1b4   :  { %2345 = vmatprep.subr.mxu1 %v8255_v43  ;;  %1114 = vmatmul.mubr.f32.gmra.mxu0 %v1113_v42  ;;  %4605 = vrsqrt.f32 %v561_v2  ;;  %v8110_v62 = vand.u32 4294901760, %v6105_v48  ;;  %v698_v60 = vmul.f32 %v5619_v21, %v622_v28  ;;  %v6120_v30 = vsub.f32 %v773_v40, %v6091_v32 }
 0x1b5   :  { %8438 = vst [vmem:[#allocation138_spill] sm:$0xff] %v6109_v35  ;;  %2347 = vmatpush2.msra.mxu1 %v8440_v7  ;;  %v6123_v31 = vpop.eup %4597  ;;  %v6126_v54 = vand.u32 4294901760, %v775_v38  ;;  %v1122_v12 = vand.u32 4294901760, %v1121_v18  ;;  %v560_v25 = vadd.f32 1e-05, %v528_v51  ;;  %v625_v42 = vmul.f32 %v5747_v49, %v8442_v44  ;;  %1952 = vmatprep.subr.mxu0 %v8255_v43  ;;  %v8444_v44 = vld [vmem:[#allocation63_spill] sm:$0xff] }
 0x1b6   :  { %1737 = vmatmul.mubr.f32.gmra.mxu1 %v6109_v35  ;;  %v1127_v40 = vsub.f32 %v6105_v48, %v8110_v62  ;;  %v774_v2 = vadd.f32 %v5625_v4, %v698_v60  ;;  %v6137_v32 = vsub.f32 %v772_v29, %v6109_v35  ;;  %1955 = vmatpush2.msra.mxu0 %v8443_v23  ;;  %v8447_v35 = vand.u32 4294901760, %v6120_v30  ;;  %v8448_v7 = vld [vmem:[#allocation58_spill] sm:$0xff] }
 0x1b7   :  { %8441 = vst [vmem:[#allocation139_spill] sm:$0xff] %v6126_v54  ;;  %2348 = vmatprep.subr.mxu1 %v8255_v43  ;;  %v6141_v51 = vpop.eup %4599  ;;  %1742 = vmatprep.mubr.f32.mxu1 %v6126_v54  ;;  %4607 = vrsqrt.f32 %v560_v25  ;;  %v701_v18 = vmul.f32 %v5617_v53, %v625_v42  ;;  %v624_v60 = vmul.f32 %v5747_v49, %v8444_v44  ;;  %v8449_v42 = vld [vmem:[#allocation65_spill] sm:$0xff] }
 0x1b8   :  { %1123 = vmatprep.mubr.f32.mxu0 %v1122_v12  ;;  %v6148_v62 = vsub.f32 %v775_v38, %v6126_v54  ;;  %v1128_v29 = vand.u32 4294901760, %v1127_v40  ;;  %v6150_v28 = vand.u32 4294901760, %v774_v2  ;;  %v1136_v23 = vsub.f32 %v6120_v30, %v8447_v35  ;;  %2350 = vmatpush2.msra.mxu1 %v8448_v7 }
 0x1b9   :  { %v8115_v9 = vand.u32 4294901760, %v6137_v32  ;;  %1956 = vmatprep.subr.mxu0 %v8255_v43  ;;  %v777_v12 = vadd.f32 %v5621_v45, %v701_v18  ;;  %v700_v49 = vmul.f32 %v5619_v21, %v624_v60  ;;  %v627_v25 = vmul.f32 %v5974_v41, %v5471_v15  ;;  %2351 = vmatprep.subr.mxu1 %v8255_v43 }
 0x1ba   :  { %8445 = vst [vmem:[#allocation64_spill] sm:$0xff] %v6148_v62  ;;  %8446 = vst [vmem:[#allocation63_spill] sm:$0xff] %v6150_v28  ;;  %1959 = vmatpush2.msra.mxu0 %v8449_v42  ;;  %1744 = vmatmul.mubr.f32.gmra.mxu1 %v6150_v28  ;;  %v1137_v35 = vand.u32 4294901760, %v1136_v23  ;;  %v6170_v18 = vsub.f32 %v774_v2, %v6150_v28  ;;  %v626_v44 = vmul.f32 %v5974_v41, %v5453_v56  ;;  %v6174_v60 = vpop.eup %4601  ;;  %v8453_v42 = vld [vmem:[#allocation62_spill] sm:$0xff] }
 0x1bb   :  { %1129 = vmatmul.mubr.f32.gmra.mxu0 %v1128_v29  ;;  %v1142_v40 = vsub.f32 %v6137_v32, %v8115_v9  ;;  %v6176_v15 = vand.u32 4294901760, %v777_v12  ;;  %v776_v38 = vadd.f32 %v5625_v4, %v700_v49  ;;  %v8452_v29 = vand.u32 4294901760, %v6148_v62  ;;  %2353 = vmatpush2.msra.mxu1 %v8453_v42  ;;  %v8454_v9 = vld [vmem:[#allocation68_spill] sm:$0xff]  ;;  %v8455_v49 = vld [vmem:[#allocation69_spill] sm:$0xff] }
 0x1bc   :  { %8450 = vst [vmem:[#allocation140_spill] sm:$0xff] %v6170_v18  ;;  %v703_v54 = vmul.f32 %v5617_v53, %v627_v25  ;;  %1960 = vmatprep.subr.mxu0 %v8255_v43  ;;  %1138 = vmatprep.mubr.f32.mxu0 %v1137_v35  ;;  %v8118_v56 = vand.u32 4294901760, %v6170_v18  ;;  %v702_v41 = vmul.f32 %v5619_v21, %v626_v44 }
 0x1bd   :  { %8451 = vst [vmem:[#allocation141_spill] sm:$0xff] %v6176_v15  ;;  %v1151_v23 = vsub.f32 %v6148_v62, %v8452_v29  ;;  %v1143_v2 = vand.u32 4294901760, %v1142_v40  ;;  %v629_v28 = vmul.f32 %v5775_v27, %v8454_v9  ;;  %1963 = vmatpush2.msra.mxu0 %v8455_v49  ;;  %1749 = vmatprep.mubr.f32.mxu1 %v6176_v15  ;;  %v6191_v29 = vand.u32 4294901760, %v776_v38  ;;  %v6198_v35 = vpop.eup %4603  ;;  %v8458_v49 = vld [vmem:[#allocation67_spill] sm:$0xff]  ;;  %v8470_v62 = vld [vmem:[#allocation76_spill] sm:$0xff] }
 0x1be   :  { %v779_v42 = vadd.f32 %v5621_v45, %v703_v54  ;;  %v6195_v7 = vsub.f32 %v777_v12, %v6176_v15  ;;  %2354 = vmatprep.subr.mxu1 %v8255_v43  ;;  %v1157_v9 = vsub.f32 %v6170_v18, %v8118_v56  ;;  %v778_v40 = vadd.f32 %v5625_v4, %v702_v41 }
 0x1bf   :  { %8456 = vst [vmem:[#allocation68_spill] sm:$0xff] %v6191_v29  ;;  %v1152_v25 = vand.u32 4294901760, %v1151_v23  ;;  %1144 = vmatmul.mubr.f32.gmra.mxu0 %v1143_v2  ;;  %v705_v44 = vmul.f32 %v5617_v53, %v629_v28  ;;  %v628_v23 = vmul.f32 %v5775_v27, %v8458_v49  ;;  %1751 = vmatmul.mubr.f32.gmra.mxu1 %v6191_v29  ;;  %v8462_v49 = vld [vmem:[#allocation66_spill] sm:$0xff] }
 0x1c0   :  { %8457 = vst [vmem:[#allocation142_spill] sm:$0xff] %v6195_v7  ;;  %v6208_v54 = vand.u32 4294901760, %v779_v42  ;;  %v8125_v12 = vand.u32 4294901760, %v6195_v7  ;;  %v6212_v2 = vsub.f32 %v776_v38, %v6191_v29  ;;  %v631_v56 = vmul.f32 %v6009_v37, %v5496_v5  ;;  %2356 = vmatpush2.msra.mxu1 %v8462_v49  ;;  %1964 = vmatprep.subr.mxu0 %v8255_v43 }
 0x1c1   :  { %1153 = vmatprep.mubr.f32.mxu0 %v1152_v25  ;;  %v1158_v15 = vand.u32 4294901760, %v1157_v9  ;;  %v6216_v41 = vand.u32 4294901760, %v778_v40  ;;  %v781_v28 = vadd.f32 %v5621_v45, %v705_v44  ;;  %v704_v27 = vmul.f32 %v5619_v21, %v628_v23  ;;  %v6222_v25 = vpop.eup %4605  ;;  %v8463_v23 = vld [vmem:[#allocation73_spill] sm:$0xff]  ;;  %2357 = vmatprep.subr.mxu1 %v8255_v43 }
 0x1c2   :  { %8459 = vst [vmem:[#allocation67_spill] sm:$0xff] %v6208_v54  ;;  %8460 = vst [vmem:[#allocation143_spill] sm:$0xff] %v6212_v2  ;;  %1756 = vmatprep.mubr.f32.mxu1 %v6208_v54  ;;  %v1166_v38 = vsub.f32 %v6195_v7, %v8125_v12  ;;  %v8128_v5 = vand.u32 4294901760, %v6212_v2  ;;  %v6230_v9 = vsub.f32 %v779_v42, %v6208_v54  ;;  %1967 = vmatpush2.msra.mxu0 %v8463_v23 }
 0x1c3   :  { %8461 = vst [vmem:[#allocation144_spill] sm:$0xff] %v6216_v41  ;;  %v707_v44 = vmul.f32 %v5617_v53, %v631_v56  ;;  %1159 = vmatmul.mubr.f32.gmra.mxu0 %v1158_v15  ;;  %v6234_v29 = vand.u32 4294901760, %v781_v28  ;;  %v780_v49 = vadd.f32 %v5625_v4, %v704_v27  ;;  %v6238_v18 = vsub.f32 %v778_v40, %v6216_v41 }
 0x1c4   :  { %v630_v12 = vmul.f32 %v6009_v37, %v5487_v63  ;;  %1758 = vmatmul.mubr.f32.gmra.mxu1 %v6216_v41  ;;  %v1167_v42 = vand.u32 4294901760, %v1166_v38  ;;  %v1172_v56 = vsub.f32 %v6212_v2, %v8128_v5  ;;  %1968 = vmatprep.subr.mxu0 %v8255_v43  ;;  %v6250_v40 = vpop.eup %4607  ;;  %v8466_v5 = vld [vmem:[#allocation72_spill] sm:$0xff]  ;;  %v8469_v2 = vld [vmem:[#allocation71_spill] sm:$0xff] }
 0x1c5   :  { %8464 = vst [vmem:[#allocation145_spill] sm:$0xff] %v6234_v29  ;;  %v783_v54 = vadd.f32 %v5621_v45, %v707_v44  ;;  %1763 = vmatprep.mubr.f32.mxu1 %v6234_v29  ;;  %v6253_v63 = vand.u32 4294901760, %v780_v49  ;;  %v8139_v37 = vand.u32 4294901760, %v6238_v18  ;;  %v6258_v38 = vsub.f32 %v781_v28, %v6234_v29  ;;  %2359 = vmatpush2.msra.mxu1 %v8466_v5  ;;  %v8471_v29 = vld [vmem:[#allocation70_spill] sm:$0xff] }
 0x1c6   :  { %v706_v27 = vmul.f32 %v5619_v21, %v630_v12  ;;  %1168 = vmatprep.mubr.f32.mxu0 %v1167_v42  ;;  %v1173_v15 = vand.u32 4294901760, %v1172_v56  ;;  %v8467_v44 = vand.u32 4294901760, %v6230_v9  ;;  %v633_v7 = vmul.f32 %v5807_v17, %v8469_v2  ;;  %1971 = vmatpush2.msra.mxu0 %v8470_v62 }
 0x1c7   :  { %8465 = vst [vmem:[#allocation146_spill] sm:$0xff] %v6253_v63  ;;  %v6264_v23 = vand.u32 4294901760, %v783_v54  ;;  %v1187_v12 = vsub.f32 %v6238_v18, %v8139_v37  ;;  %v6275_v56 = vsub.f32 %v780_v49, %v6253_v63  ;;  %2360 = vmatprep.subr.mxu1 %v8255_v43  ;;  %1972 = vmatprep.subr.mxu0 %v8255_v43  ;;  %v8473_v62 = vand.u32 4294901760, %v6258_v38 }
 0x1c8   :  { %v1181_v41 = vsub.f32 %v6230_v9, %v8467_v44  ;;  %v782_v28 = vadd.f32 %v5625_v4, %v706_v27  ;;  %1174 = vmatmul.mubr.f32.gmra.mxu0 %v1173_v15  ;;  %1765 = vmatmul.mubr.f32.gmra.mxu1 %v6253_v63  ;;  %v709_v44 = vmul.f32 %v5617_v53, %v633_v7 }
 0x1c9   :  { %8468 = vst [vmem:[#allocation147_spill] sm:$0xff] %v6264_v23  ;;  %v632_v37 = vmul.f32 %v5807_v17, %v8471_v29  ;;  %v6284_v27 = vsub.f32 %v783_v54, %v6264_v23  ;;  %1770 = vmatprep.mubr.f32.mxu1 %v6264_v23  ;;  %v1188_v49 = vand.u32 4294901760, %v1187_v12  ;;  %v1196_v15 = vsub.f32 %v6258_v38, %v8473_v62  ;;  %v8475_v12 = vld [vmem:[#allocation78_spill] sm:$0xff] }
 0x1ca   :  { %v1182_v2 = vand.u32 4294901760, %v1181_v41  ;;  %v6287_v42 = vand.u32 4294901760, %v782_v28  ;;  %v8144_v63 = vand.u32 4294901760, %v6275_v56  ;;  %v8474_v41 = vld [vmem:[#allocation74_spill] sm:$0xff]  ;;  %v785_v7 = vadd.f32 %v5621_v45, %v709_v44  ;;  %1975 = vmatpush2.msra.mxu0 %v8475_v12 }
 0x1cb   :  { %2362 = vmatpush2.msra.mxu1 %v8474_v41  ;;  %v708_v17 = vmul.f32 %v5619_v21, %v632_v37  ;;  %v8147_v29 = vand.u32 4294901760, %v6284_v27  ;;  %v635_v54 = vmul.f32 %v6037_v11, %v5523_v26  ;;  %v1197_v23 = vand.u32 4294901760, %v1196_v15  ;;  %1976 = vmatprep.subr.mxu0 %v8255_v43 }
 0x1cc   :  { %8472 = vst [vmem:[#allocation71_spill] sm:$0xff] %v6287_v42  ;;  %1183 = vmatprep.mubr.f32.mxu0 %v1182_v2  ;;  %v1202_v62 = vsub.f32 %v6275_v56, %v8144_v63  ;;  %v6304_v5 = vsub.f32 %v782_v28, %v6287_v42  ;;  %v634_v2 = vmul.f32 %v6037_v11, %v5521_v59  ;;  %v6311_v26 = vand.u32 4294901760, %v785_v7  ;;  %v8477_v63 = vld [vmem:[#allocation13_spill] sm:$0xff] }
 0x1cd   :  { %2363 = vmatprep.subr.mxu1 %v8255_v43  ;;  %1189 = vmatmul.mubr.f32.gmra.mxu0 %v1188_v49  ;;  %v784_v37 = vadd.f32 %v5625_v4, %v708_v17  ;;  %v1211_v44 = vsub.f32 %v6284_v27, %v8147_v29  ;;  %v711_v28 = vmul.f32 %v5617_v53, %v635_v54 }
 0x1ce   :  { %1772 = vmatmul.mubr.f32.gmra.mxu1 %v6287_v42  ;;  %8476 = vst [vmem:[#allocation70_spill] sm:$0xff] %v6311_v26  ;;  %1198 = vmatprep.mubr.f32.mxu0 %v1197_v23  ;;  %v1203_v15 = vand.u32 4294901760, %v1202_v62  ;;  %v8148_v59 = vand.u32 4294901760, %v6304_v5  ;;  %v710_v11 = vmul.f32 %v5619_v21, %v634_v2  ;;  %v637_v49 = vmul.f32 %v5865_v57, %v8477_v63  ;;  %v8478_v42 = vld [vmem:[#allocation75_spill] sm:$0xff]  ;;  %v8480_v2 = vld [vmem:[#allocation81_spill] sm:$0xff] }
 0x1cf   :  { %2365 = vmatpush2.msra.mxu1 %v8478_v42  ;;  %1777 = vmatprep.mubr.f32.mxu1 %v6311_v26  ;;  %v6324_v17 = vand.u32 4294901760, %v784_v37  ;;  %v1212_v12 = vand.u32 4294901760, %v1211_v44  ;;  %v787_v29 = vadd.f32 %v5621_v45, %v711_v28  ;;  %v6328_v54 = vsub.f32 %v785_v7, %v6311_v26 }
 0x1d0   :  { %1979 = vmatpush2.msra.mxu0 %v5411_v33  ;;  %v1217_v23 = vsub.f32 %v6304_v5, %v8148_v59  ;;  %v786_v63 = vadd.f32 %v5625_v4, %v710_v11  ;;  %v713_v62 = vmul.f32 %v5617_v53, %v637_v49  ;;  %v636_v42 = vmul.f32 %v5865_v57, %v8480_v2  ;;  %v8482_v59 = vld [vmem:[#allocation91_spill] sm:$0xff]  ;;  %v8484_v2 = vld [vmem:[#allocation77_spill] sm:$0xff]  ;;  %v8487_v33 = vld [vmem:[#allocation90_spill] sm:$0xff] }
 0x1d1   :  { %8479 = vst [vmem:[#allocation13_spill] sm:$0xff] %v6324_v17  ;;  %2366 = vmatprep.subr.mxu1 %v8255_v43  ;;  %1204 = vmatmul.mubr.f32.gmra.mxu0 %v1203_v15  ;;  %v6340_v7 = vand.u32 4294901760, %v787_v29  ;;  %v8154_v44 = vand.u32 4294901760, %v6328_v54  ;;  %v6344_v28 = vsub.f32 %v784_v37, %v6324_v17  ;;  %v639_v11 = vmul.f32 %v6089_v6, %v8482_v59 }
 0x1d2   :  { %1779 = vmatmul.mubr.f32.gmra.mxu1 %v6324_v17  ;;  %1213 = vmatprep.mubr.f32.mxu0 %v1212_v12  ;;  %v1218_v49 = vand.u32 4294901760, %v1217_v23  ;;  %v6348_v26 = vand.u32 4294901760, %v786_v63  ;;  %v789_v57 = vadd.f32 %v5621_v45, %v713_v62  ;;  %v712_v15 = vmul.f32 %v5619_v21, %v636_v42 }
 0x1d3   :  { %8481 = vst [vmem:[#allocation81_spill] sm:$0xff] %v6340_v7  ;;  %2368 = vmatpush2.msra.mxu1 %v8484_v2  ;;  %1784 = vmatprep.mubr.f32.mxu1 %v6340_v7  ;;  %v1226_v37 = vsub.f32 %v6328_v54, %v8154_v44  ;;  %v8159_v17 = vand.u32 4294901760, %v6344_v28  ;;  %v6359_v59 = vsub.f32 %v787_v29, %v6340_v7  ;;  %v8488_v44 = vld [vmem:[#allocation82_spill] sm:$0xff] }
 0x1d4   :  { %8483 = vst [vmem:[#allocation91_spill] sm:$0xff] %v6348_v26  ;;  %v715_v12 = vmul.f32 %v5617_v53, %v639_v11  ;;  %1980 = vmatprep.subr.mxu0 %v8255_v43  ;;  %v6363_v23 = vand.u32 4294901760, %v789_v57  ;;  %v788_v42 = vadd.f32 %v5625_v4, %v712_v15  ;;  %v6367_v62 = vsub.f32 %v786_v63, %v6348_v26 }
 0x1d5   :  { %v638_v2 = vmul.f32 %v6089_v6, %v8487_v33  ;;  %1983 = vmatpush2.msra.mxu0 %v8488_v44  ;;  %2369 = vmatprep.subr.mxu1 %v8255_v43  ;;  %v1227_v29 = vand.u32 4294901760, %v1226_v37  ;;  %v1232_v11 = vsub.f32 %v6344_v28, %v8159_v17  ;;  %v8160_v15 = vand.u32 4294901760, %v6359_v59  ;;  %v8490_v37 = vld [vmem:[#allocation80_spill] sm:$0xff]  ;;  %v8492_v44 = vld [vmem:[#allocation15_spill] sm:$0xff] }
 0x1d6   :  { %8485 = vst [vmem:[#allocation148_spill] sm:$0xff] %v6363_v23  ;;  %8486 = vst [vmem:[#allocation149_spill] sm:$0xff] %v6367_v62  ;;  %1219 = vmatmul.mubr.f32.gmra.mxu0 %v1218_v49  ;;  %1786 = vmatmul.mubr.f32.gmra.mxu1 %v6348_v26  ;;  %v791_v63 = vadd.f32 %v5621_v45, %v715_v12  ;;  %v6380_v7 = vand.u32 4294901760, %v788_v42  ;;  %v8163_v33 = vand.u32 4294901760, %v6367_v62 }
 0x1d7   :  { %1791 = vmatprep.mubr.f32.mxu1 %v6363_v23  ;;  %v714_v6 = vmul.f32 %v5619_v21, %v638_v2  ;;  %v6385_v49 = vsub.f32 %v789_v57, %v6363_v23  ;;  %2371 = vmatpush2.msra.mxu1 %v8490_v37  ;;  %v1233_v26 = vand.u32 4294901760, %v1232_v11  ;;  %v1241_v17 = vsub.f32 %v6359_v59, %v8160_v15  ;;  %v8494_v15 = vld [vmem:[#allocation83_spill] sm:$0xff]  ;;  %v8495_v37 = vld [vmem:[#allocation14_spill] sm:$0xff] }
 0x1d8   :  { %8489 = vst [vmem:[#allocation90_spill] sm:$0xff] %v6380_v7  ;;  %1228 = vmatprep.mubr.f32.mxu0 %v1227_v29  ;;  %v6391_v12 = vand.u32 4294901760, %v791_v63  ;;  %v641_v41 = vmul.f32 %v5928_v3, %v8492_v44  ;;  %2372 = vmatprep.subr.mxu1 %v8255_v43  ;;  %v1247_v57 = vsub.f32 %v6367_v62, %v8163_v33 }
 0x1d9   :  { %v790_v2 = vadd.f32 %v5625_v4, %v714_v6  ;;  %v6402_v11 = vsub.f32 %v788_v42, %v6380_v7  ;;  %1984 = vmatprep.subr.mxu0 %v8255_v43  ;;  %2374 = vmatpush2.msra.mxu1 %v8494_v15  ;;  %v1242_v44 = vand.u32 4294901760, %v1241_v17  ;;  %v640_v33 = vmul.f32 %v5928_v3, %v8495_v37  ;;  %v8499_v17 = vld [vmem:[#allocation12_spill] sm:$0xff] }
 0x1da   :  { %8491 = vst [vmem:[#allocation150_spill] sm:$0xff] %v6391_v12  ;;  %1234 = vmatmul.mubr.f32.gmra.mxu0 %v1233_v26  ;;  %1793 = vmatmul.mubr.f32.gmra.mxu1 %v6380_v7  ;;  %v717_v23 = vmul.f32 %v5617_v53, %v641_v41  ;;  %v6411_v6 = vsub.f32 %v791_v63, %v6391_v12  ;;  %v1248_v42 = vand.u32 4294901760, %v1247_v57  ;;  %v8498_v62 = vand.u32 4294901760, %v6385_v49  ;;  %v8506_v15 = vld [vmem:[#allocation88_spill] sm:$0xff] }
 0x1db   :  { %8493 = vst [vmem:[#allocation15_spill] sm:$0xff] %v6402_v11  ;;  %1798 = vmatprep.mubr.f32.mxu1 %v6391_v12  ;;  %v6414_v29 = vand.u32 4294901760, %v790_v2  ;;  %v8170_v7 = vand.u32 4294901760, %v6402_v11  ;;  %1987 = vmatpush2.msra.mxu0 %v8499_v17  ;;  %v716_v3 = vmul.f32 %v5619_v21, %v640_v33  ;;  %v643_v37 = vmul.f32 %v6123_v31, %v5549_v36  ;;  %v8501_v17 = vld [vmem:[#allocation84_spill] sm:$0xff] }
 0x1dc   :  { %8496 = vst [vmem:[#allocation14_spill] sm:$0xff] %v6411_v6  ;;  %v1256_v26 = vsub.f32 %v6385_v49, %v8498_v62  ;;  %1243 = vmatprep.mubr.f32.mxu0 %v1242_v44  ;;  %v793_v41 = vadd.f32 %v5621_v45, %v717_v23  ;;  %v8173_v63 = vand.u32 4294901760, %v6411_v6  ;;  %2375 = vmatprep.subr.mxu1 %v8255_v43  ;;  %v8500_v44 = vld [vmem:[#allocation92_spill] sm:$0xff] }
 0x1dd   :  { %8497 = vst [vmem:[#allocation151_spill] sm:$0xff] %v6414_v29  ;;  %v1262_v62 = vsub.f32 %v6402_v11, %v8170_v7  ;;  %v6431_v12 = vsub.f32 %v790_v2, %v6414_v29  ;;  %v642_v23 = vmul.f32 %v6123_v31, %v8500_v44  ;;  %2377 = vmatpush2.msra.mxu1 %v8501_v17  ;;  %v8503_v17 = vld [vmem:[#allocation89_spill] sm:$0xff]  ;;  %v8507_v11 = vld [vmem:[#allocation86_spill] sm:$0xff] }
 0x1de   :  { %v1257_v57 = vand.u32 4294901760, %v1256_v26  ;;  %1988 = vmatprep.subr.mxu0 %v8255_v43  ;;  %1249 = vmatmul.mubr.f32.gmra.mxu0 %v1248_v42  ;;  %v6438_v36 = vand.u32 4294901760, %v793_v41  ;;  %v792_v33 = vadd.f32 %v5625_v4, %v716_v3  ;;  %v1271_v26 = vsub.f32 %v6411_v6, %v8173_v63 }
 0x1df   :  { %1800 = vmatmul.mubr.f32.gmra.mxu1 %v6414_v29  ;;  %v719_v2 = vmul.f32 %v5617_v53, %v643_v37  ;;  %v1263_v7 = vand.u32 4294901760, %v1262_v62  ;;  %v8178_v31 = vand.u32 4294901760, %v6431_v12  ;;  %v718_v44 = vmul.f32 %v5619_v21, %v642_v23  ;;  %2378 = vmatprep.subr.mxu1 %v8255_v43 }
 0x1e0   :  { %8502 = vst [vmem:[#allocation92_spill] sm:$0xff] %v6438_v36  ;;  %1258 = vmatprep.mubr.f32.mxu0 %v1257_v57  ;;  %v645_v42 = vmul.f32 %v5995_v19, %v8503_v17  ;;  %1805 = vmatprep.mubr.f32.mxu1 %v6438_v36  ;;  %v6451_v3 = vand.u32 4294901760, %v792_v33  ;;  %v1272_v29 = vand.u32 4294901760, %v1271_v26  ;;  %v6455_v37 = vsub.f32 %v793_v41, %v6438_v36  ;;  %v8505_v57 = vld [vmem:[#allocation85_spill] sm:$0xff] }
 0x1e1   :  { %v795_v63 = vadd.f32 %v5621_v45, %v719_v2  ;;  %2380 = vmatpush2.msra.mxu1 %v8505_v57  ;;  %v1277_v62 = vsub.f32 %v6431_v12, %v8178_v31  ;;  %v794_v17 = vadd.f32 %v5625_v4, %v718_v44  ;;  %v644_v6 = vmul.f32 %v5995_v19, %v8506_v15 }
 0x1e2   :  { %8504 = vst [vmem:[#allocation89_spill] sm:$0xff] %v6451_v3  ;;  %v721_v23 = vmul.f32 %v5617_v53, %v645_v42  ;;  %1991 = vmatpush2.msra.mxu0 %v8507_v11  ;;  %v8183_v26 = vand.u32 4294901760, %v6455_v37  ;;  %v6471_v2 = vsub.f32 %v792_v33, %v6451_v3  ;;  %v647_v44 = vmul.f32 %v6174_v60, %v5569_v39 }
 0x1e3   :  { %1264 = vmatmul.mubr.f32.gmra.mxu0 %v1263_v7  ;;  %1807 = vmatmul.mubr.f32.gmra.mxu1 %v6451_v3  ;;  %v6467_v41 = vand.u32 4294901760, %v795_v63  ;;  %v1278_v42 = vand.u32 4294901760, %v1277_v62  ;;  %v6475_v31 = vand.u32 4294901760, %v794_v17  ;;  %v720_v7 = vmul.f32 %v5619_v21, %v644_v6  ;;  %v8510_v62 = vld [vmem:[#allocation87_spill] sm:$0xff] }
 0x1e4   :  { %1273 = vmatprep.mubr.f32.mxu0 %v1272_v29  ;;  %v797_v19 = vadd.f32 %v5621_v45, %v721_v23  ;;  %1992 = vmatprep.subr.mxu0 %v8255_v43  ;;  %v1286_v15 = vsub.f32 %v6455_v37, %v8183_v26  ;;  %v8184_v33 = vand.u32 4294901760, %v6471_v2  ;;  %v723_v29 = vmul.f32 %v5617_v53, %v647_v44 }
 0x1e5   :  { %8508 = vst [vmem:[#allocation88_spill] sm:$0xff] %v6467_v41  ;;  %8509 = vst [vmem:[#allocation152_spill] sm:$0xff] %v6475_v31  ;;  %1812 = vmatprep.mubr.f32.mxu1 %v6467_v41  ;;  %v6486_v39 = vsub.f32 %v795_v63, %v6467_v41  ;;  %1995 = vmatpush2.msra.mxu0 %v8510_v62  ;;  %v796_v6 = vadd.f32 %v5625_v4, %v720_v7 }
 0x1e6   :  { %v6490_v23 = vand.u32 4294901760, %v797_v19  ;;  %v6494_v3 = vsub.f32 %v794_v17, %v6475_v31  ;;  %v646_v36 = vmul.f32 %v6174_v60, %v5567_v13  ;;  %2734 = vmatprep.subr.mxu0 %v8255_v43  ;;  %3119 = vmatprep.subr.mxu1 %v8255_v43  ;;  %v1287_v63 = vand.u32 4294901760, %v1286_v15 }
 0x1e7   :  { %1279 = vmatmul.mubr.f32.gmra.mxu0 %v1278_v42  ;;  %1814 = vmatmul.mubr.f32.gmra.mxu1 %v6475_v31  ;;  %v1292_v44 = vsub.f32 %v6471_v2, %v8184_v33  ;;  %v8189_v7 = vand.u32 4294901760, %v6486_v39  ;;  %v799_v17 = vadd.f32 %v5621_v45, %v723_v29  ;;  %v6507_v26 = vand.u32 4294901760, %v796_v6  ;;  %v8514_v29 = vld [vmem:[#allocation94_spill] sm:$0xff] }
 0x1e8   :  { %8511 = vst [vmem:[#allocation153_spill] sm:$0xff] %v6490_v23  ;;  %1819 = vmatprep.mubr.f32.mxu1 %v6490_v23  ;;  %v8192_v13 = vand.u32 4294901760, %v6494_v3  ;;  %v722_v60 = vmul.f32 %v5619_v21, %v646_v36  ;;  %v6512_v42 = vsub.f32 %v797_v19, %v6490_v23  ;;  %1288 = vmatprep.mubr.f32.mxu0 %v1287_v63  ;;  %v8515_v23 = vld [vmem:[#allocation93_spill] sm:$0xff] }
 0x1e9   :  { %8512 = vst [vmem:[#allocation154_spill] sm:$0xff] %v6507_v26  ;;  %v1293_v15 = vand.u32 4294901760, %v1292_v44  ;;  %v1301_v33 = vsub.f32 %v6486_v39, %v8189_v7  ;;  %v6517_v31 = vand.u32 4294901760, %v799_v17  ;;  %v649_v41 = vmul.f32 %v6068_v34, %v8514_v29 }
 0x1ea   :  { %v1307_v62 = vsub.f32 %v6494_v3, %v8192_v13  ;;  %v798_v36 = vadd.f32 %v5625_v4, %v722_v60  ;;  %v8197_v19 = vand.u32 4294901760, %v6512_v42  ;;  %v6527_v63 = vsub.f32 %v796_v6, %v6507_v26 }
 0x1eb   :  { %8513 = vst [vmem:[#allocation155_spill] sm:$0xff] %v6517_v31  ;;  %1294 = vmatmul.mubr.f32.gmra.mxu0 %v1293_v15  ;;  %1821 = vmatmul.mubr.f32.gmra.mxu1 %v6507_v26  ;;  %v1302_v44 = vand.u32 4294901760, %v1301_v33  ;;  %v725_v7 = vmul.f32 %v5617_v53, %v649_v41  ;;  %v648_v29 = vmul.f32 %v6068_v34, %v8515_v23  ;;  %v8517_v23 = vld [vmem:[#allocation96_spill] sm:$0xff] }
 0x1ec   :  { %v6534_v11 = vsub.f32 %v799_v17, %v6517_v31  ;;  %1826 = vmatprep.mubr.f32.mxu1 %v6517_v31  ;;  %v1308_v60 = vand.u32 4294901760, %v1307_v62  ;;  %v6537_v13 = vand.u32 4294901760, %v798_v36  ;;  %v1316_v6 = vsub.f32 %v6512_v42, %v8197_v19  ;;  %v8519_v19 = vld [vmem:[#allocation95_spill] sm:$0xff] }
 0x1ed   :  { %v8198_v15 = vand.u32 4294901760, %v6527_v63  ;;  %1303 = vmatprep.mubr.f32.mxu0 %v1302_v44  ;;  %v801_v41 = vadd.f32 %v5621_v45, %v725_v7  ;;  %v724_v33 = vmul.f32 %v5619_v21, %v648_v29  ;;  %v651_v17 = vmul.f32 %v6198_v35, %v8517_v23 }
 0x1ee   :  { %8516 = vst [vmem:[#allocation94_spill] sm:$0xff] %v6537_v13  ;;  %v8201_v34 = vand.u32 4294901760, %v6534_v11  ;;  %v1317_v31 = vand.u32 4294901760, %v1316_v6  ;;  %v6552_v26 = vsub.f32 %v798_v36, %v6537_v13  ;;  %v650_v44 = vmul.f32 %v6198_v35, %v8519_v19  ;;  %v8521_v35 = vld [vmem:[#allocation98_spill] sm:$0xff] }
 0x1ef   :  { %v1322_v62 = vsub.f32 %v6527_v63, %v8198_v15  ;;  %1309 = vmatmul.mubr.f32.gmra.mxu0 %v1308_v60  ;;  %1828 = vmatmul.mubr.f32.gmra.mxu1 %v6537_v13  ;;  %v6557_v7 = vand.u32 4294901760, %v801_v41  ;;  %v800_v29 = vadd.f32 %v5625_v4, %v724_v33  ;;  %v727_v23 = vmul.f32 %v5617_v53, %v651_v17 }
 0x1f0   :  { %8518 = vst [vmem:[#allocation93_spill] sm:$0xff] %v6552_v26  ;;  %v1331_v6 = vsub.f32 %v6534_v11, %v8201_v34  ;;  %1318 = vmatprep.mubr.f32.mxu0 %v1317_v31  ;;  %v8204_v36 = vand.u32 4294901760, %v6552_v26  ;;  %v726_v57 = vmul.f32 %v5619_v21, %v650_v44  ;;  %v653_v19 = vmul.f32 %v6141_v51, %v8521_v35  ;;  %v8523_v44 = vld [vmem:[#allocation97_spill] sm:$0xff] }
 0x1f1   :  { %8520 = vst [vmem:[#allocation96_spill] sm:$0xff] %v6557_v7  ;;  %v1323_v15 = vand.u32 4294901760, %v1322_v62  ;;  %1833 = vmatprep.mubr.f32.mxu1 %v6557_v7  ;;  %v6569_v60 = vand.u32 4294901760, %v800_v29  ;;  %v803_v13 = vadd.f32 %v5621_v45, %v727_v23  ;;  %v6573_v34 = vsub.f32 %v801_v41, %v6557_v7  ;;  %v8526_v7 = vld [vmem:[#allocation100_spill] sm:$0xff] }
 0x1f2   :  { %v1332_v33 = vand.u32 4294901760, %v1331_v6  ;;  %v1337_v31 = vsub.f32 %v6552_v26, %v8204_v36  ;;  %v802_v17 = vadd.f32 %v5625_v4, %v726_v57  ;;  %v729_v62 = vmul.f32 %v5617_v53, %v653_v19 }
 0x1f3   :  { %8522 = vst [vmem:[#allocation95_spill] sm:$0xff] %v6569_v60  ;;  %v652_v35 = vmul.f32 %v6141_v51, %v8523_v44  ;;  %1324 = vmatmul.mubr.f32.gmra.mxu0 %v1323_v15  ;;  %1835 = vmatmul.mubr.f32.gmra.mxu1 %v6569_v60  ;;  %v6583_v6 = vand.u32 4294901760, %v803_v13  ;;  %v8209_v23 = vand.u32 4294901760, %v6573_v34  ;;  %v6587_v41 = vsub.f32 %v800_v29, %v6569_v60 }
 0x1f4   :  { %v655_v36 = vmul.f32 %v6250_v40, %v8526_v7  ;;  %1333 = vmatprep.mubr.f32.mxu0 %v1332_v33  ;;  %v1338_v57 = vand.u32 4294901760, %v1337_v31  ;;  %v6591_v26 = vand.u32 4294901760, %v802_v17  ;;  %v805_v19 = vadd.f32 %v5621_v45, %v729_v62 }
 0x1f5   :  { %8524 = vst [vmem:[#allocation98_spill] sm:$0xff] %v6583_v6  ;;  %8525 = vst [vmem:[#allocation97_spill] sm:$0xff] %v6587_v41  ;;  %v728_v51 = vmul.f32 %v5619_v21, %v652_v35  ;;  %1840 = vmatprep.mubr.f32.mxu1 %v6583_v6  ;;  %v1346_v15 = vsub.f32 %v6573_v34, %v8209_v23  ;;  %v8212_v29 = vand.u32 4294901760, %v6587_v41  ;;  %v8530_v35 = vld [vmem:[#allocation99_spill] sm:$0xff] }
 0x1f6   :  { %8527 = vst [vmem:[#allocation100_spill] sm:$0xff] %v6591_v26  ;;  %v6601_v44 = vsub.f32 %v803_v13, %v6583_v6  ;;  %v731_v7 = vmul.f32 %v5617_v53, %v655_v36  ;;  %v6604_v33 = vand.u32 4294901760, %v805_v19  ;;  %v6608_v62 = vsub.f32 %v802_v17, %v6591_v26 }
 0x1f7   :  { %v804_v31 = vadd.f32 %v5625_v4, %v728_v51  ;;  %v654_v60 = vmul.f32 %v6250_v40, %v8530_v35  ;;  %1339 = vmatmul.mubr.f32.gmra.mxu0 %v1338_v57  ;;  %1842 = vmatmul.mubr.f32.gmra.mxu1 %v6591_v26  ;;  %v1347_v23 = vand.u32 4294901760, %v1346_v15  ;;  %v1352_v13 = vsub.f32 %v6587_v41, %v8212_v29 }
 0x1f8   :  { %8528 = vst [vmem:[#allocation156_spill] sm:$0xff] %v6601_v44  ;;  %8529 = vst [vmem:[#allocation157_spill] sm:$0xff] %v6604_v33  ;;  %v8217_v36 = vand.u32 4294901760, %v6601_v44  ;;  %v807_v6 = vadd.f32 %v5621_v45, %v731_v7  ;;  %1847 = vmatprep.mubr.f32.mxu1 %v6604_v33  ;;  %v8222_v17 = vand.u32 4294901760, %v6608_v62  ;;  %v6624_v57 = vsub.f32 %v805_v19, %v6604_v33  ;;  %v8531_v7 = vld [vmem:[#allocation102_spill] sm:$0xff]  ;;  %v8532_v33 = vld [vmem:[#allocation101_spill] sm:$0xff] }
 0x1f9   :  { %v6619_v51 = vand.u32 4294901760, %v804_v31  ;;  %v730_v40 = vmul.f32 %v5619_v21, %v654_v60  ;;  %1348 = vmatprep.mubr.f32.mxu0 %v1347_v23  ;;  %v1353_v15 = vand.u32 4294901760, %v1352_v13  ;;  %v657_v26 = vmul.f32 %v6222_v25, %v8531_v7 }
 0x1fa   :  { %v1361_v35 = vsub.f32 %v6601_v44, %v8217_v36  ;;  %v6629_v29 = vand.u32 4294901760, %v807_v6  ;;  %v1367_v41 = vsub.f32 %v6608_v62, %v8222_v17  ;;  %v8223_v19 = vand.u32 4294901760, %v6624_v57 }
 0x1fb   :  { %v806_v60 = vadd.f32 %v5625_v4, %v730_v40  ;;  %v6639_v23 = vsub.f32 %v804_v31, %v6619_v51  ;;  %1354 = vmatmul.mubr.f32.gmra.mxu0 %v1353_v15  ;;  %1849 = vmatmul.mubr.f32.gmra.mxu1 %v6619_v51  ;;  %v733_v36 = vmul.f32 %v5617_v53, %v657_v26 }
 0x1fc   :  { %v1362_v13 = vand.u32 4294901760, %v1361_v35  ;;  %v656_v7 = vmul.f32 %v6222_v25, %v8532_v33  ;;  %v6646_v44 = vsub.f32 %v807_v6, %v6629_v29  ;;  %1854 = vmatprep.mubr.f32.mxu1 %v6629_v29  ;;  %v1376_v31 = vsub.f32 %v6624_v57, %v8223_v19 }
 0x1fd   :  { %v6649_v40 = vand.u32 4294901760, %v806_v60  ;;  %v1381_v15 = vand.u32 4294901760, %v6639_v23  ;;  %v1368_v35 = vand.u32 4294901760, %v1367_v41  ;;  %v809_v53 = vadd.f32 %v5621_v45, %v733_v36 }
 0x1fe   :  { %1363 = vmatprep.mubr.f32.mxu0 %v1362_v13  ;;  %v732_v26 = vmul.f32 %v5619_v21, %v656_v7  ;;  %v8226_v25 = vand.u32 4294901760, %v6646_v44  ;;  %v1377_v6 = vand.u32 4294901760, %v1376_v31 }
 0x1ff   :  { %v1382_v33 = vsub.f32 %v6639_v23, %v1381_v15  ;;  %v6662_v17 = vsub.f32 %v806_v60, %v6649_v40  ;;  %1369 = vmatmul.mubr.f32.gmra.mxu0 %v1368_v35  ;;  %1856 = vmatmul.mubr.f32.gmra.mxu1 %v6649_v40  ;;  %v6665_v19 = vand.u32 4294901760, %v809_v53 }
 0x200   :  { %v808_v41 = vadd.f32 %v5625_v4, %v732_v26  ;;  %v1391_v21 = vsub.f32 %v6646_v44, %v8226_v25  ;;  %1378 = vmatprep.mubr.f32.mxu0 %v1377_v6  ;;  %v8533_v26 = vld [vmem:[#allocation106_spill] sm:$0xff] }
 0x201   :  { %v8224_v45 = vand.u32 4294901760, %v6662_v17  ;;  %1861 = vmatprep.mubr.f32.mxu1 %v6665_v19  ;;  %v1383_v36 = vand.u32 4294901760, %v1382_v33  ;;  %v6676_v60 = vsub.f32 %v809_v53, %v6665_v19  ;;  %v8534_v6 = vand.u32 4294901760, %v8533_v26 }
 0x202   :  { %v6673_v13 = vand.u32 4294901760, %v808_v41  ;;  %v1392_v7 = vand.u32 4294901760, %v1391_v21 }
 0x203   :  { %v1397_v4 = vsub.f32 %v6662_v17, %v8224_v45  ;;  %1384 = vmatmul.mubr.f32.gmra.mxu0 %v1383_v36  ;;  %v8225_v31 = vand.u32 4294901760, %v6676_v60  ;;  %v8535_v36 = vand.u32 4294901760, %v5645_v8 }
 0x204   :  { %1863 = vmatmul.mubr.f32.gmra.mxu1 %v6673_v13  ;;  %v6684_v35 = vsub.f32 %v808_v41, %v6673_v13  ;;  %1393 = vmatprep.mubr.f32.mxu0 %v1392_v7  ;;  %v8536_v7 = vand.u32 4294901760, %v5670_v24 }
 0x205   :  { %2384 = vmatprep.mubr.f32.mxu1 %v8534_v6  ;;  %v1398_v33 = vand.u32 4294901760, %v1397_v4  ;;  %v1406_v53 = vsub.f32 %v6676_v60, %v8225_v31  ;;  %v8537_v6 = vld [vmem:[#allocation16_spill] sm:$0xff]  ;;  %v8538_v31 = vld [vmem:[#allocation17_spill] sm:$0xff] }
 0x206   :  { %v1411_v21 = vand.u32 4294901760, %v6684_v35 }
 0x207   :  { %1399 = vmatmul.mubr.f32.gmra.mxu0 %v1398_v33  ;;  %v1407_v45 = vand.u32 4294901760, %v1406_v53  ;;  %v8539_v33 = vld [vmem:[#allocation110_spill] sm:$0xff]  ;;  %v8541_v53 = vld [vmem:[#allocation112_spill] sm:$0xff] }
 0x208   :  { %2388 = vmatmul.mubr.f32.vlgmr.msra.gmra.mxu1 %v8535_v36  ;;  %v1412_v41 = vsub.f32 %v6684_v35, %v1411_v21  ;;  %v8540_v25 = vand.u32 4294901760, %v8539_v33  ;;  %v8542_v36 = vand.u32 4294901760, %v8541_v53 }
 0x209   :  { %2395 = vmatprep.mubr.f32.mxu1 %v8536_v7  ;;  %3121 = vmatpush1.msra.mxu1 %v8537_v6  ;;  %v8543_v7 = vld [vmem:[#allocation18_spill] sm:$0xff] }
 0x20a   :  { %1408 = vmatprep.mubr.f32.mxu0 %v1407_v45  ;;  %v1413_v4 = vand.u32 4294901760, %v1412_v41  ;;  %3122 = vmatprep.subr.mxu1 %v8255_v43  ;;  %v8544_v45 = vld [vmem:[#allocation113_spill] sm:$0xff]  ;;  %v8546_v6 = vld [vmem:[#allocation22_spill] sm:$0xff] }
 0x20b   :  { %3124 = vmatpush1.msra.mxu1 %v8538_v31  ;;  %v8545_v41 = vand.u32 4294901760, %v8544_v45  ;;  %v8547_v31 = vand.u32 4294901760, %v8546_v6 }
 0x20c   :  { %1414 = vmatmul.mubr.f32.gmra.mxu0 %v1413_v4  ;;  %2399 = vmatmul.mubr.f32.gmra.mxu1 %v8540_v25  ;;  %v8548_v25 = vand.u32 4294901760, %v5734_v10 }
 0x20d   :  { %1998 = vmatprep.mubr.f32.mxu0 %v8533_v26  ;;  %2406 = vmatprep.mubr.f32.mxu1 %v8542_v36  ;;  %v8549_v26 = vld [vmem:[#allocation23_spill] sm:$0xff]  ;;  %v8552_v36 = vld [vmem:[#allocation117_spill] sm:$0xff] }
 0x20e   :  { %3125 = vmatprep.subr.mxu1 %v8255_v43  ;;  %v8550_v4 = vand.u32 4294901760, %v8549_v26 }
 0x20f   :  { %3127 = vmatpush1.msra.mxu1 %v8543_v7  ;;  %v8553_v7 = vand.u32 4294901760, %v8552_v36 }
 0x210   :  { %2001 = vmatmul.mubr.f32.vlgmr.msra.gmra.mxu0 %v5645_v8  ;;  %2410 = vmatmul.mubr.f32.gmra.mxu1 %v8545_v41  ;;  %v8551_v8 = vand.u32 4294901760, %v5768_v16  ;;  %v8555_v41 = vld [vmem:[#allocation24_spill] sm:$0xff] }
 0x211   :  { %2738 = vmatpush1.msra.mxu0 %v8547_v31  ;;  %2007 = vmatprep.mubr.f32.mxu0 %v5670_v24  ;;  %v8554_v24 = vld [vmem:[#allocation19_spill] sm:$0xff]  ;;  %v8556_v6 = vand.u32 4294901760, %v8555_v41  ;;  %v8559_v31 = vld [vmem:[#allocation20_spill] sm:$0xff]  ;;  %v8570_v41 = vld [vmem:[#allocation25_spill] sm:$0xff] }
 0x212   :  { %2417 = vmatprep.mubr.f32.mxu1 %v8548_v25  ;;  %2739 = vmatprep.subr.mxu0 %v8255_v43  ;;  %v8560_v25 = vld [vmem:[#allocation26_spill] sm:$0xff] }
 0x213   :  { %2743 = vmatpush1.msra.mxu0 %v8550_v4  ;;  %3128 = vmatprep.subr.mxu1 %v8255_v43  ;;  %v8561_v26 = vand.u32 4294901760, %v8560_v25 }
 0x214   :  { %2010 = vmatmul.mubr.f32.gmra.mxu0 %v8539_v33  ;;  %2421 = vmatmul.mubr.f32.gmra.mxu1 %v8551_v8  ;;  %v8557_v33 = vand.u32 4294901760, %v5794_v58  ;;  %v8565_v8 = vld [vmem:[#allocation21_spill] sm:$0xff] }
 0x215   :  { %2016 = vmatprep.mubr.f32.mxu0 %v8541_v53  ;;  %2428 = vmatprep.mubr.f32.mxu1 %v8553_v7  ;;  %v8558_v53 = vand.u32 4294901760, %v5829_v52  ;;  %v8566_v7 = vld [vmem:[#allocation27_spill] sm:$0xff] }
 0x216   :  { %2744 = vmatprep.subr.mxu0 %v8255_v43  ;;  %3130 = vmatpush1.msra.mxu1 %v8554_v24  ;;  %v8567_v24 = vand.u32 4294901760, %v8566_v7  ;;  %v8586_v7 = vld [vmem:[#allocation33_spill] sm:$0xff] }
 0x217   :  { %2748 = vmatpush1.msra.mxu0 %v8556_v6  ;;  %3131 = vmatprep.subr.mxu1 %v8255_v43  ;;  %v8571_v6 = vld [vmem:[#allocation28_spill] sm:$0xff] }
 0x218   :  { %2019 = vmatmul.mubr.f32.gmra.mxu0 %v8544_v45  ;;  %2432 = vmatmul.mubr.f32.gmra.mxu1 %v8557_v33  ;;  %v8562_v45 = vld [vmem:[#allocation121_spill] sm:$0xff]  ;;  %v8572_v33 = vand.u32 4294901760, %v8571_v6  ;;  %v8593_v6 = vld [vmem:[#allocation34_spill] sm:$0xff] }
 0x219   :  { %2025 = vmatprep.mubr.f32.mxu0 %v5734_v10  ;;  %2439 = vmatprep.mubr.f32.mxu1 %v8558_v53  ;;  %v8563_v4 = vand.u32 4294901760, %v8562_v45  ;;  %v8564_v10 = vand.u32 4294901760, %v5852_v55  ;;  %v8575_v53 = vld [vmem:[#allocation29_spill] sm:$0xff] }
 0x21a   :  { %2749 = vmatprep.subr.mxu0 %v8255_v43  ;;  %3133 = vmatpush1.msra.mxu1 %v8559_v31  ;;  %v8576_v31 = vld [vmem:[#allocation30_spill] sm:$0xff] }
 0x21b   :  { %2753 = vmatpush1.msra.mxu0 %v8561_v26  ;;  %3134 = vmatprep.subr.mxu1 %v8255_v43  ;;  %v8577_v25 = vand.u32 4294901760, %v8576_v31  ;;  %v8578_v26 = vand.u32 4294901760, %v5955_v50  ;;  %v8599_v31 = vld [vmem:[#allocation38_spill] sm:$0xff] }
 0x21c   :  { %2028 = vmatmul.mubr.f32.gmra.mxu0 %v5768_v16  ;;  %2443 = vmatmul.mubr.f32.gmra.mxu1 %v8563_v4  ;;  %v8568_v16 = vand.u32 4294901760, %v5887_v20  ;;  %v8581_v4 = vld [vmem:[#allocation31_spill] sm:$0xff] }
 0x21d   :  { %2034 = vmatprep.mubr.f32.mxu0 %v8552_v36  ;;  %2450 = vmatprep.mubr.f32.mxu1 %v8564_v10  ;;  %v8569_v36 = vand.u32 4294901760, %v5896_v1  ;;  %v8582_v10 = vand.u32 4294901760, %v8581_v4 }
 0x21e   :  { %2754 = vmatprep.subr.mxu0 %v8255_v43  ;;  %3136 = vmatpush1.msra.mxu1 %v8565_v8 }
 0x21f   :  { %2758 = vmatpush1.msra.mxu0 %v8567_v24  ;;  %3137 = vmatprep.subr.mxu1 %v8255_v43  ;;  %v8587_v24 = vld [vmem:[#allocation35_spill] sm:$0xff] }
 0x220   :  { %2037 = vmatmul.mubr.f32.gmra.mxu0 %v5794_v58  ;;  %2454 = vmatmul.mubr.f32.gmra.mxu1 %v8568_v16  ;;  %v8573_v58 = vand.u32 4294901760, %v5910_v0  ;;  %v8588_v16 = vand.u32 4294901760, %v8587_v24 }
 0x221   :  { %2043 = vmatprep.mubr.f32.mxu0 %v5829_v52  ;;  %2461 = vmatprep.mubr.f32.mxu1 %v8569_v36  ;;  %v8574_v52 = vand.u32 4294901760, %v5933_v22 }
 0x222   :  { %2759 = vmatprep.subr.mxu0 %v8255_v43  ;;  %3139 = vmatpush1.msra.mxu1 %v8570_v41 }
 0x223   :  { %2763 = vmatpush1.msra.mxu0 %v8572_v33  ;;  %3140 = vmatprep.subr.mxu1 %v8255_v43  ;;  %v8594_v33 = vld [vmem:[#allocation36_spill] sm:$0xff] }
 0x224   :  { %2046 = vmatmul.mubr.f32.gmra.mxu0 %v8562_v45  ;;  %2465 = vmatmul.mubr.f32.gmra.mxu1 %v8573_v58  ;;  %v8580_v45 = vld [vmem:[#allocation32_spill] sm:$0xff]  ;;  %v8595_v58 = vand.u32 4294901760, %v8594_v33  ;;  %v8614_v33 = vld [vmem:[#allocation142_spill] sm:$0xff] }
 0x225   :  { %2052 = vmatprep.mubr.f32.mxu0 %v5852_v55  ;;  %2472 = vmatprep.mubr.f32.mxu1 %v8574_v52  ;;  %v8579_v55 = vand.u32 4294901760, %v5969_v61 }
 0x226   :  { %2764 = vmatprep.subr.mxu0 %v8255_v43  ;;  %3142 = vmatpush1.msra.mxu1 %v8575_v53  ;;  %v8598_v53 = vld [vmem:[#allocation37_spill] sm:$0xff] }
 0x227   :  { %2768 = vmatpush1.msra.mxu0 %v8577_v25  ;;  %3143 = vmatprep.subr.mxu1 %v8255_v43  ;;  %v8600_v25 = vand.u32 4294901760, %v8599_v31 }
 0x228   :  { %2055 = vmatmul.mubr.f32.gmra.mxu0 %v5887_v20  ;;  %2476 = vmatmul.mubr.f32.gmra.mxu1 %v8578_v26  ;;  %v8583_v20 = vld [vmem:[#allocation131_spill] sm:$0xff] }
 0x229   :  { %2061 = vmatprep.mubr.f32.mxu0 %v5896_v1  ;;  %2483 = vmatprep.mubr.f32.mxu1 %v8579_v55  ;;  %v8584_v8 = vand.u32 4294901760, %v8583_v20  ;;  %v8585_v1 = vand.u32 4294901760, %v6014_v47  ;;  %v8601_v55 = vand.u32 4294901760, %v6105_v48 }
 0x22a   :  { %2769 = vmatprep.subr.mxu0 %v8255_v43  ;;  %3145 = vmatpush1.msra.mxu1 %v8580_v45  ;;  %v8603_v45 = vld [vmem:[#allocation39_spill] sm:$0xff] }
 0x22b   :  { %2773 = vmatpush1.msra.mxu0 %v8582_v10  ;;  %3146 = vmatprep.subr.mxu1 %v8255_v43  ;;  %v8604_v10 = vld [vmem:[#allocation41_spill] sm:$0xff] }
 0x22c   :  { %2064 = vmatmul.mubr.f32.gmra.mxu0 %v5910_v0  ;;  %2487 = vmatmul.mubr.f32.gmra.mxu1 %v8584_v8  ;;  %v8589_v0 = vld [vmem:[#allocation134_spill] sm:$0xff]  ;;  %v8606_v8 = vand.u32 4294901760, %v6137_v32 }
 0x22d   :  { %2070 = vmatprep.mubr.f32.mxu0 %v5933_v22  ;;  %2494 = vmatprep.mubr.f32.mxu1 %v8585_v1  ;;  %v8590_v36 = vand.u32 4294901760, %v8589_v0  ;;  %v8591_v22 = vld [vmem:[#allocation61_spill] sm:$0xff] }
 0x22e   :  { %2774 = vmatprep.subr.mxu0 %v8255_v43  ;;  %3148 = vmatpush1.msra.mxu1 %v8586_v7  ;;  %v8592_v41 = vand.u32 4294901760, %v8591_v22  ;;  %v1647_v52 = vpop.f32.mrf.mxu1  ;;  %v8607_v7 = vld [vmem:[#allocation64_spill] sm:$0xff] }
 0x22f   :  { %2778 = vmatpush1.msra.mxu0 %v8588_v16  ;;  %3149 = vmatprep.subr.mxu1 %v8255_v43  ;;  %v8608_v24 = vand.u32 4294901760, %v8607_v7 }
 0x230   :  { %2073 = vmatmul.mubr.f32.gmra.mxu0 %v5955_v50  ;;  %2498 = vmatmul.mubr.f32.gmra.mxu1 %v8590_v36  ;;  %v8596_v50 = vand.u32 4294901760, %v6064_v46  ;;  %v1649_v26 = vpop.f32.mrf.mxu1 }
 0x231   :  { %2079 = vmatprep.mubr.f32.mxu0 %v5969_v61  ;;  %2505 = vmatprep.mubr.f32.mxu1 %v8592_v41  ;;  %v8597_v61 = vand.u32 4294901760, %v6087_v14  ;;  %v8621_v26 = vand.u32 4294901760, %v6230_v9 }
 0x232   :  { %2779 = vmatprep.subr.mxu0 %v8255_v43  ;;  %3151 = vmatpush1.msra.mxu1 %v8593_v6  ;;  %v8612_v6 = vld [vmem:[#allocation140_spill] sm:$0xff] }
 0x233   :  { %2783 = vmatpush1.msra.mxu0 %v8595_v58  ;;  %3152 = vmatprep.subr.mxu1 %v8255_v43  ;;  %v1654_v4 = vpop.f32.mrf.mxu1  ;;  %v8615_v58 = vand.u32 4294901760, %v8614_v33 }
 0x234   :  { %2082 = vmatmul.mubr.f32.gmra.mxu0 %v8583_v20  ;;  %2509 = vmatmul.mubr.f32.gmra.mxu1 %v8596_v50  ;;  %v8605_v20 = vand.u32 4294901760, %v8604_v10 }
 0x235   :  { %2088 = vmatprep.mubr.f32.mxu0 %v6014_v47  ;;  %2516 = vmatprep.mubr.f32.mxu1 %v8597_v61  ;;  %v8602_v47 = vand.u32 4294901760, %v6120_v30  ;;  %v1656_v1 = vpop.f32.mrf.mxu1  ;;  %v8616_v61 = vld [vmem:[#allocation42_spill] sm:$0xff] }
 0x236   :  { %2784 = vmatprep.subr.mxu0 %v8255_v43  ;;  %3154 = vmatpush1.msra.mxu1 %v8598_v53  ;;  %v8625_v1 = vand.u32 4294901760, %v6238_v18 }
 0x237   :  { %2788 = vmatpush1.msra.mxu0 %v8600_v25  ;;  %3155 = vmatprep.subr.mxu1 %v8255_v43  ;;  %v950_v16 = vpop.f32.mrf.mxu0 }
 0x238   :  { %2091 = vmatmul.mubr.f32.gmra.mxu0 %v8589_v0  ;;  %2520 = vmatmul.mubr.f32.gmra.mxu1 %v8601_v55  ;;  %v8609_v0 = vld [vmem:[#allocation40_spill] sm:$0xff]  ;;  %v6839_v36 = vadd.f32 %v1647_v52, %v950_v16 }
 0x239   :  { %2097 = vmatprep.mubr.f32.mxu0 %v8591_v22  ;;  %2527 = vmatprep.mubr.f32.mxu1 %v8602_v47  ;;  %v8610_v22 = vld [vmem:[#allocation43_spill] sm:$0xff]  ;;  %v8617_v52 = vld [vmem:[#allocation44_spill] sm:$0xff] }
 0x23a   :  { %2789 = vmatprep.subr.mxu0 %v8255_v43  ;;  %3157 = vmatpush1.msra.mxu1 %v8603_v45  ;;  %v8611_v41 = vand.u32 4294901760, %v8610_v22  ;;  %v8618_v53 = vand.u32 4294901760, %v8617_v52  ;;  %v8622_v45 = vld [vmem:[#allocation45_spill] sm:$0xff]  ;;  %v8628_v16 = vld [vmem:[#allocation48_spill] sm:$0xff]  ;;  %v8635_v52 = vand.u32 4294901760, %v6304_v5 }
 0x23b   :  { %2793 = vmatpush1.msra.mxu0 %v8605_v20  ;;  %3158 = vmatprep.subr.mxu1 %v8255_v43  ;;  %v1661_v50 = vpop.f32.mrf.mxu1  ;;  %v8623_v20 = vld [vmem:[#allocation46_spill] sm:$0xff] }
 0x23c   :  { %2100 = vmatmul.mubr.f32.gmra.mxu0 %v6064_v46  ;;  %2531 = vmatmul.mubr.f32.gmra.mxu1 %v8606_v8  ;;  %v952_v46 = vpop.f32.mrf.mxu0  ;;  %v8624_v8 = vand.u32 4294901760, %v8623_v20 }
 0x23d   :  { %2106 = vmatprep.mubr.f32.mxu0 %v6087_v14  ;;  %2538 = vmatprep.mubr.f32.mxu1 %v8608_v24  ;;  %v8613_v14 = vand.u32 4294901760, %v8612_v6  ;;  %v1663_v31 = vpop.f32.mrf.mxu1 }
 0x23e   :  { %2794 = vmatprep.subr.mxu0 %v8255_v43  ;;  %3160 = vmatpush1.msra.mxu1 %v8609_v0  ;;  %v8629_v0 = vand.u32 4294901760, %v8628_v16  ;;  %v8647_v16 = vand.u32 4294901760, %v6385_v49 }
 0x23f   :  { %2798 = vmatpush1.msra.mxu0 %v8611_v41  ;;  %3161 = vmatprep.subr.mxu1 %v8255_v43  ;;  %v1668_v47 = vpop.f32.mrf.mxu1  ;;  %v8630_v41 = vand.u32 4294901760, %v6275_v56 }
 0x240   :  { %2109 = vmatmul.mubr.f32.gmra.mxu0 %v6105_v48  ;;  %2542 = vmatmul.mubr.f32.gmra.mxu1 %v8613_v14  ;;  %v8619_v48 = vld [vmem:[#allocation143_spill] sm:$0xff]  ;;  %v8631_v14 = vand.u32 4294901760, %v6284_v27 }
 0x241   :  { %2115 = vmatprep.mubr.f32.mxu0 %v6120_v30  ;;  %2549 = vmatprep.mubr.f32.mxu1 %v8615_v58  ;;  %v8620_v25 = vand.u32 4294901760, %v8619_v48  ;;  %v965_v30 = vpop.f32.mrf.mxu0 }
 0x242   :  { %2799 = vmatprep.subr.mxu0 %v8255_v43  ;;  %3163 = vmatpush1.msra.mxu1 %v8616_v61  ;;  %v6861_v55 = vadd.f32 %v1654_v4, %v965_v30  ;;  %v8626_v4 = vand.u32 4294901760, %v6258_v38  ;;  %v8633_v61 = vld [vmem:[#allocation50_spill] sm:$0xff]  ;;  %v8638_v30 = vld [vmem:[#allocation51_spill] sm:$0xff] }
 0x243   :  { %2803 = vmatpush1.msra.mxu0 %v8618_v53  ;;  %3164 = vmatprep.subr.mxu1 %v8255_v43  ;;  %v967_v10 = vpop.f32.mrf.mxu0 }
 0x244   :  { %2118 = vmatmul.mubr.f32.gmra.mxu0 %v6137_v32  ;;  %2553 = vmatmul.mubr.f32.gmra.mxu1 %v8620_v25  ;;  %v1670_v32 = vpop.f32.mrf.mxu1  ;;  %v8641_v10 = vand.u32 4294901760, %v6359_v59 }
 0x245   :  { %2124 = vmatprep.mubr.f32.mxu0 %v8607_v7  ;;  %2560 = vmatprep.mubr.f32.mxu1 %v8621_v26  ;;  %v8627_v7 = vld [vmem:[#allocation47_spill] sm:$0xff]  ;;  %v980_v24 = vpop.f32.mrf.mxu0  ;;  %v8639_v26 = vand.u32 4294901760, %v8638_v30 }
 0x246   :  { %2804 = vmatprep.subr.mxu0 %v8255_v43  ;;  %3166 = vmatpush1.msra.mxu1 %v8622_v45  ;;  %v6879_v22 = vadd.f32 %v1661_v50, %v980_v24  ;;  %v1675_v46 = vpop.f32.mrf.mxu1  ;;  %v8634_v50 = vand.u32 4294901760, %v8633_v61  ;;  %v8653_v61 = vld [vmem:[#allocation14_spill] sm:$0xff] }
 0x247   :  { %2808 = vmatpush1.msra.mxu0 %v8624_v8  ;;  %3167 = vmatprep.subr.mxu1 %v8255_v43  ;;  %v8642_v8 = vld [vmem:[#allocation54_spill] sm:$0xff] }
 0x248   :  { %2127 = vmatmul.mubr.f32.gmra.mxu0 %v8612_v6  ;;  %2564 = vmatmul.mubr.f32.gmra.mxu1 %v8625_v1  ;;  %v982_v6 = vpop.f32.mrf.mxu0  ;;  %v1677_v58 = vpop.f32.mrf.mxu1  ;;  %v8643_v1 = vld [vmem:[#allocation53_spill] sm:$0xff] }
 0x249   :  { %2133 = vmatprep.mubr.f32.mxu0 %v8614_v33  ;;  %2571 = vmatprep.mubr.f32.mxu1 %v8626_v4  ;;  %v8632_v33 = vld [vmem:[#allocation49_spill] sm:$0xff]  ;;  %v8644_v4 = vand.u32 4294901760, %v8643_v1 }
 0x24a   :  { %2809 = vmatprep.subr.mxu0 %v8255_v43  ;;  %3169 = vmatpush2.msra.mxu1 %v8627_v7 }
 0x24b   :  { %2813 = vmatpush1.msra.mxu0 %v8629_v0  ;;  %3170 = vmatprep.subr.mxu1 %v8255_v43  ;;  %v995_v53 = vpop.f32.mrf.mxu0  ;;  %v1682_v31 = vpop.f32.mrf.mxu1  ;;  %v8648_v0 = vld [vmem:[#allocation56_spill] sm:$0xff] }
 0x24c   :  { %2136 = vmatmul.mubr.f32.gmra.mxu0 %v8619_v48  ;;  %2575 = vmatmul.mubr.f32.gmra.mxu1 %v8630_v41  ;;  %v8637_v48 = vld [vmem:[#allocation52_spill] sm:$0xff]  ;;  %v6900_v25 = vadd.f32 %v1668_v47, %v995_v53  ;;  %v8656_v53 = vld [vmem:[#allocation57_spill] sm:$0xff] }
 0x24d   :  { %2142 = vmatprep.mubr.f32.mxu0 %v6230_v9  ;;  %2582 = vmatprep.mubr.f32.mxu1 %v8631_v14  ;;  %v8636_v9 = vand.u32 4294901760, %v6328_v54  ;;  %v1684_v45 = vpop.f32.mrf.mxu1 }
 0x24e   :  { %2814 = vmatprep.subr.mxu0 %v8255_v43  ;;  %3172 = vmatpush2.msra.mxu1 %v8632_v33  ;;  %v8661_v45 = vld [vmem:[#allocation59_spill] sm:$0xff] }
 0x24f   :  { %2818 = vmatpush2.msra.mxu0 %v8634_v50  ;;  %3173 = vmatprep.subr.mxu1 %v8255_v43  ;;  %v8654_v50 = vand.u32 4294901760, %v8653_v61 }
 0x250   :  { %2145 = vmatmul.mubr.f32.gmra.mxu0 %v6238_v18  ;;  %2586 = vmatmul.mubr.f32.gmra.mxu1 %v8635_v52  ;;  %v997_v18 = vpop.f32.mrf.mxu0  ;;  %v1689_v47 = vpop.f32.mrf.mxu1 }
 0x251   :  { %2151 = vmatprep.mubr.f32.mxu0 %v6258_v38  ;;  %2593 = vmatprep.mubr.f32.mxu1 %v8636_v9  ;;  %v8640_v38 = vand.u32 4294901760, %v6344_v28  ;;  %v8655_v9 = vld [vmem:[#allocation58_spill] sm:$0xff] }
 0x252   :  { %2819 = vmatprep.subr.mxu0 %v8255_v43  ;;  %3175 = vmatpush2.msra.mxu1 %v8637_v48  ;;  %v1010_v20 = vpop.f32.mrf.mxu0  ;;  %v1691_v7 = vpop.f32.mrf.mxu1  ;;  %v8660_v18 = vld [vmem:[#allocation62_spill] sm:$0xff] }
 0x253   :  { %2823 = vmatpush2.msra.mxu0 %v8639_v26  ;;  %3176 = vmatprep.subr.mxu1 %v8255_v43  ;;  %v6913_v32 = vadd.f32 %v1675_v46, %v1010_v20  ;;  %v8649_v46 = vld [vmem:[#allocation55_spill] sm:$0xff]  ;;  %v8666_v7 = vld [vmem:[#allocation65_spill] sm:$0xff] }
 0x254   :  { %2154 = vmatmul.mubr.f32.gmra.mxu0 %v6275_v56  ;;  %2597 = vmatmul.mubr.f32.gmra.mxu1 %v8640_v38  ;;  %v1012_v56 = vpop.f32.mrf.mxu0  ;;  %v8650_v6 = vand.u32 4294901760, %v8649_v46  ;;  %v8662_v38 = vand.u32 4294901760, %v8661_v45 }
 0x255   :  { %2160 = vmatprep.mubr.f32.mxu0 %v6284_v27  ;;  %2604 = vmatprep.mubr.f32.mxu1 %v8641_v10  ;;  %v8645_v27 = vld [vmem:[#allocation149_spill] sm:$0xff]  ;;  %v8665_v56 = vld [vmem:[#allocation66_spill] sm:$0xff] }
 0x256   :  { %2824 = vmatprep.subr.mxu0 %v8255_v43  ;;  %3178 = vmatpush2.msra.mxu1 %v8642_v8  ;;  %v8646_v24 = vand.u32 4294901760, %v8645_v27  ;;  %v1025_v41 = vpop.f32.mrf.mxu0  ;;  %v8664_v8 = vand.u32 4294901760, %v6486_v39 }
 0x257   :  { %2828 = vmatpush2.msra.mxu0 %v8644_v4  ;;  %3179 = vmatprep.subr.mxu1 %v8255_v43  ;;  %v6928_v14 = vadd.f32 %v1682_v31, %v1025_v41  ;;  %v8657_v31 = vand.u32 4294901760, %v8656_v53  ;;  %v8669_v41 = vand.u32 4294901760, %v6512_v42 }
 0x258   :  { %2163 = vmatmul.mubr.f32.gmra.mxu0 %v6304_v5  ;;  %2608 = vmatmul.mubr.f32.gmra.mxu1 %v8646_v24  ;;  %v8651_v5 = vld [vmem:[#allocation15_spill] sm:$0xff]  ;;  %v1027_v58 = vpop.f32.mrf.mxu0 }
 0x259   :  { %2169 = vmatprep.mubr.f32.mxu0 %v6328_v54  ;;  %2615 = vmatprep.mubr.f32.mxu1 %v8647_v16  ;;  %v8652_v33 = vand.u32 4294901760, %v8651_v5  ;;  %v1696_v54 = vpop.f32.mrf.mxu1 }
 0x25a   :  { %2829 = vmatprep.subr.mxu0 %v8255_v43  ;;  %3181 = vmatpush2.msra.mxu1 %v8648_v0  ;;  %v8668_v0 = vand.u32 4294901760, %v6494_v3 }
 0x25b   :  { %2833 = vmatpush2.msra.mxu0 %v8650_v6  ;;  %3182 = vmatprep.subr.mxu1 %v8255_v43  ;;  %v1698_v52 = vpop.f32.mrf.mxu1  ;;  %v8670_v6 = vld [vmem:[#allocation72_spill] sm:$0xff] }
 0x25c   :  { %2172 = vmatmul.mubr.f32.gmra.mxu0 %v6344_v28  ;;  %2619 = vmatmul.mubr.f32.gmra.mxu1 %v8652_v33  ;;  %v8658_v28 = vand.u32 4294901760, %v6431_v12  ;;  %v1040_v48 = vpop.f32.mrf.mxu0  ;;  %v8675_v52 = vld [vmem:[#allocation74_spill] sm:$0xff] }
 0x25d   :  { %2178 = vmatprep.mubr.f32.mxu0 %v6359_v59  ;;  %2626 = vmatprep.mubr.f32.mxu1 %v8654_v50  ;;  %v8659_v59 = vand.u32 4294901760, %v6455_v37  ;;  %v1703_v30 = vpop.f32.mrf.mxu1  ;;  %v6949_v26 = vadd.f32 %v1689_v47, %v1040_v48  ;;  %v3449_v48 = vld [vmem:[#allocation7 + $0x38] sm:$0xff] }
 0x25e   :  { %2834 = vmatprep.subr.mxu0 %v8255_v43  ;;  %3184 = vmatpush2.msra.mxu1 %v8655_v9  ;;  %v1042_v10 = vpop.f32.mrf.mxu0  ;;  %v8676_v9 = vld [vmem:[#allocation73_spill] sm:$0xff] }
 0x25f   :  { %2838 = vmatpush2.msra.mxu0 %v8657_v31  ;;  %3185 = vmatprep.subr.mxu1 %v8255_v43  ;;  %v1705_v20 = vpop.f32.mrf.mxu1  ;;  %v8677_v53 = vand.u32 4294901760, %v8676_v9  ;;  %v8682_v10 = vld [vmem:[#allocation76_spill] sm:$0xff] }
 0x260   :  { %2181 = vmatmul.mubr.f32.gmra.mxu0 %v8645_v27  ;;  %2630 = vmatmul.mubr.f32.gmra.mxu1 %v8658_v28  ;;  %v1055_v47 = vpop.f32.mrf.mxu0  ;;  %v8667_v27 = vand.u32 4294901760, %v8666_v7  ;;  %v8683_v20 = vand.u32 4294901760, %v8682_v10 }
 0x261   :  { %2187 = vmatprep.mubr.f32.mxu0 %v6385_v49  ;;  %2637 = vmatprep.mubr.f32.mxu1 %v8659_v59  ;;  %v8663_v49 = vand.u32 4294901760, %v6471_v2  ;;  %v1710_v1 = vpop.f32.mrf.mxu1  ;;  %v6962_v4 = vadd.f32 %v1696_v54, %v1055_v47 }
 0x262   :  { %2839 = vmatprep.subr.mxu0 %v8255_v43  ;;  %3187 = vmatpush2.msra.mxu1 %v8660_v18  ;;  %v1057_v24 = vpop.f32.mrf.mxu0 }
 0x263   :  { %2843 = vmatpush2.msra.mxu0 %v8662_v38  ;;  %3188 = vmatprep.subr.mxu1 %v8255_v43  ;;  %v1712_v16 = vpop.f32.mrf.mxu1  ;;  %v8681_v38 = vld [vmem:[#allocation75_spill] sm:$0xff] }
 0x264   :  { %2190 = vmatmul.mubr.f32.gmra.mxu0 %v8651_v5  ;;  %2641 = vmatmul.mubr.f32.gmra.mxu1 %v8663_v49  ;;  %v8671_v5 = vld [vmem:[#allocation69_spill] sm:$0xff] }
 0x265   :  { %2196 = vmatprep.mubr.f32.mxu0 %v8653_v61  ;;  %2648 = vmatprep.mubr.f32.mxu1 %v8664_v8  ;;  %v1070_v46 = vpop.f32.mrf.mxu0  ;;  %v8672_v33 = vand.u32 4294901760, %v8671_v5  ;;  %v8674_v61 = vand.u32 4294901760, %v6534_v11  ;;  %v8684_v49 = vld [vmem:[#allocation97_spill] sm:$0xff] }
 0x266   :  { %2844 = vmatprep.subr.mxu0 %v8255_v43  ;;  %3190 = vmatpush2.msra.mxu1 %v8665_v56  ;;  %v6978_v54 = vadd.f32 %v1703_v30, %v1070_v46  ;;  %v1717_v58 = vpop.f32.mrf.mxu1  ;;  %v8680_v30 = vand.u32 4294901760, %v6573_v34  ;;  %v8686_v56 = vld [vmem:[#allocation156_spill] sm:$0xff]  ;;  %v3447_v5 = vld [vmem:[#allocation7 + $0x28] sm:$0xff] }
 0x267   :  { %2848 = vmatpush2.msra.mxu0 %v8667_v27  ;;  %3191 = vmatprep.subr.mxu1 %v8255_v43  ;;  %v8687_v7 = vand.u32 4294901760, %v8686_v56 }
 0x268   :  { %2199 = vmatmul.mubr.f32.gmra.mxu0 %v6431_v12  ;;  %2652 = vmatmul.mubr.f32.gmra.mxu1 %v8668_v0  ;;  %v8673_v12 = vand.u32 4294901760, %v6527_v63  ;;  %v1719_v50 = vpop.f32.mrf.mxu1  ;;  %v8688_v0 = vld [vmem:[#allocation77_spill] sm:$0xff] }
 0x269   :  { %2205 = vmatprep.mubr.f32.mxu0 %v6455_v37  ;;  %2659 = vmatprep.mubr.f32.mxu1 %v8669_v41  ;;  %v1072_v37 = vpop.f32.mrf.mxu0  ;;  %v8694_v50 = vld [vmem:[#allocation79_spill] sm:$0xff] }
 0x26a   :  { %2849 = vmatprep.subr.mxu0 %v8255_v43  ;;  %3193 = vmatpush2.msra.mxu1 %v8670_v6  ;;  %v1724_v28 = vpop.f32.mrf.mxu1  ;;  %v8691_v6 = vand.u32 4294901760, %v6608_v62 }
 0x26b   :  { %2853 = vmatpush2.msra.mxu0 %v8672_v33  ;;  %3194 = vmatprep.subr.mxu1 %v8255_v43  ;;  %v1085_v31 = vpop.f32.mrf.mxu0  ;;  %v8692_v33 = vand.u32 4294901760, %v6624_v57 }
 0x26c   :  { %2208 = vmatmul.mubr.f32.gmra.mxu0 %v6471_v2  ;;  %2663 = vmatmul.mubr.f32.gmra.mxu1 %v8673_v12  ;;  %v8678_v2 = vld [vmem:[#allocation93_spill] sm:$0xff]  ;;  %v1726_v45 = vpop.f32.mrf.mxu1 }
 0x26d   :  { %2214 = vmatprep.mubr.f32.mxu0 %v6486_v39  ;;  %2670 = vmatprep.mubr.f32.mxu1 %v8674_v61  ;;  %v8679_v59 = vand.u32 4294901760, %v8678_v2  ;;  %v6995_v39 = vadd.f32 %v1710_v1, %v1085_v31  ;;  %v1087_v18 = vpop.f32.mrf.mxu0  ;;  %v3448_v1 = vld [vmem:[#allocation7 + $0x30] sm:$0xff]  ;;  %v8693_v61 = vld [vmem:[#allocation80_spill] sm:$0xff]  ;;  %v7044_v31 = vand.u32 4294901760, %v3447_v5 }
 0x26e   :  { %2854 = vmatprep.subr.mxu0 %v8255_v43  ;;  %3196 = vmatpush2.msra.mxu1 %v8675_v52  ;;  %v8695_v52 = vand.u32 4294901760, %v8694_v50  ;;  %v8698_v45 = vld [vmem:[#allocation82_spill] sm:$0xff] }
 0x26f   :  { %2858 = vmatpush2.msra.mxu0 %v8677_v53  ;;  %3197 = vmatprep.subr.mxu1 %v8255_v43 }
 0x270   :  { %2217 = vmatmul.mubr.f32.gmra.mxu0 %v6494_v3  ;;  %2674 = vmatmul.mubr.f32.gmra.mxu1 %v8679_v59  ;;  %v7005_v3 = vand.u32 4294901760, %v3449_v48  ;;  %v1100_v8 = vpop.f32.mrf.mxu0  ;;  %v1731_v47 = vpop.f32.mrf.mxu1  ;;  %v8697_v59 = vld [vmem:[#allocation83_spill] sm:$0xff] }
 0x271   :  { %2223 = vmatprep.mubr.f32.mxu0 %v6512_v42  ;;  %2681 = vmatprep.mubr.f32.mxu1 %v8680_v30  ;;  %v8685_v42 = vand.u32 4294901760, %v8684_v49  ;;  %v7013_v27 = vadd.f32 %v1717_v58, %v1100_v8  ;;  %v8701_v8 = vand.u32 4294901760, %v6676_v60 }
 0x272   :  { %2859 = vmatprep.subr.mxu0 %v8255_v43  ;;  %3199 = vmatpush2.msra.mxu1 %v8681_v38  ;;  %v1102_v24 = vpop.f32.mrf.mxu0  ;;  %v1733_v16 = vpop.f32.mrf.mxu1  ;;  %v7021_v46 = vsub.f32 %v3449_v48, %v7005_v3  ;;  %v3446_v48 = vld [vmem:[#allocation7 + $0x20] sm:$0xff]  ;;  %v8699_v38 = vand.u32 4294901760, %v8698_v45  ;;  %v8710_v45 = vld [vmem:[#allocation107_spill] sm:$0xff] }
 0x273   :  { %2863 = vmatpush2.msra.mxu0 %v8683_v20  ;;  %3200 = vmatprep.subr.mxu1 %v8255_v43  ;;  %v7063_v20 = vsub.f32 %v3447_v5, %v7044_v31  ;;  %v8702_v24 = vld [vmem:[#allocation84_spill] sm:$0xff] }
 0x274   :  { %2226 = vmatmul.mubr.f32.gmra.mxu0 %v6527_v63  ;;  %2685 = vmatmul.mubr.f32.gmra.mxu1 %v8685_v42  ;;  %v8689_v63 = vld [vmem:[#allocation78_spill] sm:$0xff]  ;;  %v1115_v58 = vpop.f32.mrf.mxu0  ;;  %v7039_v53 = vand.u32 4294901760, %v7021_v46  ;;  %v8700_v42 = vand.u32 4294901760, %v6662_v17  ;;  %v8703_v16 = vld [vmem:[#allocation12_spill] sm:$0xff] }
 0x275   :  { %2232 = vmatprep.mubr.f32.mxu0 %v6534_v11  ;;  %2692 = vmatprep.mubr.f32.mxu1 %v8687_v7  ;;  %v8690_v41 = vand.u32 4294901760, %v8689_v63  ;;  %v7023_v11 = vand.u32 4294901760, %v3448_v1  ;;  %v7032_v12 = vadd.f32 %v1724_v28, %v1115_v58  ;;  %v7073_v7 = vand.u32 4294901760, %v3446_v48 }
 0x276   :  { %2864 = vmatprep.subr.mxu0 %v8255_v43  ;;  %3202 = vmatpush2.msra.mxu1 %v8688_v0  ;;  %v1738_v37 = vpop.f32.mrf.mxu1  ;;  %v1117_v9 = vpop.f32.mrf.mxu0  ;;  %v8704_v0 = vand.u32 4294901760, %v8703_v16  ;;  %v7083_v63 = vand.u32 4294901760, %v7063_v20  ;;  %v8714_v16 = vld [vmem:[#allocation108_spill] sm:$0xff] }
 0x277   :  { %2868 = vmatpush2.msra.mxu0 %v8690_v41  ;;  %3203 = vmatprep.subr.mxu1 %v8255_v43  ;;  %v3445_v41 = vld [vmem:[#allocation7 + $0x18] sm:$0xff] }
 0x278   :  { %2235 = vmatmul.mubr.f32.gmra.mxu0 %v8678_v2  ;;  %2696 = vmatmul.mubr.f32.gmra.mxu1 %v8691_v6  ;;  %v1740_v28 = vpop.f32.mrf.mxu1  ;;  %v8696_v2 = vand.u32 4294901760, %v6646_v44 }
 0x279   :  { %2241 = vmatprep.mubr.f32.mxu0 %v6573_v34  ;;  %2703 = vmatprep.mubr.f32.mxu1 %v8692_v33  ;;  %v7042_v34 = vsub.f32 %v3448_v1, %v7023_v11  ;;  %v8705_v33 = vld [vmem:[#allocation104_spill] sm:$0xff] }
 0x27a   :  { %2869 = vmatprep.subr.mxu0 %v8255_v43  ;;  %3205 = vmatpush2.msra.mxu1 %v8693_v61  ;;  %v1745_v18 = vpop.f32.mrf.mxu1  ;;  %v7093_v61 = vsub.f32 %v3446_v48, %v7073_v7 }
 0x27b   :  { %2873 = vmatpush2.msra.mxu0 %v8695_v52  ;;  %3206 = vmatprep.subr.mxu1 %v8255_v43  ;;  %v1130_v30 = vpop.f32.mrf.mxu0  ;;  %v7060_v10 = vand.u32 4294901760, %v7042_v34  ;;  %v8706_v52 = vld [vmem:[#allocation85_spill] sm:$0xff] }
 0x27c   :  { %2244 = vmatmul.mubr.f32.gmra.mxu0 %v8684_v49  ;;  %2707 = vmatmul.mubr.f32.gmra.mxu1 %v1381_v15  ;;  %v3577_v15 = vsub.f32 %v7021_v46, %v7039_v53  ;;  %v7065_v49 = vadd.f32 %v1731_v47, %v1130_v30  ;;  %v8709_v30 = vld [vmem:[#allocation105_spill] sm:$0xff] }
 0x27d   :  { %2250 = vmatprep.mubr.f32.mxu0 %v8686_v56  ;;  %2714 = vmatprep.mubr.f32.mxu1 %v8696_v2  ;;  %v1132_v1 = vpop.f32.mrf.mxu0  ;;  %v1747_v56 = vpop.f32.mrf.mxu1  ;;  %v3444_v2 = vld [vmem:[#allocation7 + $0x10] sm:$0xff] }
 0x27e   :  { %2874 = vmatprep.subr.mxu0 %v8255_v43  ;;  %3208 = vmatpush2.msra.mxu1 %v8697_v59  ;;  %v3443_v56 = vld [vmem:[#allocation7 + $0x8] sm:$0xff] }
 0x27f   :  { %2878 = vmatpush2.msra.mxu0 %v8699_v38  ;;  %3209 = vmatprep.subr.mxu1 %v8255_v43  ;;  %v1145_v47 = vpop.f32.mrf.mxu0  ;;  %v1752_v5 = vpop.f32.mrf.mxu1 }
 0x280   :  { %2253 = vmatmul.mubr.f32.gmra.mxu0 %v6608_v62  ;;  %2718 = vmatmul.mubr.f32.gmra.mxu1 %v8700_v42  ;;  %v3578_v62 = vand.u32 4294901760, %v3577_v15  ;;  %v7085_v6 = vadd.f32 %v1738_v37, %v1145_v47  ;;  %v7097_v37 = vand.u32 4294901760, %v3445_v41  ;;  %v7110_v15 = vand.u32 4294901760, %v7093_v61 }
 0x281   :  { %2259 = vmatprep.mubr.f32.mxu0 %v6624_v57  ;;  %2725 = vmatprep.mubr.f32.mxu1 %v8701_v8  ;;  %v3584_v57 = vsub.f32 %v7042_v34, %v7060_v10  ;;  %v1147_v58 = vpop.f32.mrf.mxu0  ;;  %v1754_v50 = vpop.f32.mrf.mxu1  ;;  %v7116_v8 = vand.u32 4294901760, %v3444_v2 }
 0x282   :  { %2879 = vmatprep.subr.mxu0 %v8255_v43  ;;  %3211 = vmatpush2.msra.mxu1 %v8702_v24  ;;  %8711 = vst [vmem:[#allocation99_spill] sm:$0xff] %v7110_v15 }
 0x283   :  { %2883 = vmatpush2.msra.mxu0 %v8704_v0  ;;  %3212 = vmatprep.subr.mxu1 %v8255_v43  ;;  %v1160_v9 = vpop.f32.mrf.mxu0 }
 0x284   :  { %2262 = vmatmul.mubr.f32.gmra.mxu0 %v6639_v23  ;;  %2729 = vmatmul.mubr.f32.gmra.mxu1 %v1411_v21  ;;  %v8707_v23 = vld [vmem:[#allocation86_spill] sm:$0xff]  ;;  %v3585_v21 = vand.u32 4294901760, %v3584_v57  ;;  %v7103_v59 = vadd.f32 %v1745_v18, %v1160_v9  ;;  %v1759_v48 = vpop.f32.mrf.mxu1  ;;  %v7114_v18 = vsub.f32 %v3445_v41, %v7097_v37  ;;  %v8717_v9 = vld [vmem:[#allocation111_spill] sm:$0xff] }
 0x285   :  { %2268 = vmatprep.mubr.f32.mxu0 %v6646_v44  ;;  %3216 = vmatprep.mubr.f32.mxu1 %v8705_v33  ;;  %v8708_v28 = vand.u32 4294901760, %v8707_v23  ;;  %v3591_v44 = vsub.f32 %v7063_v20, %v7083_v63  ;;  %v1162_v38 = vpop.f32.mrf.mxu0 }
 0x286   :  { %2884 = vmatprep.subr.mxu0 %v8255_v43  ;;  %3214 = vmatpush2.msra.mxu1 %v8706_v52  ;;  %v1761_v42 = vpop.f32.mrf.mxu1  ;;  %v7130_v58 = vand.u32 4294901760, %v7114_v18 }
 0x287   :  { %2888 = vmatpush2.msra.mxu0 %v8708_v28  ;;  %4440 = vmatprep.subr.mxu1 %v3578_v62 }
 0x288   :  { %2271 = vmatmul.mubr.f32.gmra.mxu0 %v6662_v17  ;;  %3218 = vmatmul.mubr.f32.vlgmr.msra.gmra.mxu1 %v8709_v30  ;;  %v8712_v17 = vld [vmem:[#allocation87_spill] sm:$0xff]  ;;  %v1175_v24 = vpop.f32.mrf.mxu0  ;;  %v1766_v47 = vpop.f32.mrf.mxu1  ;;  %8716 = vst [vmem:[#allocation102_spill] sm:$0xff] %v7130_v58  ;;  %v3605_v38 = vsub.f32 %v7114_v18, %v7130_v58 }
 0x289   :  { %2277 = vmatprep.mubr.f32.mxu0 %v6676_v60  ;;  %3223 = vmatprep.mubr.f32.mxu1 %v8710_v45  ;;  %v8713_v1 = vand.u32 4294901760, %v8712_v17  ;;  %v3592_v60 = vand.u32 4294901760, %v3591_v44  ;;  %v7122_v0 = vadd.f32 %v1752_v5, %v1175_v24  ;;  %v7135_v5 = vand.u32 4294901760, %v3443_v56 }
 0x28a   :  { %2889 = vmatprep.subr.mxu0 %v8255_v43  ;;  %4441 = vmatpush3.msra.mxu1 %v3578_v62  ;;  %v8715_v43 = vld [vmem:[#allocation109_spill] sm:$0xff]  ;;  %v3598_v62 = vsub.f32 %v7093_v61, %v7110_v15  ;;  %v1177_v57 = vpop.f32.mrf.mxu0  ;;  %v1768_v41 = vpop.f32.mrf.mxu1 }
 0x28b   :  { %2893 = vmatpush2.msra.mxu0 %v8713_v1  ;;  %4442 = vmatprep.subr.mxu1 %v3585_v21  ;;  %v8720_v1 = vld [vmem:[#allocation115_spill] sm:$0xff]  ;;  %v3606_v41 = vand.u32 4294901760, %v3605_v38 }
 0x28c   :  { %2280 = vmatmul.mubr.f32.gmra.mxu0 %v6684_v35  ;;  %3225 = vmatmul.mubr.f32.gmra.mxu1 %v8714_v16  ;;  %v7133_v35 = vsub.f32 %v3444_v2, %v7116_v8  ;;  %v3599_v28 = vand.u32 4294901760, %v3598_v62  ;;  %v8721_v62 = vld [vmem:[#allocation116_spill] sm:$0xff]  ;;  %v8724_v38 = vld [vmem:[#allocation119_spill] sm:$0xff] }
 0x28d   :  { %2895 = vmatprep.mubr.f32.mxu0 %v8705_v33  ;;  %3230 = vmatprep.mubr.f32.mxu1 %v8715_v43  ;;  %v3442_v33 = vld [vmem:[#allocation7] sm:$0xff]  ;;  %v1190_v50 = vpop.f32.mrf.mxu0 }
 0x28e   :  { %4421 = vmatprep.subr.mxu0 %v7005_v3  ;;  %4443 = vmatpush3.msra.mxu1 %v3585_v21  ;;  %v1773_v52 = vpop.f32.mrf.mxu1  ;;  %v7139_v23 = vadd.f32 %v1759_v48, %v1190_v50  ;;  %v8718_v21 = vld [vmem:[#allocation114_spill] sm:$0xff]  ;;  %v7151_v48 = vsub.f32 %v3443_v56, %v7135_v5  ;;  %v7153_v42 = vand.u32 4294901760, %v3442_v33 }
 0x28f   :  { %4444 = vmatprep.subr.mxu1 %v3592_v60  ;;  %v1192_v44 = vpop.f32.mrf.mxu0 }
 0x290   :  { %2897 = vmatmul.mubr.f32.vlgmr.msra.gmra.mxu0 %v8709_v30  ;;  %3232 = vmatmul.mubr.f32.gmra.mxu1 %v8717_v9  ;;  %v1775_v2 = vpop.f32.mrf.mxu1  ;;  %v7148_v30 = vand.u32 4294901760, %v7133_v35  ;;  %v7166_v50 = vand.u32 4294901760, %v7151_v48  ;;  %v8723_v44 = vld [vmem:[#allocation118_spill] sm:$0xff] }
 0x291   :  { %4422 = vmatpush3.msra.mxu0 %v7005_v3  ;;  %2902 = vmatprep.mubr.f32.mxu0 %v8710_v45  ;;  %v1205_v45 = vpop.f32.mrf.mxu0 }
 0x292   :  { %3237 = vmatprep.mubr.f32.mxu1 %v8718_v21  ;;  %4423 = vmatprep.subr.mxu0 %v7023_v11  ;;  %8719 = vst [vmem:[#allocation101_spill] sm:$0xff] %v7148_v30  ;;  %v1780_v17 = vpop.f32.mrf.mxu1  ;;  %v7158_v24 = vadd.f32 %v1766_v47, %v1205_v45  ;;  %8722 = vst [vmem:[#allocation106_spill] sm:$0xff] %v7166_v50 }
 0x293   :  { %4424 = vmatpush3.msra.mxu0 %v7023_v11  ;;  %4445 = vmatpush3.msra.mxu1 %v3592_v60  ;;  %v1207_v57 = vpop.f32.mrf.mxu0  ;;  %v3612_v60 = vsub.f32 %v7133_v35, %v7148_v30 }
 0x294   :  { %2904 = vmatmul.mubr.f32.gmra.mxu0 %v8714_v16  ;;  %3239 = vmatmul.mubr.f32.gmra.mxu1 %v8720_v1  ;;  %v1782_v56 = vpop.f32.mrf.mxu1  ;;  %v7169_v16 = vsub.f32 %v3442_v33, %v7153_v42 }
 0x295   :  { %2909 = vmatprep.mubr.f32.mxu0 %v8715_v43  ;;  %3244 = vmatprep.mubr.f32.mxu1 %v8721_v62  ;;  %v3613_v33 = vand.u32 4294901760, %v3612_v60  ;;  %v8727_v60 = vld [vmem:[#allocation122_spill] sm:$0xff] }
 0x296   :  { %4425 = vmatprep.subr.mxu0 %v7044_v31  ;;  %4446 = vmatprep.subr.mxu1 %v3599_v28  ;;  %v1220_v47 = vpop.f32.mrf.mxu0  ;;  %v1787_v43 = vpop.f32.mrf.mxu1  ;;  %v7182_v56 = vand.u32 4294901760, %v7169_v16 }
 0x297   :  { %4426 = vmatpush3.msra.mxu0 %v7044_v31  ;;  %4447 = vmatpush3.msra.mxu1 %v3599_v28  ;;  %v7174_v2 = vadd.f32 %v1773_v52, %v1220_v47  ;;  %v3619_v28 = vsub.f32 %v7151_v48, %v7166_v50 }
 0x298   :  { %2911 = vmatmul.mubr.f32.gmra.mxu0 %v8717_v9  ;;  %3246 = vmatmul.mubr.f32.gmra.mxu1 %v8723_v44  ;;  %v1222_v45 = vpop.f32.mrf.mxu0  ;;  %v1789_v57 = vpop.f32.mrf.mxu1  ;;  %8725 = vst [vmem:[#allocation16_spill] sm:$0xff] %v7182_v56 }
 0x299   :  { %2916 = vmatprep.mubr.f32.mxu0 %v8718_v21  ;;  %3251 = vmatprep.mubr.f32.mxu1 %v8724_v38  ;;  %v8726_v21 = vld [vmem:[#allocation120_spill] sm:$0xff]  ;;  %v3620_v50 = vand.u32 4294901760, %v3619_v28 }
 0x29a   :  { %4427 = vmatprep.subr.mxu0 %v7073_v7  ;;  %4448 = vmatprep.subr.mxu1 %v3606_v41  ;;  %v1235_v52 = vpop.f32.mrf.mxu0  ;;  %v1794_v9 = vpop.f32.mrf.mxu1 }
 0x29b   :  { %4428 = vmatpush3.msra.mxu0 %v7073_v7  ;;  %4449 = vmatpush3.msra.mxu1 %v3606_v41  ;;  %v7187_v47 = vadd.f32 %v1780_v17, %v1235_v52  ;;  %v3626_v41 = vsub.f32 %v7169_v16, %v7182_v56  ;;  %v8728_v17 = vld [vmem:[#allocation123_spill] sm:$0xff]  ;;  %v8729_v52 = vld [vmem:[#allocation124_spill] sm:$0xff] }
 0x29c   :  { %2918 = vmatmul.mubr.f32.gmra.mxu0 %v8720_v1  ;;  %3253 = vmatmul.mubr.f32.gmra.mxu1 %v8726_v21  ;;  %v1237_v45 = vpop.f32.mrf.mxu0  ;;  %v1796_v57 = vpop.f32.mrf.mxu1 }
 0x29d   :  { %2923 = vmatprep.mubr.f32.mxu0 %v8721_v62  ;;  %3258 = vmatprep.mubr.f32.mxu1 %v8727_v60  ;;  %v3627_v57 = vand.u32 4294901760, %v3626_v41 }
 0x29e   :  { %4429 = vmatprep.subr.mxu0 %v7097_v37  ;;  %4450 = vmatprep.subr.mxu1 %v3613_v33  ;;  %v1250_v1 = vpop.f32.mrf.mxu0 }
 0x29f   :  { %4430 = vmatpush3.msra.mxu0 %v7097_v37  ;;  %4451 = vmatpush3.msra.mxu1 %v3613_v33  ;;  %v1801_v30 = vpop.f32.mrf.mxu1  ;;  %v7197_v62 = vadd.f32 %v1787_v43, %v1250_v1 }
 0x2a0   :  { %2925 = vmatmul.mubr.f32.gmra.mxu0 %v8723_v44  ;;  %3260 = vmatmul.mubr.f32.gmra.mxu1 %v8728_v17  ;;  %v1252_v45 = vpop.f32.mrf.mxu0  ;;  %v8730_v44 = vld [vmem:[#allocation125_spill] sm:$0xff] }
 0x2a1   :  { %2930 = vmatprep.mubr.f32.mxu0 %v8724_v38  ;;  %3265 = vmatprep.mubr.f32.mxu1 %v8729_v52  ;;  %v1803_v28 = vpop.f32.mrf.mxu1  ;;  %v8731_v38 = vld [vmem:[#allocation126_spill] sm:$0xff] }
 0x2a2   :  { %4431 = vmatprep.subr.mxu0 %v7116_v8  ;;  %4452 = vmatprep.subr.mxu1 %v3620_v50 }
 0x2a3   :  { %4432 = vmatpush3.msra.mxu0 %v7116_v8  ;;  %4453 = vmatpush3.msra.mxu1 %v3620_v50  ;;  %v1265_v33 = vpop.f32.mrf.mxu0  ;;  %v1808_v56 = vpop.f32.mrf.mxu1 }
 0x2a4   :  { %2932 = vmatmul.mubr.f32.gmra.mxu0 %v8726_v21  ;;  %3267 = vmatmul.mubr.f32.gmra.mxu1 %v8730_v44  ;;  %v7205_v43 = vadd.f32 %v1794_v9, %v1265_v33  ;;  %v8732_v21 = vld [vmem:[#allocation127_spill] sm:$0xff] }
 0x2a5   :  { %2937 = vmatprep.mubr.f32.mxu0 %v8727_v60  ;;  %3272 = vmatprep.mubr.f32.mxu1 %v8731_v38  ;;  %v1267_v1 = vpop.f32.mrf.mxu0  ;;  %v1810_v45 = vpop.f32.mrf.mxu1  ;;  %v8734_v60 = vld [vmem:[#allocation128_spill] sm:$0xff] }
 0x2a6   :  { %4433 = vmatprep.subr.mxu0 %v7135_v5  ;;  %4454 = vmatprep.subr.mxu1 %v3627_v57 }
 0x2a7   :  { %4434 = vmatpush3.msra.mxu0 %v7135_v5  ;;  %4455 = vmatpush3.msra.mxu1 %v3627_v57  ;;  %v1280_v50 = vpop.f32.mrf.mxu0  ;;  %v1815_v41 = vpop.f32.mrf.mxu1 }
 0x2a8   :  { %2939 = vmatmul.mubr.f32.gmra.mxu0 %v8728_v17  ;;  %3274 = vmatmul.mubr.f32.gmra.mxu1 %v8732_v21  ;;  %v7213_v9 = vadd.f32 %v1801_v30, %v1280_v50  ;;  %v8735_v17 = vld [vmem:[#allocation129_spill] sm:$0xff] }
 0x2a9   :  { %2944 = vmatprep.mubr.f32.mxu0 %v8729_v52  ;;  %3279 = vmatprep.mubr.f32.mxu1 %v8734_v60  ;;  %v1282_v28 = vpop.f32.mrf.mxu0  ;;  %v1817_v33 = vpop.f32.mrf.mxu1  ;;  %v8737_v52 = vld [vmem:[#allocation130_spill] sm:$0xff] }
 0x2aa   :  { %8733 = vst [vmem:[#allocation17_spill] sm:$0xff] %v7213_v9  ;;  %4435 = vmatprep.subr.mxu0 %v7153_v42  ;;  %4478 = vmatprep.subr.mxu1 %v7005_v3  ;;  %v8738_v9 = vld [vmem:[#allocation132_spill] sm:$0xff] }
 0x2ab   :  { %4436 = vmatpush3.msra.mxu0 %v7153_v42  ;;  %v1295_v57 = vpop.f32.mrf.mxu0  ;;  %v1822_v1 = vpop.f32.mrf.mxu1 }
 0x2ac   :  { %2946 = vmatmul.mubr.f32.gmra.mxu0 %v8730_v44  ;;  %3281 = vmatmul.mubr.f32.gmra.mxu1 %v8735_v17  ;;  %v7222_v30 = vadd.f32 %v1808_v56, %v1295_v57  ;;  %v8740_v56 = vld [vmem:[#allocation133_spill] sm:$0xff] }
 0x2ad   :  { %2951 = vmatprep.mubr.f32.mxu0 %v8731_v38  ;;  %3286 = vmatprep.mubr.f32.mxu1 %v8737_v52  ;;  %v1297_v45 = vpop.f32.mrf.mxu0  ;;  %v1824_v50 = vpop.f32.mrf.mxu1 }
 0x2ae   :  { %8736 = vst [vmem:[#allocation110_spill] sm:$0xff] %v7222_v30  ;;  %4459 = vmatprep.subr.mxu0 %v7021_v46  ;;  %v8741_v45 = vld [vmem:[#allocation135_spill] sm:$0xff] }
 0x2af   :  { %v1310_v28 = vpop.f32.mrf.mxu0  ;;  %v1829_v33 = vpop.f32.mrf.mxu1 }
 0x2b0   :  { %2953 = vmatmul.mubr.f32.gmra.mxu0 %v8732_v21  ;;  %3288 = vmatmul.mubr.f32.gmra.mxu1 %v8738_v9  ;;  %v7229_v58 = vadd.f32 %v1815_v41, %v1310_v28  ;;  %v8743_v21 = vld [vmem:[#allocation136_spill] sm:$0xff] }
 0x2b1   :  { %2958 = vmatprep.mubr.f32.mxu0 %v8734_v60  ;;  %3293 = vmatprep.mubr.f32.mxu1 %v8740_v56  ;;  %v1312_v44 = vpop.f32.mrf.mxu0  ;;  %v1831_v38 = vpop.f32.mrf.mxu1 }
 0x2b2   :  { %8739 = vst [vmem:[#allocation112_spill] sm:$0xff] %v7229_v58  ;;  %v8744_v44 = vld [vmem:[#allocation137_spill] sm:$0xff] }
 0x2b3   :  { %v1325_v57 = vpop.f32.mrf.mxu0  ;;  %v1836_v30 = vpop.f32.mrf.mxu1 }
 0x2b4   :  { %2960 = vmatmul.mubr.f32.gmra.mxu0 %v8735_v17  ;;  %3295 = vmatmul.mubr.f32.gmra.mxu1 %v8741_v45  ;;  %v7235_v50 = vadd.f32 %v1822_v1, %v1325_v57  ;;  %v8746_v17 = vld [vmem:[#allocation60_spill] sm:$0xff] }
 0x2b5   :  { %2965 = vmatprep.mubr.f32.mxu0 %v8737_v52  ;;  %3300 = vmatprep.mubr.f32.mxu1 %v8743_v21  ;;  %v1327_v41 = vpop.f32.mrf.mxu0  ;;  %v1838_v28 = vpop.f32.mrf.mxu1 }
 0x2b6   :  { %8742 = vst [vmem:[#allocation18_spill] sm:$0xff] %v7235_v50  ;;  %v8747_v41 = vld [vmem:[#allocation138_spill] sm:$0xff] }
 0x2b7   :  { %v1340_v58 = vpop.f32.mrf.mxu0  ;;  %v1843_v60 = vpop.f32.mrf.mxu1 }
 0x2b8   :  { %2967 = vmatmul.mubr.f32.gmra.mxu0 %v8738_v9  ;;  %3302 = vmatmul.mubr.f32.gmra.mxu1 %v8744_v44  ;;  %v7241_v38 = vadd.f32 %v1829_v33, %v1340_v58  ;;  %v8749_v9 = vld [vmem:[#allocation139_spill] sm:$0xff] }
 0x2b9   :  { %2972 = vmatprep.mubr.f32.mxu0 %v8740_v56  ;;  %3307 = vmatprep.mubr.f32.mxu1 %v8746_v17  ;;  %v1342_v1 = vpop.f32.mrf.mxu0  ;;  %v1845_v57 = vpop.f32.mrf.mxu1 }
 0x2ba   :  { %8745 = vst [vmem:[#allocation113_spill] sm:$0xff] %v7241_v38  ;;  %v8750_v1 = vld [vmem:[#allocation63_spill] sm:$0xff] }
 0x2bb   :  { %v1355_v50 = vpop.f32.mrf.mxu0  ;;  %v1850_v52 = vpop.f32.mrf.mxu1 }
 0x2bc   :  { %2974 = vmatmul.mubr.f32.gmra.mxu0 %v8741_v45  ;;  %3309 = vmatmul.mubr.f32.gmra.mxu1 %v8747_v41  ;;  %v7247_v28 = vadd.f32 %v1836_v30, %v1355_v50  ;;  %v8752_v45 = vld [vmem:[#allocation141_spill] sm:$0xff] }
 0x2bd   :  { %2979 = vmatprep.mubr.f32.mxu0 %v8743_v21  ;;  %3314 = vmatprep.mubr.f32.mxu1 %v8749_v9  ;;  %v1357_v58 = vpop.f32.mrf.mxu0  ;;  %v1852_v33 = vpop.f32.mrf.mxu1 }
 0x2be   :  { %8748 = vst [vmem:[#allocation22_spill] sm:$0xff] %v7247_v28  ;;  %v8753_v58 = vld [vmem:[#allocation68_spill] sm:$0xff] }
 0x2bf   :  { %v1370_v38 = vpop.f32.mrf.mxu0  ;;  %v1857_v56 = vpop.f32.mrf.mxu1 }
 0x2c0   :  { %2981 = vmatmul.mubr.f32.gmra.mxu0 %v8744_v44  ;;  %3316 = vmatmul.mubr.f32.gmra.mxu1 %v8750_v1  ;;  %v7253_v57 = vadd.f32 %v1843_v60, %v1370_v38  ;;  %v8755_v44 = vld [vmem:[#allocation67_spill] sm:$0xff] }
 0x2c1   :  { %2986 = vmatprep.mubr.f32.mxu0 %v8746_v17  ;;  %3321 = vmatprep.mubr.f32.mxu1 %v8752_v45  ;;  %v1372_v30 = vpop.f32.mrf.mxu0  ;;  %v1859_v50 = vpop.f32.mrf.mxu1 }
 0x2c2   :  { %8751 = vst [vmem:[#allocation23_spill] sm:$0xff] %v7253_v57  ;;  %v8756_v30 = vld [vmem:[#allocation144_spill] sm:$0xff] }
 0x2c3   :  { %v1385_v28 = vpop.f32.mrf.mxu0 }
 0x2c4   :  { %v1864_v21 = vpop.f32.mrf.mxu1  ;;  %2988 = vmatmul.mubr.f32.gmra.mxu0 %v8747_v41  ;;  %3323 = vmatmul.mubr.f32.gmra.mxu1 %v8753_v58  ;;  %v7259_v33 = vadd.f32 %v1850_v52, %v1385_v28  ;;  %v8758_v41 = vld [vmem:[#allocation145_spill] sm:$0xff] }
 0x2c5   :  { %2993 = vmatprep.mubr.f32.mxu0 %v8749_v9  ;;  %3328 = vmatprep.mubr.f32.mxu1 %v8755_v44  ;;  %v1387_v60 = vpop.f32.mrf.mxu0 }
 0x2c6   :  { %8754 = vst [vmem:[#allocation117_spill] sm:$0xff] %v7259_v33  ;;  %v1866_v38 = vpop.f32.mrf.mxu1  ;;  %v8759_v60 = vld [vmem:[#allocation146_spill] sm:$0xff] }
 0x2c7   :  { %v1400_v57 = vpop.f32.mrf.mxu0 }
 0x2c8   :  { %v2389_v17 = vpop.f32.mrf.mxu1  ;;  %2995 = vmatmul.mubr.f32.gmra.mxu0 %v8750_v1  ;;  %3330 = vmatmul.mubr.f32.gmra.mxu1 %v8756_v30  ;;  %v7265_v50 = vadd.f32 %v1857_v56, %v1400_v57  ;;  %v8761_v1 = vld [vmem:[#allocation147_spill] sm:$0xff] }
 0x2c9   :  { %3000 = vmatprep.mubr.f32.mxu0 %v8752_v45  ;;  %3335 = vmatprep.mubr.f32.mxu1 %v8758_v41  ;;  %v1402_v52 = vpop.f32.mrf.mxu0 }
 0x2ca   :  { %8757 = vst [vmem:[#allocation19_spill] sm:$0xff] %v7265_v50  ;;  %v2391_v28 = vpop.f32.mrf.mxu1  ;;  %v8762_v52 = vld [vmem:[#allocation71_spill] sm:$0xff] }
 0x2cc   :  { %v1415_v33 = vpop.f32.mrf.mxu0  ;;  %v2400_v9 = vpop.f32.mrf.mxu1  ;;  %3002 = vmatmul.mubr.f32.gmra.mxu0 %v8753_v58  ;;  %3337 = vmatmul.mubr.f32.gmra.mxu1 %v8759_v60  ;;  %v8763_v58 = vld [vmem:[#allocation70_spill] sm:$0xff] }
 0x2cd   :  { %v7271_v38 = vadd.f32 %v1864_v21, %v1415_v33  ;;  %3007 = vmatprep.mubr.f32.mxu0 %v8755_v44  ;;  %3342 = vmatprep.mubr.f32.mxu1 %v8761_v1 }
 0x2ce   :  { %v1417_v56 = vpop.f32.mrf.mxu0  ;;  %v2402_v57 = vpop.f32.mrf.mxu1 }
 0x2cf   :  { %8760 = vst [vmem:[#allocation24_spill] sm:$0xff] %v7271_v38  ;;  %v8764_v56 = vld [vmem:[#allocation13_spill] sm:$0xff] }
 0x2d0   :  { %v2002_v50 = vpop.f32.mrf.mxu0  ;;  %v2411_v45 = vpop.f32.mrf.mxu1  ;;  %3009 = vmatmul.mubr.f32.gmra.mxu0 %v8756_v30  ;;  %3344 = vmatmul.mubr.f32.gmra.mxu1 %v8762_v52  ;;  %v8765_v57 = vld [vmem:[#allocation81_spill] sm:$0xff] }
 0x2d1   :  { %v2003_v28 = vadd.f32 %v2002_v50, %v6839_v36  ;;  %3014 = vmatprep.mubr.f32.mxu0 %v8758_v41  ;;  %3349 = vmatprep.mubr.f32.mxu1 %v8763_v58 }
 0x2d2   :  { %v2004_v21 = vpop.f32.mrf.mxu0  ;;  %v2413_v33 = vpop.f32.mrf.mxu1 }
 0x2d3   :  { %v7280_v38 = vadd.f32 %v2389_v17, %v2003_v28  ;;  %v8766_v17 = vld [vmem:[#allocation91_spill] sm:$0xff]  ;;  %v8767_v28 = vld [vmem:[#allocation148_spill] sm:$0xff] }
 0x2d4   :  { %v2011_v44 = vpop.f32.mrf.mxu0  ;;  %v2422_v15 = vpop.f32.mrf.mxu1  ;;  %3016 = vmatmul.mubr.f32.gmra.mxu0 %v8759_v60  ;;  %3351 = vmatmul.mubr.f32.gmra.mxu1 %v8764_v56 }
 0x2d5   :  { %v2012_v30 = vadd.f32 %v2011_v44, %v6861_v55  ;;  %3021 = vmatprep.mubr.f32.mxu0 %v8761_v1  ;;  %3356 = vmatprep.mubr.f32.mxu1 %v8765_v57 }
 0x2d6   :  { %v2013_v36 = vpop.f32.mrf.mxu0  ;;  %v2424_v50 = vpop.f32.mrf.mxu1 }
 0x2d7   :  { %v7287_v41 = vadd.f32 %v2400_v9, %v2012_v30  ;;  %v8768_v9 = vld [vmem:[#allocation90_spill] sm:$0xff] }
 0x2d8   :  { %v2020_v21 = vpop.f32.mrf.mxu0  ;;  %v2433_v33 = vpop.f32.mrf.mxu1  ;;  %3023 = vmatmul.mubr.f32.gmra.mxu0 %v8762_v52  ;;  %3358 = vmatmul.mubr.f32.gmra.mxu1 %v8766_v17  ;;  %v8769_v30 = vld [vmem:[#allocation150_spill] sm:$0xff] }
 0x2d9   :  { %v2021_v60 = vadd.f32 %v2020_v21, %v6879_v22  ;;  %3028 = vmatprep.mubr.f32.mxu0 %v8763_v58  ;;  %3363 = vmatprep.mubr.f32.mxu1 %v8767_v28 }
 0x2da   :  { %v2022_v55 = vpop.f32.mrf.mxu0  ;;  %v2435_v1 = vpop.f32.mrf.mxu1 }
 0x2db   :  { %v7294_v44 = vadd.f32 %v2411_v45, %v2021_v60  ;;  %v8770_v45 = vld [vmem:[#allocation151_spill] sm:$0xff]  ;;  %v8771_v60 = vld [vmem:[#allocation92_spill] sm:$0xff] }
 0x2dc   :  { %v2029_v36 = vpop.f32.mrf.mxu0  ;;  %v2444_v50 = vpop.f32.mrf.mxu1  ;;  %3030 = vmatmul.mubr.f32.gmra.mxu0 %v8764_v56  ;;  %3365 = vmatmul.mubr.f32.gmra.mxu1 %v8768_v9 }
 0x2dd   :  { %v2030_v52 = vadd.f32 %v2029_v36, %v6900_v25  ;;  %3035 = vmatprep.mubr.f32.mxu0 %v8765_v57  ;;  %3370 = vmatprep.mubr.f32.mxu1 %v8769_v30 }
 0x2de   :  { %v2031_v22 = vpop.f32.mrf.mxu0  ;;  %v2446_v58 = vpop.f32.mrf.mxu1 }
 0x2df   :  { %v7301_v21 = vadd.f32 %v2422_v15, %v2030_v52  ;;  %v8772_v15 = vld [vmem:[#allocation89_spill] sm:$0xff]  ;;  %v8773_v52 = vld [vmem:[#allocation88_spill] sm:$0xff] }
 0x2e0   :  { %v2038_v55 = vpop.f32.mrf.mxu0  ;;  %v2455_v1 = vpop.f32.mrf.mxu1  ;;  %3037 = vmatmul.mubr.f32.gmra.mxu0 %v8766_v17  ;;  %3372 = vmatmul.mubr.f32.gmra.mxu1 %v8770_v45 }
 0x2e1   :  { %v2039_v56 = vadd.f32 %v2038_v55, %v6913_v32  ;;  %3042 = vmatprep.mubr.f32.mxu0 %v8767_v28  ;;  %3377 = vmatprep.mubr.f32.mxu1 %v8771_v60 }
 0x2e2   :  { %v2040_v25 = vpop.f32.mrf.mxu0  ;;  %v2457_v57 = vpop.f32.mrf.mxu1 }
 0x2e3   :  { %v7308_v36 = vadd.f32 %v2433_v33, %v2039_v56  ;;  %v8774_v33 = vld [vmem:[#allocation152_spill] sm:$0xff]  ;;  %v8775_v56 = vld [vmem:[#allocation153_spill] sm:$0xff] }
 0x2e4   :  { %v2047_v22 = vpop.f32.mrf.mxu0  ;;  %v2466_v58 = vpop.f32.mrf.mxu1  ;;  %3044 = vmatmul.mubr.f32.gmra.mxu0 %v8768_v9  ;;  %3379 = vmatmul.mubr.f32.gmra.mxu1 %v8772_v15 }
 0x2e5   :  { %v2048_v17 = vadd.f32 %v2047_v22, %v6928_v14  ;;  %3049 = vmatprep.mubr.f32.mxu0 %v8769_v30  ;;  %3384 = vmatprep.mubr.f32.mxu1 %v8773_v52 }
 0x2e6   :  { %v2049_v32 = vpop.f32.mrf.mxu0  ;;  %v2468_v28 = vpop.f32.mrf.mxu1 }
 0x2e7   :  { %v7315_v55 = vadd.f32 %v2444_v50, %v2048_v17  ;;  %v8776_v50 = vld [vmem:[#allocation154_spill] sm:$0xff]  ;;  %v8777_v17 = vld [vmem:[#allocation155_spill] sm:$0xff] }
 0x2e8   :  { %v2056_v25 = vpop.f32.mrf.mxu0  ;;  %v2477_v57 = vpop.f32.mrf.mxu1  ;;  %3051 = vmatmul.mubr.f32.gmra.mxu0 %v8770_v45  ;;  %3386 = vmatmul.mubr.f32.gmra.mxu1 %v8774_v33 }
 0x2e9   :  { %v2057_v9 = vadd.f32 %v2056_v25, %v6949_v26  ;;  %3056 = vmatprep.mubr.f32.mxu0 %v8771_v60  ;;  %3391 = vmatprep.mubr.f32.mxu1 %v8775_v56 }
 0x2ea   :  { %v2058_v14 = vpop.f32.mrf.mxu0  ;;  %v2479_v30 = vpop.f32.mrf.mxu1 }
 0x2eb   :  { %v7322_v22 = vadd.f32 %v2455_v1, %v2057_v9  ;;  %v8779_v1 = vld [vmem:[#allocation94_spill] sm:$0xff]  ;;  %v8780_v9 = vld [vmem:[#allocation96_spill] sm:$0xff] }
 0x2ec   :  { %v2065_v32 = vpop.f32.mrf.mxu0  ;;  %v2488_v28 = vpop.f32.mrf.mxu1  ;;  %3058 = vmatmul.mubr.f32.gmra.mxu0 %v8772_v15  ;;  %3393 = vmatmul.mubr.f32.gmra.mxu1 %v8776_v50 }
 0x2ed   :  { %v2066_v45 = vadd.f32 %v2065_v32, %v6962_v4  ;;  %3063 = vmatprep.mubr.f32.mxu0 %v8773_v52  ;;  %3398 = vmatprep.mubr.f32.mxu1 %v8777_v17  ;;  %v3440_v32 = vld [vmem:[#allocation2] sm:$0xff] }
 0x2ee   :  { %v2067_v26 = vpop.f32.mrf.mxu0  ;;  %v2490_v60 = vpop.f32.mrf.mxu1 }
 0x2ef   :  { %v7329_v25 = vadd.f32 %v2466_v58, %v2066_v45  ;;  %v8782_v60 = vld [vmem:[#allocation95_spill] sm:$0xff] }
 0x2f0   :  { %v2074_v14 = vpop.f32.mrf.mxu0  ;;  %v2499_v30 = vpop.f32.mrf.mxu1  ;;  %3065 = vmatmul.mubr.f32.gmra.mxu0 %v8774_v33  ;;  %3400 = vmatmul.mubr.f32.gmra.mxu1 %v8779_v1 }
 0x2f1   :  { %8778 = vst [vmem:[#allocation20_spill] sm:$0xff] %v7329_v25  ;;  %v2075_v15 = vadd.f32 %v2074_v14, %v6978_v54  ;;  %3070 = vmatprep.mubr.f32.mxu0 %v8775_v56  ;;  %3405 = vmatprep.mubr.f32.mxu1 %v8780_v9  ;;  %v8783_v54 = vld [vmem:[#allocation98_spill] sm:$0xff] }
 0x2f2   :  { %v2076_v4 = vpop.f32.mrf.mxu0  ;;  %v2501_v52 = vpop.f32.mrf.mxu1 }
 0x2f3   :  { %v7336_v26 = vadd.f32 %v2477_v57, %v2075_v15  ;;  %v3441_v4 = vld [vmem:[#allocation2 + $0x8] sm:$0xff]  ;;  %v3459_v52 = vsel %vm3457_vm0, %v3440_v32, 0 }
 0x2f4   :  { %v2083_v58 = vpop.f32.mrf.mxu0  ;;  %v2510_v45 = vpop.f32.mrf.mxu1  ;;  %3072 = vmatmul.mubr.f32.gmra.mxu0 %v8776_v50  ;;  %3407 = vmatmul.mubr.f32.gmra.mxu1 %v8782_v60  ;;  %v8784_v50 = vld [vmem:[#allocation100_spill] sm:$0xff] }
 0x2f5   :  { %8781 = vst [vmem:[#allocation26_spill] sm:$0xff] %v7336_v26  ;;  %v2084_v33 = vadd.f32 %v2083_v58, %v6995_v39  ;;  %3077 = vmatprep.mubr.f32.mxu0 %v8777_v17  ;;  %3412 = vmatprep.mubr.f32.mxu1 %v8783_v54  ;;  %v8785_v39 = vld [vmem:[#allocation157_spill] sm:$0xff]  ;;  %v3462_v17 = vsel %vm3457_vm0, %v3441_v4, 0  ;;  %v7352_v58 = vand.u32 4294901760, %v3459_v52 }
 0x2f6   :  { %v2085_v56 = vpop.f32.mrf.mxu0  ;;  %v2512_v14 = vpop.f32.mrf.mxu1 }
 0x2f7   :  { %v7344_v25 = vadd.f32 %v2488_v28, %v2084_v33 }
 0x2f8   :  { %v2092_v57 = vpop.f32.mrf.mxu0  ;;  %v2521_v15 = vpop.f32.mrf.mxu1  ;;  %3079 = vmatmul.mubr.f32.gmra.mxu0 %v8779_v1  ;;  %3414 = vmatmul.mubr.f32.gmra.mxu1 %v8784_v50  ;;  %v7358_v1 = vand.u32 4294901760, %v3462_v17 }
 0x2f9   :  { %v2093_v26 = vadd.f32 %v2092_v57, %v7013_v27  ;;  %3084 = vmatprep.mubr.f32.mxu0 %v8780_v9  ;;  %3419 = vmatprep.mubr.f32.mxu1 %v8785_v39  ;;  %v7364_v9 = vsub.f32 %v3459_v52, %v7352_v58 }
 0x2fa   :  { %v2094_v56 = vpop.f32.mrf.mxu0  ;;  %v2523_v32 = vpop.f32.mrf.mxu1 }
 0x2fb   :  { %v7354_v28 = vadd.f32 %v2499_v30, %v2093_v26 }
 0x2fc   :  { %v2101_v33 = vpop.f32.mrf.mxu0  ;;  %v2532_v14 = vpop.f32.mrf.mxu1  ;;  %3086 = vmatmul.mubr.f32.gmra.mxu0 %v8782_v60  ;;  %3421 = vmatmul.mubr.f32.gmra.mxu1 %v6619_v51  ;;  %v7371_v60 = vsub.f32 %v3462_v17, %v7358_v1 }
 0x2fd   :  { %v2102_v27 = vadd.f32 %v2101_v33, %v7032_v12  ;;  %3091 = vmatprep.mubr.f32.mxu0 %v8783_v54  ;;  %3426 = vmatprep.mubr.f32.mxu1 %v6629_v29  ;;  %v3539_v54 = vand.u32 4294901760, %v7364_v9 }
 0x2fe   :  { %v2103_v4 = vpop.f32.mrf.mxu0  ;;  %v2534_v30 = vpop.f32.mrf.mxu1 }
 0x2ff   :  { %v7366_v26 = vadd.f32 %v2510_v45, %v2102_v27 }
 0x300   :  { %v2110_v57 = vpop.f32.mrf.mxu0  ;;  %v2543_v56 = vpop.f32.mrf.mxu1  ;;  %3093 = vmatmul.mubr.f32.gmra.mxu0 %v8784_v50  ;;  %3428 = vmatmul.mubr.f32.gmra.mxu1 %v6649_v40  ;;  %v3549_v50 = vand.u32 4294901760, %v7371_v60 }
 0x301   :  { %v2111_v12 = vadd.f32 %v2110_v57, %v7065_v49  ;;  %3098 = vmatprep.mubr.f32.mxu0 %v8785_v39  ;;  %3433 = vmatprep.mubr.f32.mxu1 %v6665_v19  ;;  %v3540_v39 = vsub.f32 %v7364_v9, %v3539_v54 }
 0x302   :  { %v2112_v52 = vpop.f32.mrf.mxu0  ;;  %v2545_v45 = vpop.f32.mrf.mxu1 }
 0x303   :  { %v7377_v32 = vadd.f32 %v2521_v15, %v2111_v12 }
 0x304   :  { %v2119_v33 = vpop.f32.mrf.mxu0  ;;  %v2554_v27 = vpop.f32.mrf.mxu1  ;;  %3100 = vmatmul.mubr.f32.gmra.mxu0 %v6619_v51  ;;  %3435 = vmatmul.mubr.f32.gmra.mxu1 %v6673_v13  ;;  %v3550_v51 = vsub.f32 %v7371_v60, %v3549_v50 }
 0x305   :  { %v2120_v49 = vadd.f32 %v2119_v33, %v7085_v6  ;;  %3105 = vmatprep.mubr.f32.mxu0 %v6629_v29  ;;  %4456 = vmatprep.mubr.f32.mxu1 %v7352_v58  ;;  %v3541_v6 = vand.u32 4294901760, %v3540_v39 }
 0x306   :  { %v2121_v17 = vpop.f32.mrf.mxu0  ;;  %v2556_v4 = vpop.f32.mrf.mxu1  ;;  %v3551_v33 = vand.u32 4294901760, %v3550_v51 }
 0x307   :  { %v7386_v15 = vadd.f32 %v2532_v14, %v2120_v49 }
 0x308   :  { %v2128_v30 = vpop.f32.mrf.mxu0  ;;  %v2565_v57 = vpop.f32.mrf.mxu1  ;;  %3107 = vmatmul.mubr.f32.gmra.mxu0 %v6649_v40  ;;  %4457 = vmatmul.mubr.f32.vlgmr.msra.gmra.mxu1 %v7358_v1 }
 0x309   :  { %v2129_v29 = vadd.f32 %v2128_v30, %v7103_v59  ;;  %3112 = vmatprep.mubr.f32.mxu0 %v6665_v19  ;;  %4479 = vmatpush3.msra.mxu1 %v7005_v3 }
 0x30a   :  { %v2130_v12 = vpop.f32.mrf.mxu0  ;;  %v2567_v14 = vpop.f32.mrf.mxu1  ;;  %4480 = vmatprep.subr.mxu1 %v7023_v11  ;;  %4494 = vmatprep.mubr.f32.mxu1 %v3539_v54 }
 0x30b   :  { %4481 = vmatpush3.msra.mxu1 %v7023_v11  ;;  %v7398_v40 = vadd.f32 %v2543_v56, %v2129_v29  ;;  %v8786_v14 = vld [vmem:[#allocation99_spill] sm:$0xff] }
 0x30c   :  { %v2137_v52 = vpop.f32.mrf.mxu0  ;;  %v2576_v45 = vpop.f32.mrf.mxu1  ;;  %3114 = vmatmul.mubr.f32.gmra.mxu0 %v6673_v13  ;;  %4482 = vmatprep.subr.mxu1 %v7044_v31 }
 0x30d   :  { %v2138_v19 = vadd.f32 %v2137_v52, %v7122_v0  ;;  %4437 = vmatprep.mubr.f32.mxu0 %v3541_v6  ;;  %4483 = vmatpush3.msra.mxu1 %v7044_v31 }
 0x30e   :  { %v2139_v59 = vpop.f32.mrf.mxu0  ;;  %v2578_v49 = vpop.f32.mrf.mxu1  ;;  %4484 = vmatprep.subr.mxu1 %v7073_v7 }
 0x30f   :  { %4485 = vmatpush3.msra.mxu1 %v7073_v7  ;;  %v7406_v56 = vadd.f32 %v2554_v27, %v2138_v19  ;;  %v8789_v19 = vld [vmem:[#allocation101_spill] sm:$0xff] }
 0x310   :  { %v2146_v54 = vpop.f32.mrf.mxu0  ;;  %v2587_v39 = vpop.f32.mrf.mxu1  ;;  %4438 = vmatmul.mubr.f32.vlgmr.msra.gmra.mxu0 %v3551_v33  ;;  %4486 = vmatprep.subr.mxu1 %v7097_v37 }
 0x311   :  { %v2147_v13 = vadd.f32 %v2146_v54, %v7139_v23  ;;  %4460 = vmatpush3.msra.mxu0 %v7021_v46  ;;  %4487 = vmatpush3.msra.mxu1 %v7097_v37  ;;  %v8790_v54 = vld [vmem:[#allocation106_spill] sm:$0xff] }
 0x312   :  { %4461 = vmatprep.subr.mxu0 %v7042_v34  ;;  %v2148_v0 = vpop.f32.mrf.mxu0  ;;  %v2589_v17 = vpop.f32.mrf.mxu1  ;;  %4488 = vmatprep.subr.mxu1 %v7116_v8 }
 0x313   :  { %4462 = vmatpush3.msra.mxu0 %v7042_v34  ;;  %4489 = vmatpush3.msra.mxu1 %v7116_v8  ;;  %v7416_v27 = vadd.f32 %v2565_v57, %v2147_v13  ;;  %v8791_v13 = vld [vmem:[#allocation110_spill] sm:$0xff]  ;;  %v8792_v17 = vld [vmem:[#allocation16_spill] sm:$0xff] }
 0x314   :  { %4463 = vmatprep.subr.mxu0 %v7063_v20  ;;  %v2155_v4 = vpop.f32.mrf.mxu0  ;;  %v2598_v23 = vpop.f32.mrf.mxu1  ;;  %4490 = vmatprep.subr.mxu1 %v7135_v5 }
 0x315   :  { %v2156_v46 = vadd.f32 %v2155_v4, %v7158_v24  ;;  %4464 = vmatpush3.msra.mxu0 %v7063_v20  ;;  %4491 = vmatpush3.msra.mxu1 %v7135_v5 }
 0x316   :  { %4465 = vmatprep.subr.mxu0 %v7093_v61  ;;  %v2157_v30 = vpop.f32.mrf.mxu0  ;;  %v2600_v34 = vpop.f32.mrf.mxu1  ;;  %4492 = vmatprep.subr.mxu1 %v7153_v42 }
 0x317   :  { %4466 = vmatpush3.msra.mxu0 %v7093_v61  ;;  %4475 = vmatprep.mubr.f32.mxu0 %v7364_v9  ;;  %v7427_v57 = vadd.f32 %v2576_v45, %v2156_v46  ;;  %v8787_v45 = vld [vmem:[#allocation102_spill] sm:$0xff]  ;;  %v8793_v34 = vld [vmem:[#allocation112_spill] sm:$0xff] }
 0x318   :  { %4467 = vmatprep.subr.mxu0 %v7114_v18  ;;  %v2164_v51 = vpop.f32.mrf.mxu0  ;;  %v2609_v24 = vpop.f32.mrf.mxu1  ;;  %4493 = vmatpush3.msra.mxu1 %v7153_v42 }
 0x319   :  { %v2165_v20 = vadd.f32 %v2164_v51, %v7174_v2  ;;  %4468 = vmatpush3.msra.mxu0 %v7114_v18  ;;  %4516 = vmatprep.subr.mxu1 %v7005_v3 }
 0x31a   :  { %4469 = vmatprep.subr.mxu0 %v7133_v35  ;;  %v2166_v29 = vpop.f32.mrf.mxu0  ;;  %v2611_v61 = vpop.f32.mrf.mxu1  ;;  %4495 = vmatmul.mubr.f32.vlgmr.msra.gmra.mxu1 %v3549_v50 }
 0x31b   :  { %4470 = vmatpush3.msra.mxu0 %v7133_v35  ;;  %4517 = vmatpush3.msra.mxu1 %v7005_v3  ;;  %v7439_v9 = vadd.f32 %v2587_v39, %v2165_v20 }
 0x31c   :  { %4471 = vmatprep.subr.mxu0 %v7151_v48  ;;  %v2173_v2 = vpop.f32.mrf.mxu0  ;;  %v2620_v6 = vpop.f32.mrf.mxu1  ;;  %4518 = vmatprep.subr.mxu1 %v7023_v11 }
 0x31d   :  { %v2174_v18 = vadd.f32 %v2173_v2, %v7187_v47  ;;  %4472 = vmatpush3.msra.mxu0 %v7151_v48  ;;  %4519 = vmatpush3.msra.mxu1 %v7023_v11  ;;  %v8794_v2 = vld [vmem:[#allocation18_spill] sm:$0xff] }
 0x31e   :  { %4473 = vmatprep.subr.mxu0 %v7169_v16  ;;  %v2175_v50 = vpop.f32.mrf.mxu0  ;;  %v2622_v35 = vpop.f32.mrf.mxu1  ;;  %4520 = vmatprep.subr.mxu1 %v7044_v31 }
 0x31f   :  { %4474 = vmatpush3.msra.mxu0 %v7169_v16  ;;  %4521 = vmatpush3.msra.mxu1 %v7044_v31  ;;  %v7450_v3 = vadd.f32 %v2598_v23, %v2174_v18 }
 0x320   :  { %4476 = vmatmul.mubr.f32.vlgmr.msra.gmra.mxu0 %v7371_v60  ;;  %4497 = vmatprep.subr.mxu0 %v7039_v53  ;;  %v2182_v47 = vpop.f32.mrf.mxu0  ;;  %v2631_v48 = vpop.f32.mrf.mxu1 }
 0x321   :  { %v2183_v11 = vadd.f32 %v2182_v47, %v7197_v62  ;;  %4498 = vmatpush3.msra.mxu0 %v7039_v53  ;;  %4522 = vmatprep.subr.mxu1 %v7073_v7 }
 0x322   :  { %4499 = vmatprep.subr.mxu0 %v7060_v10  ;;  %v2184_v12 = vpop.f32.mrf.mxu0  ;;  %v2633_v16 = vpop.f32.mrf.mxu1  ;;  %4523 = vmatpush3.msra.mxu1 %v7073_v7 }
 0x323   :  { %4500 = vmatpush3.msra.mxu0 %v7060_v10  ;;  %4524 = vmatprep.subr.mxu1 %v7097_v37  ;;  %v7461_v31 = vadd.f32 %v2609_v24, %v2183_v11  ;;  %v8795_v11 = vld [vmem:[#allocation113_spill] sm:$0xff] }
 0x324   :  { %4501 = vmatprep.subr.mxu0 %v7083_v63  ;;  %v2191_v60 = vpop.f32.mrf.mxu0  ;;  %v2642_v62 = vpop.f32.mrf.mxu1  ;;  %4525 = vmatpush3.msra.mxu1 %v7097_v37 }
 0x325   :  { %v2192_v53 = vadd.f32 %v2191_v60, %v7205_v43  ;;  %4502 = vmatpush3.msra.mxu0 %v7083_v63  ;;  %4526 = vmatprep.subr.mxu1 %v7116_v8  ;;  %v8788_v63 = vld [vmem:[#allocation17_spill] sm:$0xff] }
 0x326   :  { %4503 = vmatprep.subr.mxu0 %v8786_v14  ;;  %v2193_v7 = vpop.f32.mrf.mxu0  ;;  %v2644_v10 = vpop.f32.mrf.mxu1  ;;  %4527 = vmatpush3.msra.mxu1 %v7116_v8 }
 0x327   :  { %4504 = vmatpush3.msra.mxu0 %v8786_v14  ;;  %4528 = vmatprep.subr.mxu1 %v7135_v5  ;;  %v7472_v52 = vadd.f32 %v2620_v6, %v2192_v53  ;;  %v8796_v14 = vld [vmem:[#allocation22_spill] sm:$0xff] }
 0x328   :  { %4505 = vmatprep.subr.mxu0 %v8787_v45  ;;  %v2200_v37 = vpop.f32.mrf.mxu0  ;;  %v2653_v43 = vpop.f32.mrf.mxu1  ;;  %4529 = vmatpush3.msra.mxu1 %v7135_v5 }
 0x329   :  { %v2201_v33 = vadd.f32 %v2200_v37, %v8788_v63  ;;  %4506 = vmatpush3.msra.mxu0 %v8787_v45  ;;  %4530 = vmatprep.subr.mxu1 %v7153_v42 }
 0x32a   :  { %4507 = vmatprep.subr.mxu0 %v8789_v19  ;;  %v2202_v8 = vpop.f32.mrf.mxu0  ;;  %v2655_v59 = vpop.f32.mrf.mxu1  ;;  %4513 = vmatprep.mubr.f32.mxu0 %v7352_v58 }
 0x32b   :  { %4508 = vmatpush3.msra.mxu0 %v8789_v19  ;;  %4531 = vmatpush3.msra.mxu1 %v7153_v42  ;;  %v7483_v49 = vadd.f32 %v2631_v48, %v2201_v33  ;;  %v8797_v33 = vld [vmem:[#allocation23_spill] sm:$0xff] }
 0x32c   :  { %4509 = vmatprep.subr.mxu0 %v8790_v54  ;;  %v2209_v5 = vpop.f32.mrf.mxu0  ;;  %v2664_v39 = vpop.f32.mrf.mxu1  ;;  %4532 = vmatprep.mubr.f32.mxu1 %v7352_v58 }
 0x32d   :  { %v2210_v0 = vadd.f32 %v2209_v5, %v8791_v13  ;;  %4510 = vmatpush3.msra.mxu0 %v8790_v54  ;;  %4533 = vmatmul.mubr.f32.vlgmr.msra.gmra.mxu1 %v7358_v1  ;;  %v8798_v13 = vld [vmem:[#allocation117_spill] sm:$0xff] }
 0x32e   :  { %4511 = vmatprep.subr.mxu0 %v8792_v17  ;;  %v2211_v4 = vpop.f32.mrf.mxu0  ;;  %v2666_v23 = vpop.f32.mrf.mxu1 }
 0x32f   :  { %4512 = vmatpush3.msra.mxu0 %v8792_v17  ;;  %v7492_v42 = vadd.f32 %v2642_v62, %v2210_v0 }
 0x330   :  { %4514 = vmatmul.mubr.f32.vlgmr.msra.gmra.mxu0 %v7358_v1  ;;  %v2218_v46 = vpop.f32.mrf.mxu0  ;;  %v2675_v30 = vpop.f32.mrf.mxu1 }
 0x331   :  { %v2219_v58 = vadd.f32 %v2218_v46, %v8793_v34  ;;  %v8799_v34 = vld [vmem:[#allocation19_spill] sm:$0xff] }
 0x332   :  { %v2220_v51 = vpop.f32.mrf.mxu0  ;;  %v2677_v24 = vpop.f32.mrf.mxu1 }
 0x333   :  { %v7496_v20 = vadd.f32 %v2653_v43, %v2219_v58 }
 0x334   :  { %v2227_v29 = vpop.f32.mrf.mxu0  ;;  %v2686_v61 = vpop.f32.mrf.mxu1 }
 0x335   :  { %v2228_v6 = vadd.f32 %v2227_v29, %v8794_v2 }
 0x336   :  { %v2229_v18 = vpop.f32.mrf.mxu0  ;;  %v2688_v50 = vpop.f32.mrf.mxu1 }
 0x337   :  { %v7499_v35 = vadd.f32 %v2664_v39, %v2228_v6  ;;  %v8800_v6 = vld [vmem:[#allocation24_spill] sm:$0xff] }
 0x338   :  { %v2236_v47 = vpop.f32.mrf.mxu0  ;;  %v2697_v48 = vpop.f32.mrf.mxu1 }
 0x339   :  { %v2237_v1 = vadd.f32 %v2236_v47, %v8795_v11 }
 0x33a   :  { %v2238_v12 = vpop.f32.mrf.mxu0  ;;  %v2699_v16 = vpop.f32.mrf.mxu1 }
 0x33b   :  { %v7502_v60 = vadd.f32 %v2675_v30, %v2237_v1 }
 0x33c   :  { %v2245_v62 = vpop.f32.mrf.mxu0  ;;  %v2708_v53 = vpop.f32.mrf.mxu1 }
 0x33d   :  { %v2246_v7 = vadd.f32 %v2245_v62, %v8796_v14 }
 0x33e   :  { %v2247_v10 = vpop.f32.mrf.mxu0  ;;  %v2710_v45 = vpop.f32.mrf.mxu1 }
 0x33f   :  { %v7505_v37 = vadd.f32 %v2686_v61, %v2246_v7 }
 0x340   :  { %v2254_v43 = vpop.f32.mrf.mxu0  ;;  %v2719_v63 = vpop.f32.mrf.mxu1 }
 0x341   :  { %v2255_v19 = vadd.f32 %v2254_v43, %v8797_v33 }
 0x342   :  { %v2256_v8 = vpop.f32.mrf.mxu0  ;;  %v2721_v59 = vpop.f32.mrf.mxu1 }
 0x343   :  { %v7508_v54 = vadd.f32 %v2697_v48, %v2255_v19 }
 0x344   :  { %v2263_v5 = vpop.f32.mrf.mxu0  ;;  %v2730_v39 = vpop.f32.mrf.mxu1 }
 0x345   :  { %v2264_v0 = vadd.f32 %v2263_v5, %v8798_v13 }
 0x346   :  { %v2265_v17 = vpop.f32.mrf.mxu0  ;;  %v2732_v4 = vpop.f32.mrf.mxu1 }
 0x347   :  { %v7511_v23 = vadd.f32 %v2708_v53, %v2264_v0 }
 0x348   :  { %v2272_v46 = vpop.f32.mrf.mxu0  ;;  %v3219_v30 = vpop.f32.mrf.mxu1 }
 0x349   :  { %v2273_v58 = vadd.f32 %v2272_v46, %v8799_v34 }
 0x34a   :  { %v2274_v51 = vpop.f32.mrf.mxu0  ;;  %v3221_v24 = vpop.f32.mrf.mxu1 }
 0x34b   :  { %v7514_v29 = vadd.f32 %v2719_v63, %v2273_v58 }
 0x34c   :  { %v2281_v61 = vpop.f32.mrf.mxu0  ;;  %v3226_v2 = vpop.f32.mrf.mxu1 }
 0x34d   :  { %v2282_v18 = vadd.f32 %v2281_v61, %v8800_v6 }
 0x34e   :  { %v2283_v50 = vpop.f32.mrf.mxu0  ;;  %v3228_v47 = vpop.f32.mrf.mxu1 }
 0x34f   :  { %v7517_v48 = vadd.f32 %v2730_v39, %v2282_v18 }
 0x350   :  { %v2898_v11 = vpop.f32.mrf.mxu0  ;;  %v3233_v1 = vpop.f32.mrf.mxu1 }
 0x351   :  { %v2899_v12 = vadd.f32 %v2898_v11, %v7280_v38 }
 0x352   :  { %v2900_v16 = vpop.f32.mrf.mxu0  ;;  %v3235_v62 = vpop.f32.mrf.mxu1 }
 0x353   :  { %v7520_v7 = vadd.f32 %v3219_v30, %v2899_v12 }
 0x354   :  { %v2905_v53 = vpop.f32.mrf.mxu0  ;;  %v3240_v14 = vpop.f32.mrf.mxu1 }
 0x355   :  { %v2906_v10 = vadd.f32 %v2905_v53, %v7287_v41  ;;  %v4193_v8 = vrot.slane %v7520_v7, 7 }
 0x356   :  { %v2907_v45 = vpop.f32.mrf.mxu0  ;;  %v3242_v43 = vpop.f32.mrf.mxu1 }
 0x357   :  { %v3227_v63 = vadd.f32 %v3226_v2, %v2906_v10 }
 0x358   :  { %v2912_v33 = vpop.f32.mrf.mxu0  ;;  %v3247_v19 = vpop.f32.mrf.mxu1 }
 0x359   :  { %v4194_v59 = vrot.slane %v3227_v63, 7  ;;  %v2913_v5 = vadd.f32 %v2912_v33, %v7294_v44 }
 0x35a   :  { %v2914_v38 = vpop.f32.mrf.mxu0  ;;  %v3249_v39 = vpop.f32.mrf.mxu1 }
 0x35b   :  { %v4195_v13 = vsel %vm4192_vm1, %v4193_v8, %v4194_v59  ;;  %4307 = vst [vmem:[%s7850_s7 + $0x10] sm:$0x1] %v4194_v59  ;;  %v7534_v17 = vadd.f32 %v3233_v1, %v2913_v5  ;;  %v8801_v59 = vld [vmem:[#allocation20_spill] sm:$0xff] }
 0x35c   :  { %4306 = vst [vmem:[%s7850_s7 + $0x8] sm:$0xff] %v4195_v13  ;;  %v2919_v41 = vpop.f32.mrf.mxu0  ;;  %v3254_v0 = vpop.f32.mrf.mxu1 }
 0x35d   :  { %v2920_v44 = vadd.f32 %v2919_v41, %v7301_v21  ;;  %v4196_v51 = vrot.slane %v7534_v17, 7 }
 0x35e   :  { %v2921_v4 = vpop.f32.mrf.mxu0  ;;  %v3256_v46 = vpop.f32.mrf.mxu1 }
 0x35f   :  { %v3241_v30 = vadd.f32 %v3240_v14, %v2920_v44  ;;  %v8802_v4 = vld [vmem:[#allocation26_spill] sm:$0xff] }
 0x360   :  { %v2926_v34 = vpop.f32.mrf.mxu0  ;;  %v3261_v58 = vpop.f32.mrf.mxu1 }
 0x361   :  { %v4197_v24 = vrot.slane %v3241_v30, 7  ;;  %v2927_v61 = vadd.f32 %v2926_v34, %v7308_v36 }
 0x362   :  { %v2928_v2 = vpop.f32.mrf.mxu0  ;;  %v3263_v6 = vpop.f32.mrf.mxu1 }
 0x363   :  { %v4198_v18 = vsel %vm4192_vm1, %v4196_v51, %v4197_v24  ;;  %4310 = vst [vmem:[%s7850_s7 + $0x28] sm:$0x1] %v4197_v24  ;;  %v7548_v47 = vadd.f32 %v3247_v19, %v2927_v61 }
 0x364   :  { %4309 = vst [vmem:[%s7850_s7 + $0x20] sm:$0xff] %v4198_v18  ;;  %v2933_v21 = vpop.f32.mrf.mxu0  ;;  %v3268_v50 = vpop.f32.mrf.mxu1 }
 0x365   :  { %v2934_v36 = vadd.f32 %v2933_v21, %v7315_v55  ;;  %v4199_v53 = vrot.slane %v7548_v47, 7 }
 0x366   :  { %v2935_v11 = vpop.f32.mrf.mxu0  ;;  %v3270_v1 = vpop.f32.mrf.mxu1 }
 0x367   :  { %v3255_v12 = vadd.f32 %v3254_v0, %v2934_v36 }
 0x368   :  { %v2940_v16 = vpop.f32.mrf.mxu0  ;;  %v3275_v62 = vpop.f32.mrf.mxu1 }
 0x369   :  { %v4200_v14 = vrot.slane %v3255_v12, 7  ;;  %v2941_v10 = vadd.f32 %v2940_v16, %v7322_v22 }
 0x36a   :  { %v2942_v45 = vpop.f32.mrf.mxu0  ;;  %v3277_v43 = vpop.f32.mrf.mxu1 }
 0x36b   :  { %v4201_v63 = vsel %vm4192_vm1, %v4199_v53, %v4200_v14  ;;  %4313 = vst [vmem:[%s7850_s7 + $0x40] sm:$0x1] %v4200_v14  ;;  %v7562_v19 = vadd.f32 %v3261_v58, %v2941_v10 }
 0x36c   :  { %4312 = vst [vmem:[%s7850_s7 + $0x38] sm:$0xff] %v4201_v63  ;;  %v2947_v55 = vpop.f32.mrf.mxu0  ;;  %v3282_v33 = vpop.f32.mrf.mxu1 }
 0x36d   :  { %v2948_v22 = vadd.f32 %v2947_v55, %v8801_v59  ;;  %v4202_v0 = vrot.slane %v7562_v19, 7 }
 0x36e   :  { %v2949_v5 = vpop.f32.mrf.mxu0  ;;  %v3284_v38 = vpop.f32.mrf.mxu1 }
 0x36f   :  { %v3269_v39 = vadd.f32 %v3268_v50, %v2948_v22 }
 0x370   :  { %v2954_v13 = vpop.f32.mrf.mxu0  ;;  %v3289_v41 = vpop.f32.mrf.mxu1 }
 0x371   :  { %v4203_v44 = vrot.slane %v3269_v39, 7  ;;  %v2955_v46 = vadd.f32 %v2954_v13, %v8802_v4 }
 0x372   :  { %v2956_v30 = vpop.f32.mrf.mxu0  ;;  %v3291_v34 = vpop.f32.mrf.mxu1 }
 0x373   :  { %v4204_v24 = vsel %vm4192_vm1, %v4202_v0, %v4203_v44  ;;  %4316 = vst [vmem:[%s7850_s7 + $0x58] sm:$0x1] %v4203_v44  ;;  %v7576_v2 = vadd.f32 %v3275_v62, %v2955_v46 }
 0x374   :  { %4315 = vst [vmem:[%s7850_s7 + $0x50] sm:$0xff] %v4204_v24  ;;  %v2961_v58 = vpop.f32.mrf.mxu0  ;;  %v3296_v61 = vpop.f32.mrf.mxu1 }
 0x375   :  { %v2962_v6 = vadd.f32 %v2961_v58, %v7344_v25  ;;  %v4205_v1 = vrot.slane %v7576_v2, 7 }
 0x376   :  { %v2963_v18 = vpop.f32.mrf.mxu0  ;;  %v3298_v21 = vpop.f32.mrf.mxu1 }
 0x377   :  { %v3283_v50 = vadd.f32 %v3282_v33, %v2962_v6 }
 0x378   :  { %v2968_v36 = vpop.f32.mrf.mxu0  ;;  %v3303_v11 = vpop.f32.mrf.mxu1 }
 0x379   :  { %v4206_v12 = vrot.slane %v3283_v50, 7  ;;  %v2969_v16 = vadd.f32 %v2968_v36, %v7354_v28 }
 0x37a   :  { %v2970_v14 = vpop.f32.mrf.mxu0  ;;  %v3305_v10 = vpop.f32.mrf.mxu1 }
 0x37b   :  { %v4207_v45 = vsel %vm4192_vm1, %v4205_v1, %v4206_v12  ;;  %4319 = vst [vmem:[%s7850_s7 + $0x70] sm:$0x1] %v4206_v12  ;;  %v7590_v43 = vadd.f32 %v3289_v41, %v2969_v16 }
 0x37c   :  { %4318 = vst [vmem:[%s7850_s7 + $0x68] sm:$0xff] %v4207_v45  ;;  %v2975_v25 = vpop.f32.mrf.mxu0  ;;  %v3310_v62 = vpop.f32.mrf.mxu1 }
 0x37d   :  { %v2976_v28 = vadd.f32 %v2975_v25, %v7366_v26  ;;  %v4208_v5 = vrot.slane %v7590_v43, 7 }
 0x37e   :  { %v2977_v63 = vpop.f32.mrf.mxu0  ;;  %v3312_v55 = vpop.f32.mrf.mxu1 }
 0x37f   :  { %v3297_v33 = vadd.f32 %v3296_v61, %v2976_v28 }
 0x380   :  { %v2982_v59 = vpop.f32.mrf.mxu0  ;;  %v3317_v22 = vpop.f32.mrf.mxu1 }
 0x381   :  { %v4209_v38 = vrot.slane %v3297_v33, 7  ;;  %v2983_v39 = vadd.f32 %v2982_v59, %v7377_v32 }
 0x382   :  { %v2984_v13 = vpop.f32.mrf.mxu0  ;;  %v3319_v44 = vpop.f32.mrf.mxu1 }
 0x383   :  { %v4210_v4 = vsel %vm4192_vm1, %v4208_v5, %v4209_v38  ;;  %4322 = vst [vmem:[%s7850_s7 + $0x88] sm:$0x1] %v4209_v38  ;;  %v7604_v46 = vadd.f32 %v3303_v11, %v2983_v39 }
 0x384   :  { %4321 = vst [vmem:[%s7850_s7 + $0x80] sm:$0xff] %v4210_v4  ;;  %v2989_v26 = vpop.f32.mrf.mxu0  ;;  %v3324_v41 = vpop.f32.mrf.mxu1 }
 0x385   :  { %v2990_v32 = vadd.f32 %v2989_v26, %v7386_v15  ;;  %v4211_v6 = vrot.slane %v7604_v46, 7 }
 0x386   :  { %v2991_v30 = vpop.f32.mrf.mxu0  ;;  %v3326_v34 = vpop.f32.mrf.mxu1 }
 0x387   :  { %v3311_v24 = vadd.f32 %v3310_v62, %v2990_v32 }
 0x388   :  { %v2996_v58 = vpop.f32.mrf.mxu0  ;;  %v3331_v61 = vpop.f32.mrf.mxu1 }
 0x389   :  { %v4212_v18 = vrot.slane %v3311_v24, 7  ;;  %v2997_v21 = vadd.f32 %v2996_v58, %v7398_v40 }
 0x38a   :  { %v2998_v50 = vpop.f32.mrf.mxu0  ;;  %v3333_v36 = vpop.f32.mrf.mxu1 }
 0x38b   :  { %v4213_v12 = vsel %vm4192_vm1, %v4211_v6, %v4212_v18  ;;  %4325 = vst [vmem:[%s7850_s7 + $0xa0] sm:$0x1] %v4212_v18  ;;  %v7618_v16 = vadd.f32 %v3317_v22, %v2997_v21 }
 0x38c   :  { %4324 = vst [vmem:[%s7850_s7 + $0x98] sm:$0xff] %v4213_v12  ;;  %v3003_v15 = vpop.f32.mrf.mxu0  ;;  %v3338_v11 = vpop.f32.mrf.mxu1 }
 0x38d   :  { %v3004_v40 = vadd.f32 %v3003_v15, %v7406_v56  ;;  %v4214_v28 = vrot.slane %v7618_v16, 7 }
 0x38e   :  { %v3005_v14 = vpop.f32.mrf.mxu0  ;;  %v3340_v10 = vpop.f32.mrf.mxu1 }
 0x38f   :  { %v3325_v45 = vadd.f32 %v3324_v41, %v3004_v40 }
 0x390   :  { %v3010_v25 = vpop.f32.mrf.mxu0  ;;  %v3345_v62 = vpop.f32.mrf.mxu1 }
 0x391   :  { %v4215_v63 = vrot.slane %v3325_v45, 7  ;;  %v3011_v55 = vadd.f32 %v3010_v25, %v7416_v27 }
 0x392   :  { %v3012_v33 = vpop.f32.mrf.mxu0  ;;  %v3347_v59 = vpop.f32.mrf.mxu1 }
 0x393   :  { %v4216_v38 = vsel %vm4192_vm1, %v4214_v28, %v4215_v63  ;;  %4328 = vst [vmem:[%s7850_s7 + $0xb8] sm:$0x1] %v4215_v63  ;;  %v7632_v39 = vadd.f32 %v3331_v61, %v3011_v55 }
 0x394   :  { %4327 = vst [vmem:[%s7850_s7 + $0xb0] sm:$0xff] %v4216_v38  ;;  %v3017_v56 = vpop.f32.mrf.mxu0  ;;  %v3352_v22 = vpop.f32.mrf.mxu1 }
 0x395   :  { %v3018_v27 = vadd.f32 %v3017_v56, %v7427_v57  ;;  %v4217_v32 = vrot.slane %v7632_v39, 7 }
 0x396   :  { %v3019_v13 = vpop.f32.mrf.mxu0  ;;  %v3354_v44 = vpop.f32.mrf.mxu1 }
 0x397   :  { %v3339_v4 = vadd.f32 %v3338_v11, %v3018_v27 }
 0x398   :  { %v3024_v26 = vpop.f32.mrf.mxu0  ;;  %v3359_v41 = vpop.f32.mrf.mxu1 }
 0x399   :  { %v4218_v30 = vrot.slane %v3339_v4, 7  ;;  %v3025_v34 = vadd.f32 %v3024_v26, %v7439_v9 }
 0x39a   :  { %v3026_v24 = vpop.f32.mrf.mxu0  ;;  %v3361_v58 = vpop.f32.mrf.mxu1 }
 0x39b   :  { %v4219_v18 = vsel %vm4192_vm1, %v4217_v32, %v4218_v30  ;;  %4331 = vst [vmem:[%s7850_s7 + $0xd0] sm:$0x1] %v4218_v30  ;;  %v7646_v21 = vadd.f32 %v3345_v62, %v3025_v34 }
 0x39c   :  { %4330 = vst [vmem:[%s7850_s7 + $0xc8] sm:$0xff] %v4219_v18  ;;  %v3031_v57 = vpop.f32.mrf.mxu0  ;;  %v3366_v61 = vpop.f32.mrf.mxu1 }
 0x39d   :  { %v3032_v9 = vadd.f32 %v3031_v57, %v7450_v3  ;;  %v4220_v40 = vrot.slane %v7646_v21, 7 }
 0x39e   :  { %v3033_v50 = vpop.f32.mrf.mxu0  ;;  %v3368_v36 = vpop.f32.mrf.mxu1 }
 0x39f   :  { %v3353_v12 = vadd.f32 %v3352_v22, %v3032_v9 }
 0x3a0   :  { %v3038_v15 = vpop.f32.mrf.mxu0  ;;  %v3373_v11 = vpop.f32.mrf.mxu1 }
 0x3a1   :  { %v4221_v14 = vrot.slane %v3353_v12, 7  ;;  %v3039_v10 = vadd.f32 %v3038_v15, %v7461_v31 }
 0x3a2   :  { %v3040_v45 = vpop.f32.mrf.mxu0  ;;  %v3375_v25 = vpop.f32.mrf.mxu1 }
 0x3a3   :  { %v4222_v63 = vsel %vm4192_vm1, %v4220_v40, %v4221_v14  ;;  %4334 = vst [vmem:[%s7850_s7 + $0xe8] sm:$0x1] %v4221_v14  ;;  %v7660_v55 = vadd.f32 %v3359_v41, %v3039_v10 }
 0x3a4   :  { %4333 = vst [vmem:[%s7850_s7 + $0xe0] sm:$0xff] %v4222_v63  ;;  %v3045_v3 = vpop.f32.mrf.mxu0  ;;  %v3380_v62 = vpop.f32.mrf.mxu1 }
 0x3a5   :  { %v3046_v31 = vadd.f32 %v3045_v3, %v7472_v52  ;;  %v4223_v27 = vrot.slane %v7660_v55, 7 }
 0x3a6   :  { %v3047_v33 = vpop.f32.mrf.mxu0  ;;  %v3382_v59 = vpop.f32.mrf.mxu1 }
 0x3a7   :  { %v3367_v38 = vadd.f32 %v3366_v61, %v3046_v31 }
 0x3a8   :  { %v3052_v56 = vpop.f32.mrf.mxu0  ;;  %v3387_v22 = vpop.f32.mrf.mxu1 }
 0x3a9   :  { %v4224_v13 = vrot.slane %v3367_v38, 7  ;;  %v3053_v44 = vadd.f32 %v3052_v56, %v7483_v49 }
 0x3aa   :  { %v3054_v4 = vpop.f32.mrf.mxu0  ;;  %v3389_v26 = vpop.f32.mrf.mxu1 }
 0x3ab   :  { %v4225_v30 = vsel %vm4192_vm1, %v4223_v27, %v4224_v13  ;;  %4337 = vst [vmem:[%s7850_s7 + $0x100] sm:$0x1] %v4224_v13  ;;  %v7674_v34 = vadd.f32 %v3373_v11, %v3053_v44 }
 0x3ac   :  { %4336 = vst [vmem:[%s7850_s7 + $0xf8] sm:$0xff] %v4225_v30  ;;  %v3059_v52 = vpop.f32.mrf.mxu0  ;;  %v3394_v41 = vpop.f32.mrf.mxu1 }
 0x3ad   :  { %v3060_v49 = vadd.f32 %v3059_v52, %v7492_v42  ;;  %v4226_v9 = vrot.slane %v7674_v34, 7 }
 0x3ae   :  { %v3061_v24 = vpop.f32.mrf.mxu0  ;;  %v3396_v58 = vpop.f32.mrf.mxu1 }
 0x3af   :  { %v3381_v18 = vadd.f32 %v3380_v62, %v3060_v49 }
 0x3b0   :  { %v3066_v57 = vpop.f32.mrf.mxu0  ;;  %v3401_v61 = vpop.f32.mrf.mxu1 }
 0x3b1   :  { %v4227_v50 = vrot.slane %v3381_v18, 7  ;;  %v3067_v36 = vadd.f32 %v3066_v57, %v7496_v20 }
 0x3b2   :  { %v3068_v12 = vpop.f32.mrf.mxu0  ;;  %v3403_v15 = vpop.f32.mrf.mxu1 }
 0x3b3   :  { %v4228_v14 = vsel %vm4192_vm1, %v4226_v9, %v4227_v50  ;;  %4340 = vst [vmem:[%s7850_s7 + $0x118] sm:$0x1] %v4227_v50  ;;  %v7688_v10 = vadd.f32 %v3387_v22, %v3067_v36 }
 0x3b4   :  { %4339 = vst [vmem:[%s7850_s7 + $0x110] sm:$0xff] %v4228_v14  ;;  %v3073_v42 = vpop.f32.mrf.mxu0  ;;  %v3408_v11 = vpop.f32.mrf.mxu1 }
 0x3b5   :  { %v3074_v20 = vadd.f32 %v3073_v42, %v7499_v35  ;;  %v4229_v31 = vrot.slane %v7688_v10, 7 }
 0x3b6   :  { %v3075_v45 = vpop.f32.mrf.mxu0  ;;  %v3410_v25 = vpop.f32.mrf.mxu1 }
 0x3b7   :  { %v3395_v63 = vadd.f32 %v3394_v41, %v3074_v20 }
 0x3b8   :  { %v3080_v3 = vpop.f32.mrf.mxu0  ;;  %v3415_v62 = vpop.f32.mrf.mxu1 }
 0x3b9   :  { %v4230_v33 = vrot.slane %v3395_v63, 7  ;;  %v3081_v59 = vadd.f32 %v3080_v3, %v7502_v60 }
 0x3ba   :  { %v3082_v38 = vpop.f32.mrf.mxu0  ;;  %v3417_v56 = vpop.f32.mrf.mxu1 }
 0x3bb   :  { %v4231_v13 = vsel %vm4192_vm1, %v4229_v31, %v4230_v33  ;;  %4343 = vst [vmem:[%s7850_s7 + $0x130] sm:$0x1] %v4230_v33  ;;  %v7702_v44 = vadd.f32 %v3401_v61, %v3081_v59 }
 0x3bc   :  { %4342 = vst [vmem:[%s7850_s7 + $0x128] sm:$0xff] %v4231_v13  ;;  %v3087_v35 = vpop.f32.mrf.mxu0  ;;  %v3422_v22 = vpop.f32.mrf.mxu1 }
 0x3bd   :  { %v3088_v60 = vadd.f32 %v3087_v35, %v7505_v37  ;;  %v4232_v49 = vrot.slane %v7702_v44, 7 }
 0x3be   :  { %v3089_v4 = vpop.f32.mrf.mxu0  ;;  %v3424_v26 = vpop.f32.mrf.mxu1 }
 0x3bf   :  { %v3409_v30 = vadd.f32 %v3408_v11, %v3088_v60 }
 0x3c0   :  { %v3094_v52 = vpop.f32.mrf.mxu0  ;;  %v3429_v41 = vpop.f32.mrf.mxu1 }
 0x3c1   :  { %v4233_v24 = vrot.slane %v3409_v30, 7  ;;  %v3095_v58 = vadd.f32 %v3094_v52, %v7508_v54 }
 0x3c2   :  { %v3096_v18 = vpop.f32.mrf.mxu0  ;;  %v3431_v57 = vpop.f32.mrf.mxu1 }
 0x3c3   :  { %v4234_v50 = vsel %vm4192_vm1, %v4232_v49, %v4233_v24  ;;  %4346 = vst [vmem:[%s7850_s7 + $0x148] sm:$0x1] %v4233_v24  ;;  %v7716_v36 = vadd.f32 %v3415_v62, %v3095_v58 }
 0x3c4   :  { %4345 = vst [vmem:[%s7850_s7 + $0x140] sm:$0xff] %v4234_v50  ;;  %v3101_v37 = vpop.f32.mrf.mxu0  ;;  %v3436_v61 = vpop.f32.mrf.mxu1 }
 0x3c5   :  { %v3102_v54 = vadd.f32 %v3101_v37, %v7511_v23  ;;  %v4235_v11 = vrot.slane %v7716_v36, 7 }
 0x3c6   :  { %v3103_v12 = vpop.f32.mrf.mxu0  ;;  %v3438_v15 = vpop.f32.mrf.mxu1 }
 0x3c7   :  { %v3423_v14 = vadd.f32 %v3422_v22, %v3102_v54 }
 0x3c8   :  { %v3108_v42 = vpop.f32.mrf.mxu0  ;;  %v4458_v35 = vpop.f32.mrf.mxu1 }
 0x3c9   :  { %v4236_v20 = vrot.slane %v3423_v14, 7  ;;  %v3109_v45 = vadd.f32 %v3108_v42, %v7514_v29 }
 0x3ca   :  { %v3110_v25 = vpop.f32.mrf.mxu0  ;;  %v3664_v30 = vpop.f32.mrf.mxu1 }
 0x3cb   :  { %v4237_v63 = vsel %vm4192_vm1, %v4235_v11, %v4236_v20  ;;  %4349 = vst [vmem:[%s7850_s7 + $0x160] sm:$0x1] %v4236_v20  ;;  %v7730_v3 = vadd.f32 %v3429_v41, %v3109_v45  ;;  %v4727_v41 = vmov 1966171168   ;;  %v8803_v45 = vld [vmem:[#allocation103_spill] sm:$0xff] }
 0x3cc   :  { %4348 = vst [vmem:[%s7850_s7 + $0x158] sm:$0xff] %v4237_v63  ;;  %v3115_v23 = vpop.f32.mrf.mxu0  ;;  %v4048_v24 = vunpack.c.l.s4 %v4727_v41 }
 0x3cd   :  { %v3116_v62 = vadd.f32 %v3115_v23, %v7517_v48  ;;  %v4238_v59 = vrot.slane %v7730_v3, 7  ;;  %v4360_v48 = vld [vmem:[%s7849_s6] ss:$0 sm:$0xff] }
 0x3ce   :  { %v3117_v33 = vpop.f32.mrf.mxu0 }
 0x3cf   :  { %v3437_v29 = vadd.f32 %v3436_v61, %v3116_v62  ;;  %v4049_v61 = vunpack.c.0.s8 %v4048_v24 }
 0x3d0   :  { %v4439_v13 = vpop.f32.mrf.mxu0 }
 0x3d1   :  { %v4239_v38 = vrot.slane %v3437_v29, 7  ;;  %v3554_v60 = vadd.f32 %v4439_v13, %v4360_v48  ;;  %v4052_v25 = vsub.s32 %v4049_v61, %v8803_v45 }
 0x3d2   :  { %v3543_v22 = vpop.f32.mrf.mxu0 }
 0x3d3   :  { %v4240_v56 = vsel %vm4192_vm1, %v4238_v59, %v4239_v38  ;;  %4352 = vst [vmem:[%s7850_s7 + $0x178] sm:$0x1] %v4239_v38  ;;  %v3544_v26 = vadd.f32 %v4360_v48, %v3543_v22  ;;  %v3671_v52 = vadd.f32 %v4458_v35, %v3554_v60 }
 0x3d4   :  { %4351 = vst [vmem:[%s7850_s7 + $0x170] sm:$0xff] %v4240_v56 }
 0x3d5   :  { %v3665_v57 = vadd.f32 %v3664_v30, %v3544_v26 }
 0x3da   :  { %v4496_v58 = vpop.f32.mrf.mxu1 }
 0x3dc   :  { %v3846_v54 = vpop.f32.mrf.mxu1 }
 0x3e0   :  { %v4477_v4 = vpop.f32.mrf.mxu0 }
 0x3e1   :  { %v3766_v50 = vadd.f32 %v4477_v4, %v3671_v52 }
 0x3e2   :  { %v3758_v18 = vpop.f32.mrf.mxu0 }
 0x3e3   :  { %v3759_v37 = vadd.f32 %v3758_v18, %v3665_v57  ;;  %v3855_v12 = vadd.f32 %v4496_v58, %v3766_v50 }
 0x3e5   :  { %v3847_v42 = vadd.f32 %v3846_v54, %v3759_v37 }
 0x3ed   :  { %v4534_v14 = vpop.f32.mrf.mxu1 }
 0x3ef   :  { %v4034_v33 = vpop.f32.mrf.mxu1 }
 0x3f0   :  { %v4515_v15 = vpop.f32.mrf.mxu0 }
 0x3f1   :  { %v3956_v20 = vadd.f32 %v4515_v15, %v3855_v12 }
 0x3f2   :  { %v3949_v63 = vpop.f32.mrf.mxu0 }
 0x3f3   :  { %v4041_v23 = vadd.f32 %v4534_v14, %v3956_v20  ;;  %v3950_v62 = vadd.f32 %v3949_v63, %v3847_v42 }
 0x3f5   :  { %v4095_v29 = vcombine.high %v4041_v23, %v4041_v23  ;;  %v4102_v38 = vrot.slane %v4041_v23, %v4052_v25  ;;  %v4035_v56 = vadd.f32 %v4034_v33, %v3950_v62 }
 0x3f7   :  { %v4109_v13 = vrot.slane %v4095_v29, %v4052_v25  ;;  %v4110_v48 = vcombine.high %v4102_v38, %v4102_v38  ;;  %v4118_v35 = vrot.slane %v4102_v38, %v4052_v25  ;;  %v4046_v22 = vcombine.high %v4035_v56, %v4035_v56 }
 0x3f8   :  { %v4053_v60 = vrot.slane %v4035_v56, %v4052_v25 }
 0x3f9   :  { %v4111_v4 = vcombine.high %v4109_v13, %v4109_v13  ;;  %v4125_v26 = vrot.slane %v4109_v13, %v4052_v25  ;;  %v4132_v30 = vrot.slane %v4110_v48, %v4052_v25  ;;  %v4140_v52 = vcombine.high %v4118_v35, %v4118_v35 }
 0x3fa   :  { %v4297_v41 = vsel %vm4192_vm1, %v4118_v35, %v4217_v32  ;;  %v4060_v24 = vrot.slane %v4046_v22, %v4052_v25  ;;  %v4061_v58 = vcombine.high %v4053_v60, %v4053_v60  ;;  %v4069_v18 = vrot.slane %v4053_v60, %v4052_v25 }
 0x3fb   :  { %v4139_v57 = vrot.slane %v4111_v4, %v4052_v25  ;;  %v4141_v50 = vcombine.high %v4125_v26, %v4125_v26  ;;  %v4142_v37 = vcombine.high %v4132_v30, %v4132_v30  ;;  %v4298_v61 = vsel %vm4192_vm1, %v4132_v30, %v4220_v40  ;;  %4329 = vst [vmem:[%s7850_s7 + $0xc0] sm:$0xff] %v4297_v41 }
 0x3fc   :  { %v4299_v39 = vsel %vm4192_vm1, %v4140_v52, %v4223_v27  ;;  %v4301_v32 = vsel %vm4192_vm1, %v4125_v26, %v4229_v31  ;;  %4332 = vst [vmem:[%s7850_s7 + $0xd8] sm:$0xff] %v4298_v61  ;;  %v4062_v54 = vcombine.high %v4060_v24, %v4060_v24  ;;  %v4076_v21 = vrot.slane %v4060_v24, %v4052_v25 }
 0x3fd   :  { %v4143_v12 = vcombine.high %v4139_v57, %v4139_v57  ;;  %v4300_v40 = vsel %vm4192_vm1, %v4142_v37, %v4226_v9  ;;  %v4302_v55 = vsel %vm4192_vm1, %v4139_v57, %v4232_v49  ;;  %v4303_v27 = vsel %vm4192_vm1, %v4141_v50, %v4235_v11  ;;  %4335 = vst [vmem:[%s7850_s7 + $0xf0] sm:$0xff] %v4299_v39 }
 0x3fe   :  { %4341 = vst [vmem:[%s7850_s7 + $0x120] sm:$0xff] %v4301_v32  ;;  %4338 = vst [vmem:[%s7850_s7 + $0x108] sm:$0xff] %v4300_v40  ;;  %v4083_v34 = vrot.slane %v4061_v58, %v4052_v25  ;;  %v4090_v9 = vrot.slane %v4062_v54, %v4052_v25  ;;  %v4091_v10 = vcombine.high %v4069_v18, %v4069_v18 }
 0x3ff   :  { %4344 = vst [vmem:[%s7850_s7 + $0x138] sm:$0xff] %v4302_v55  ;;  %4347 = vst [vmem:[%s7850_s7 + $0x150] sm:$0xff] %v4303_v27  ;;  %v4092_v31 = vcombine.high %v4076_v21, %v4076_v21  ;;  %v4304_v44 = vsel %vm4192_vm1, %v4143_v12, %v4238_v59  ;;  %v4289_v49 = vsel %vm4192_vm1, %v4069_v18, %v4193_v8 }
 0x400   :  { %v4293_v36 = vsel %vm4192_vm1, %v4076_v21, %v4205_v1  ;;  %4350 = vst [vmem:[%s7850_s7 + $0x168] sm:$0xff] %v4304_v44  ;;  %v4093_v11 = vcombine.high %v4083_v34, %v4083_v34  ;;  %v4094_v15 = vcombine.high %v4090_v9, %v4090_v9  ;;  %v4290_v3 = vsel %vm4192_vm1, %v4083_v34, %v4196_v51 }
 0x401   :  { %v4291_v7 = vsel %vm4192_vm1, %v4091_v10, %v4199_v53  ;;  %4305 = vst [vmem:[%s7850_s7] sm:$0xff] %v4289_v49  ;;  %4317 = vst [vmem:[%s7850_s7 + $0x60] sm:$0xff] %v4293_v36  ;;  %v4294_v8 = vsel %vm4192_vm1, %v4090_v9, %v4208_v5  ;;  %v4295_v17 = vsel %vm4192_vm1, %v4092_v31, %v4211_v6 }
 0x402   :  { %4308 = vst [vmem:[%s7850_s7 + $0x18] sm:$0xff] %v4290_v3  ;;  %4311 = vst [vmem:[%s7850_s7 + $0x30] sm:$0xff] %v4291_v7  ;;  %v4292_v51 = vsel %vm4192_vm1, %v4093_v11, %v4202_v0  ;;  %v4296_v47 = vsel %vm4192_vm1, %v4094_v15, %v4214_v28 }
 0x403   :  { %4320 = vst [vmem:[%s7850_s7 + $0x78] sm:$0xff] %v4294_v8  ;;  %4323 = vst [vmem:[%s7850_s7 + $0x90] sm:$0xff] %v4295_v17 }
 0x404   :  { %4314 = vst [vmem:[%s7850_s7 + $0x48] sm:$0xff] %v4292_v51  ;;  %4326 = vst [vmem:[%s7850_s7 + $0xa8] sm:$0xff] %v4296_v47 }
 0x405   :  { %4357 = vsyncpa [#allocation3], 1 }
 0x406   :  { %4358 = vsyncpa [#allocation5], 1 }
 0x407   :  { %4359 = vsyncpa [#allocation8], 1 }

</bundles_post_ra>
